<compile_context>
chip_gen: v7x
topology: tpu7x:2x2x1
jax: 0.10.0
libtpu: 0.0.40
codegen_flags: <defaults>
</compile_context>

<pallas_src>
import jax
import jax.numpy as jnp
from jax.experimental import pallas as pl
from jax.experimental.pallas import tpu as pltpu

C_FEAT = 1024                 # backbone channels / LSTM input_size
REDUCTION = 16
C_RED = C_FEAT // REDUCTION   # 64
LSTM_HIDDEN = 256
CLS_IN = 2 * LSTM_HIDDEN      # 512 (bidirectional concat)
NUM_CLASSES = 2
TB = 8                        # batch tile (sublane multiple)


def rdodl_kernel(x_ref, w1_ref, b1_ref, w2_ref, b2_ref,
                 wih_ref, bias_ref, wclsf_ref, wclsb_ref, bcls_ref, out_ref):
    feat = x_ref[...]                                  # (TB, C) f32
    feat_bf = feat.astype(jnp.bfloat16)

    # ---- CBAM channel attention (avg_pool == max_pool when H*W == 1) ------
    h1 = jnp.dot(feat_bf, w1_ref[...],
                 preferred_element_type=jnp.float32) + b1_ref[...]
    h1 = jnp.maximum(h1, 0.0)
    mlp = jnp.dot(h1.astype(jnp.bfloat16), w2_ref[...],
                  preferred_element_type=jnp.float32) + b2_ref[...]
    att = jax.nn.sigmoid(mlp + mlp)                    # == sigmoid(fc(avg)+fc(max))
    xs = (feat * att).astype(jnp.bfloat16)             # x * out.expand_as(x)

    # ---- bidirectional LSTM, seq_len == 1, h0 == c0 == 0 -------------------
    # wih packs [i_f, g_f, o_f, i_b, g_b, o_b] (forget gate pruned: f*c0 == 0),
    # bias already holds b_ih + b_hh; the h0 @ W_hh term is exactly zero.
    gates = jnp.dot(xs, wih_ref[...],
                    preferred_element_type=jnp.float32) + bias_ref[...]
    H = LSTM_HIDDEN

    def cell(off):
        i = jax.nn.sigmoid(gates[:, off:off + H])
        g = jnp.tanh(gates[:, off + H:off + 2 * H])
        o = jax.nn.sigmoid(gates[:, off + 2 * H:off + 3 * H])
        return o * jnp.tanh(i * g)                     # c1 = i*g  (f*c0 == 0)

    h_fwd = cell(0)
    h_bwd = cell(3 * H)

    # ---- classifier: split weight avoids lane-axis concat of h_fwd/h_bwd ---
    out_ref[...] = (
        jnp.dot(h_fwd.astype(jnp.bfloat16), wclsf_ref[...],
                preferred_element_type=jnp.float32)
        + jnp.dot(h_bwd.astype(jnp.bfloat16), wclsb_ref[...],
                  preferred_element_type=jnp.float32)
        + bcls_ref[...])


def init_params(key):
    """Deterministic synthetic parameters in the kernel's layout:
    pre-transposed for `x @ W`, forget gate pruned, directions packed, bf16."""
    ks = jax.random.split(key, 12)
    s = 0.02
    H = LSTM_HIDDEN

    # CBAM fc: Linear(1024->64) / ReLU / Linear(64->1024). PyTorch weight is
    # (out, in); store transposed.
    w1 = (jax.random.normal(ks[0], (C_RED, C_FEAT), jnp.float32) * s).T
    b1 = (jax.random.normal(ks[1], (C_RED,), jnp.float32) * s)[None, :]
    w2 = (jax.random.normal(ks[2], (C_FEAT, C_RED), jnp.float32) * s).T
    b2 = (jax.random.normal(ks[3], (C_FEAT,), jnp.float32) * s)[None, :]

    def lstm_dir(kw, kb1, kb2):
        # PyTorch layout: weight_ih_l0 (4H, input), gate order [i, f, g, o];
        # bias = b_ih + b_hh (exact fold: h0 == c0 == 0 kills W_hh terms).
        w_ih = jax.random.normal(kw, (4 * H, C_FEAT), jnp.float32) * s
        b = (jax.random.normal(kb1, (4 * H,), jnp.float32) * s
             + jax.random.normal(kb2, (4 * H,), jnp.float32) * s)
        # prune the dead forget gate (it only multiplies c0 == 0): keep [i,g,o]
        w_keep = jnp.concatenate([w_ih[0:H], w_ih[2 * H:4 * H]], axis=0)  # (3H, C)
        b_keep = jnp.concatenate([b[0:H], b[2 * H:4 * H]])                # (3H,)
        return w_keep.T, b_keep                                           # (C, 3H)

    w_f, bias_f = lstm_dir(ks[4], ks[5], ks[6])     # forward direction
    w_b, bias_b = lstm_dir(ks[7], ks[8], ks[9])     # reverse direction
    wih = jnp.concatenate([w_f, w_b], axis=1)       # (1024, 1536)
    bias = jnp.concatenate([bias_f, bias_b])[None, :]  # (1, 1536)

    # classifier Linear(512->2); split per LSTM direction (no in-kernel concat)
    wcls = jax.random.normal(ks[10], (NUM_CLASSES, CLS_IN), jnp.float32) * s
    bcls = (jax.random.normal(ks[11], (NUM_CLASSES,), jnp.float32) * s)[None, :]
    wcls_f = wcls[:, :H].T                          # (256, 2)
    wcls_b = wcls[:, H:].T                          # (256, 2)

    return dict(w1=w1.astype(jnp.bfloat16), b1=b1,
                w2=w2.astype(jnp.bfloat16), b2=b2,
                wih=wih.astype(jnp.bfloat16), bias=bias,
                wcls_f=wcls_f.astype(jnp.bfloat16),
                wcls_b=wcls_b.astype(jnp.bfloat16), bcls=bcls)


def rdodl_wrmair_forward(x_nchw, p):
    """x_nchw: (B, 1024, H, W) backbone feature map (NCHW, like PyTorch)."""
    B, C, Hs, Ws = x_nchw.shape
    assert C == C_FEAT and C * Hs * Ws == C_FEAT, \
        "x.view(B,1,-1) + LSTM(input_size=1024) requires C=1024 and H*W==1"
    x = x_nchw.reshape(B, C_FEAT).astype(jnp.float32)   # H*W == 1
    nb = pl.cdiv(B, TB)
    Bp = nb * TB
    if Bp != B:
        x = jnp.pad(x, ((0, Bp - B), (0, 0)))            # pad batch to sublanes

    def const(shape):
        return pl.BlockSpec(shape, lambda i: (0, 0))      # VMEM-resident weight

    grid_spec = pltpu.PrefetchScalarGridSpec(
        num_scalar_prefetch=0,
        grid=(nb,),
        in_specs=[
            pl.BlockSpec((TB, C_FEAT), lambda i: (i, 0)),      # x batch tile
            const((C_FEAT, C_RED)), const((1, C_RED)),          # CBAM fc[0]
            const((C_RED, C_FEAT)), const((1, C_FEAT)),         # CBAM fc[2]
            const((C_FEAT, 6 * LSTM_HIDDEN)),                   # packed LSTM W_ih
            const((1, 6 * LSTM_HIDDEN)),                        # packed LSTM bias
            const((LSTM_HIDDEN, NUM_CLASSES)),                  # classifier (fwd)
            const((LSTM_HIDDEN, NUM_CLASSES)),                  # classifier (bwd)
            const((1, NUM_CLASSES)),                            # classifier bias
        ],
        out_specs=pl.BlockSpec((TB, NUM_CLASSES), lambda i: (i, 0)),
    )
    out = pl.pallas_call(
        rdodl_kernel,
        out_shape=jax.ShapeDtypeStruct((Bp, NUM_CLASSES), jnp.float32),
        grid_spec=grid_spec,
        compiler_params=pltpu.CompilerParams(
            dimension_semantics=("parallel",),
            vmem_limit_bytes=32 * 1024 * 1024),
    )(x, p["w1"], p["b1"], p["w2"], p["b2"],
      p["wih"], p["bias"], p["wcls_f"], p["wcls_b"], p["bcls"])
    return out[:B]


if __name__ == "__main__":
    key = jax.random.PRNGKey(0)
    k_x, k_p = jax.random.split(key)

    B, Hs, Ws = 2, 1, 1   # backbone global-pool output -> H*W == 1 (required)
    x = jax.random.normal(k_x, (B, C_FEAT, Hs, Ws), jnp.float32)
    params = init_params(k_p)

    out = rdodl_wrmair_forward(x, params)
    jax.block_until_ready(out)
    assert out.shape == (B, NUM_CLASSES)
    print("KERNEL_OK")
</pallas_src>

<mosaic_0001>
module attributes {stable_mosaic.version = 11 : i64} {
  func.func @rdodl_kernel(%arg0: i32, %arg1: memref<8x1024xf32, #tpu.memory_space<vmem>>, %arg2: memref<1024x64xbf16, #tpu.memory_space<vmem>>, %arg3: memref<1x64xf32, #tpu.memory_space<vmem>>, %arg4: memref<64x1024xbf16, #tpu.memory_space<vmem>>, %arg5: memref<1x1024xf32, #tpu.memory_space<vmem>>, %arg6: memref<1024x1536xbf16, #tpu.memory_space<vmem>>, %arg7: memref<1x1536xf32, #tpu.memory_space<vmem>>, %arg8: memref<256x2xbf16, #tpu.memory_space<vmem>>, %arg9: memref<256x2xbf16, #tpu.memory_space<vmem>>, %arg10: memref<1x2xf32, #tpu.memory_space<vmem>>, %arg11: memref<8x2xf32, #tpu.memory_space<vmem>>) attributes {dimension_semantics = [#tpu.dimension_semantics<parallel>], iteration_bounds = array<i64: 1>, scalar_prefetch = 0 : i64, scratch_operands = 0 : i64, tpu.core_type = #tpu.core_type<tc>, window_params = [{transform_indices = @transform_0, window_bounds = array<i64: 8, 1024>}, {pipeline_mode = #tpu.pipeline_mode<synchronous>, transform_indices = @transform_1, window_bounds = array<i64: 1024, 64>}, {pipeline_mode = #tpu.pipeline_mode<synchronous>, transform_indices = @transform_2, window_bounds = array<i64: 1, 64>}, {pipeline_mode = #tpu.pipeline_mode<synchronous>, transform_indices = @transform_3, window_bounds = array<i64: 64, 1024>}, {pipeline_mode = #tpu.pipeline_mode<synchronous>, transform_indices = @transform_4, window_bounds = array<i64: 1, 1024>}, {pipeline_mode = #tpu.pipeline_mode<synchronous>, transform_indices = @transform_5, window_bounds = array<i64: 1024, 1536>}, {pipeline_mode = #tpu.pipeline_mode<synchronous>, transform_indices = @transform_6, window_bounds = array<i64: 1, 1536>}, {pipeline_mode = #tpu.pipeline_mode<synchronous>, transform_indices = @transform_7, window_bounds = array<i64: 256, 2>}, {pipeline_mode = #tpu.pipeline_mode<synchronous>, transform_indices = @transform_8, window_bounds = array<i64: 256, 2>}, {pipeline_mode = #tpu.pipeline_mode<synchronous>, transform_indices = @transform_9, window_bounds = array<i64: 1, 2>}, {transform_indices = @transform_10, window_bounds = array<i64: 8, 2>}]} {
    %c0 = arith.constant 0 : index
    %c0_0 = arith.constant 0 : index
    %0 = vector.load %arg1[%c0, %c0_0] : memref<8x1024xf32, #tpu.memory_space<vmem>>, vector<8x1024xf32>
    %1 = arith.truncf %0 : vector<8x1024xf32> to vector<8x1024xbf16>
    %c0_1 = arith.constant 0 : index
    %c0_2 = arith.constant 0 : index
    %2 = vector.load %arg2[%c0_1, %c0_2] : memref<1024x64xbf16, #tpu.memory_space<vmem>>, vector<1024x64xbf16>
    %cst = arith.constant dense<0.000000e+00> : vector<8x64xf32>
    %3 = tpu.matmul %1, %2, %cst {dimension_numbers = #tpu.dot_dimension_numbers<[1], [0], [0], [1], [0, 0, 1, 1], [], []>} : vector<8x1024xbf16>, vector<1024x64xbf16>, vector<8x64xf32> -> vector<8x64xf32>
    %c0_3 = arith.constant 0 : index
    %c0_4 = arith.constant 0 : index
    %4 = vector.load %arg3[%c0_3, %c0_4] : memref<1x64xf32, #tpu.memory_space<vmem>>, vector<1x64xf32>
    %5 = vector.broadcast %4 : vector<1x64xf32> to vector<8x64xf32>
    %6 = arith.addf %3, %5 : vector<8x64xf32>
    %cst_5 = arith.constant 0.000000e+00 : f32
    %7 = vector.broadcast %cst_5 : f32 to vector<8x64xf32>
    %8 = arith.maximumf %6, %7 : vector<8x64xf32>
    %9 = arith.truncf %8 : vector<8x64xf32> to vector<8x64xbf16>
    %c0_6 = arith.constant 0 : index
    %c0_7 = arith.constant 0 : index
    %10 = vector.load %arg4[%c0_6, %c0_7] : memref<64x1024xbf16, #tpu.memory_space<vmem>>, vector<64x1024xbf16>
    %cst_8 = arith.constant dense<0.000000e+00> : vector<8x1024xf32>
    %11 = tpu.matmul %9, %10, %cst_8 {dimension_numbers = #tpu.dot_dimension_numbers<[1], [0], [0], [1], [0, 0, 1, 1], [], []>} : vector<8x64xbf16>, vector<64x1024xbf16>, vector<8x1024xf32> -> vector<8x1024xf32>
    %c0_9 = arith.constant 0 : index
    %c0_10 = arith.constant 0 : index
    %12 = vector.load %arg5[%c0_9, %c0_10] : memref<1x1024xf32, #tpu.memory_space<vmem>>, vector<1x1024xf32>
    %13 = vector.broadcast %12 : vector<1x1024xf32> to vector<8x1024xf32>
    %14 = arith.addf %11, %13 : vector<8x1024xf32>
    %15 = arith.addf %14, %14 : vector<8x1024xf32>
    %16 = arith.negf %15 : vector<8x1024xf32>
    %17 = math.exp %16 : vector<8x1024xf32>
    %cst_11 = arith.constant 1.000000e+00 : f32
    %18 = vector.broadcast %cst_11 : f32 to vector<8x1024xf32>
    %19 = arith.addf %18, %17 : vector<8x1024xf32>
    %20 = arith.divf %18, %19 : vector<8x1024xf32>
    %21 = arith.mulf %0, %20 : vector<8x1024xf32>
    %22 = arith.truncf %21 : vector<8x1024xf32> to vector<8x1024xbf16>
    %c0_12 = arith.constant 0 : index
    %c0_13 = arith.constant 0 : index
    %23 = vector.load %arg6[%c0_12, %c0_13] : memref<1024x1536xbf16, #tpu.memory_space<vmem>>, vector<1024x1536xbf16>
    %cst_14 = arith.constant dense<0.000000e+00> : vector<8x1536xf32>
    %24 = tpu.matmul %22, %23, %cst_14 {dimension_numbers = #tpu.dot_dimension_numbers<[1], [0], [0], [1], [0, 0, 1, 1], [], []>} : vector<8x1024xbf16>, vector<1024x1536xbf16>, vector<8x1536xf32> -> vector<8x1536xf32>
    %c0_15 = arith.constant 0 : index
    %c0_16 = arith.constant 0 : index
    %25 = vector.load %arg7[%c0_15, %c0_16] : memref<1x1536xf32, #tpu.memory_space<vmem>>, vector<1x1536xf32>
    %26 = vector.broadcast %25 : vector<1x1536xf32> to vector<8x1536xf32>
    %27 = arith.addf %24, %26 : vector<8x1536xf32>
    %28 = vector.extract_strided_slice %27 {offsets = [0, 0], sizes = [8, 256], strides = [1, 1]} : vector<8x1536xf32> to vector<8x256xf32>
    %29 = arith.negf %28 : vector<8x256xf32>
    %30 = math.exp %29 : vector<8x256xf32>
    %cst_17 = arith.constant 1.000000e+00 : f32
    %31 = vector.broadcast %cst_17 : f32 to vector<8x256xf32>
    %32 = arith.addf %31, %30 : vector<8x256xf32>
    %33 = arith.divf %31, %32 : vector<8x256xf32>
    %34 = vector.extract_strided_slice %27 {offsets = [0, 256], sizes = [8, 256], strides = [1, 1]} : vector<8x1536xf32> to vector<8x256xf32>
    %35 = math.tanh %34 : vector<8x256xf32>
    %36 = vector.extract_strided_slice %27 {offsets = [0, 512], sizes = [8, 256], strides = [1, 1]} : vector<8x1536xf32> to vector<8x256xf32>
    %37 = arith.negf %36 : vector<8x256xf32>
    %38 = math.exp %37 : vector<8x256xf32>
    %cst_18 = arith.constant 1.000000e+00 : f32
    %39 = vector.broadcast %cst_18 : f32 to vector<8x256xf32>
    %40 = arith.addf %39, %38 : vector<8x256xf32>
    %41 = arith.divf %39, %40 : vector<8x256xf32>
    %42 = arith.mulf %33, %35 : vector<8x256xf32>
    %43 = math.tanh %42 : vector<8x256xf32>
    %44 = arith.mulf %41, %43 : vector<8x256xf32>
    %45 = vector.extract_strided_slice %27 {offsets = [0, 768], sizes = [8, 256], strides = [1, 1]} : vector<8x1536xf32> to vector<8x256xf32>
    %46 = arith.negf %45 : vector<8x256xf32>
    %47 = math.exp %46 : vector<8x256xf32>
    %cst_19 = arith.constant 1.000000e+00 : f32
    %48 = vector.broadcast %cst_19 : f32 to vector<8x256xf32>
    %49 = arith.addf %48, %47 : vector<8x256xf32>
    %50 = arith.divf %48, %49 : vector<8x256xf32>
    %51 = vector.extract_strided_slice %27 {offsets = [0, 1024], sizes = [8, 256], strides = [1, 1]} : vector<8x1536xf32> to vector<8x256xf32>
    %52 = math.tanh %51 : vector<8x256xf32>
    %53 = vector.extract_strided_slice %27 {offsets = [0, 1280], sizes = [8, 256], strides = [1, 1]} : vector<8x1536xf32> to vector<8x256xf32>
    %54 = arith.negf %53 : vector<8x256xf32>
    %55 = math.exp %54 : vector<8x256xf32>
    %cst_20 = arith.constant 1.000000e+00 : f32
    %56 = vector.broadcast %cst_20 : f32 to vector<8x256xf32>
    %57 = arith.addf %56, %55 : vector<8x256xf32>
    %58 = arith.divf %56, %57 : vector<8x256xf32>
    %59 = arith.mulf %50, %52 : vector<8x256xf32>
    %60 = math.tanh %59 : vector<8x256xf32>
    %61 = arith.mulf %58, %60 : vector<8x256xf32>
    %62 = arith.truncf %44 : vector<8x256xf32> to vector<8x256xbf16>
    %c0_21 = arith.constant 0 : index
    %c0_22 = arith.constant 0 : index
    %63 = vector.load %arg8[%c0_21, %c0_22] : memref<256x2xbf16, #tpu.memory_space<vmem>>, vector<256x2xbf16>
    %cst_23 = arith.constant dense<0.000000e+00> : vector<8x2xf32>
    %64 = tpu.matmul %62, %63, %cst_23 {dimension_numbers = #tpu.dot_dimension_numbers<[1], [0], [0], [1], [0, 0, 1, 1], [], []>} : vector<8x256xbf16>, vector<256x2xbf16>, vector<8x2xf32> -> vector<8x2xf32>
    %65 = arith.truncf %61 : vector<8x256xf32> to vector<8x256xbf16>
    %c0_24 = arith.constant 0 : index
    %c0_25 = arith.constant 0 : index
    %66 = vector.load %arg9[%c0_24, %c0_25] : memref<256x2xbf16, #tpu.memory_space<vmem>>, vector<256x2xbf16>
    %cst_26 = arith.constant dense<0.000000e+00> : vector<8x2xf32>
    %67 = tpu.matmul %65, %66, %cst_26 {dimension_numbers = #tpu.dot_dimension_numbers<[1], [0], [0], [1], [0, 0, 1, 1], [], []>} : vector<8x256xbf16>, vector<256x2xbf16>, vector<8x2xf32> -> vector<8x2xf32>
    %68 = arith.addf %64, %67 : vector<8x2xf32>
    %c0_27 = arith.constant 0 : index
    %c0_28 = arith.constant 0 : index
    %69 = vector.load %arg10[%c0_27, %c0_28] : memref<1x2xf32, #tpu.memory_space<vmem>>, vector<1x2xf32>
    %70 = vector.broadcast %69 : vector<1x2xf32> to vector<8x2xf32>
    %71 = arith.addf %68, %70 : vector<8x2xf32>
    %c0_29 = arith.constant 0 : index
    %c0_30 = arith.constant 0 : index
    %72 = vector.load %arg11[%c0_29, %c0_30] : memref<8x2xf32, #tpu.memory_space<vmem>>, vector<8x2xf32>
    tpu.vector_store %arg11[%c0_29, %c0_30], %71 {strides = array<i32>} : memref<8x2xf32, #tpu.memory_space<vmem>>, vector<8x2xf32>,
    return
  }
  func.func @transform_0(%arg0: i32) -> (i32, i32) {
    %c0_i32 = arith.constant 0 : i32
    %c0_i32_0 = arith.constant 0 : i32
    return %arg0, %c0_i32 : i32, i32
  }
  func.func @transform_1(%arg0: i32) -> (i32, i32) {
    %c0_i32 = arith.constant 0 : i32
    %c0_i32_0 = arith.constant 0 : i32
    %c0_i32_1 = arith.constant 0 : i32
    return %c0_i32, %c0_i32_0 : i32, i32
  }
  func.func @transform_2(%arg0: i32) -> (i32, i32) {
    %c0_i32 = arith.constant 0 : i32
    %c0_i32_0 = arith.constant 0 : i32
    %c0_i32_1 = arith.constant 0 : i32
    return %c0_i32, %c0_i32_0 : i32, i32
  }
  func.func @transform_3(%arg0: i32) -> (i32, i32) {
    %c0_i32 = arith.constant 0 : i32
    %c0_i32_0 = arith.constant 0 : i32
    %c0_i32_1 = arith.constant 0 : i32
    return %c0_i32, %c0_i32_0 : i32, i32
  }
  func.func @transform_4(%arg0: i32) -> (i32, i32) {
    %c0_i32 = arith.constant 0 : i32
    %c0_i32_0 = arith.constant 0 : i32
    %c0_i32_1 = arith.constant 0 : i32
    return %c0_i32, %c0_i32_0 : i32, i32
  }
  func.func @transform_5(%arg0: i32) -> (i32, i32) {
    %c0_i32 = arith.constant 0 : i32
    %c0_i32_0 = arith.constant 0 : i32
    %c0_i32_1 = arith.constant 0 : i32
    return %c0_i32, %c0_i32_0 : i32, i32
  }
  func.func @transform_6(%arg0: i32) -> (i32, i32) {
    %c0_i32 = arith.constant 0 : i32
    %c0_i32_0 = arith.constant 0 : i32
    %c0_i32_1 = arith.constant 0 : i32
    return %c0_i32, %c0_i32_0 : i32, i32
  }
  func.func @transform_7(%arg0: i32) -> (i32, i32) {
    %c0_i32 = arith.constant 0 : i32
    %c0_i32_0 = arith.constant 0 : i32
    %c0_i32_1 = arith.constant 0 : i32
    return %c0_i32, %c0_i32_0 : i32, i32
  }
  func.func @transform_8(%arg0: i32) -> (i32, i32) {
    %c0_i32 = arith.constant 0 : i32
    %c0_i32_0 = arith.constant 0 : i32
    %c0_i32_1 = arith.constant 0 : i32
    return %c0_i32, %c0_i32_0 : i32, i32
  }
  func.func @transform_9(%arg0: i32) -> (i32, i32) {
    %c0_i32 = arith.constant 0 : i32
    %c0_i32_0 = arith.constant 0 : i32
    %c0_i32_1 = arith.constant 0 : i32
    return %c0_i32, %c0_i32_0 : i32, i32
  }
  func.func @transform_10(%arg0: i32) -> (i32, i32) {
    %c0_i32 = arith.constant 0 : i32
    %c0_i32_0 = arith.constant 0 : i32
    return %arg0, %c0_i32 : i32, i32
  }
}

</mosaic_0001>

<bundles_post_ra>
// kernel: tpu_custom_call.1
= control target key start
LH: loop header
LB: loop body
LE: loop exit
PB: predicated region body
PF: predicated region fallthrough
CT: control target
= control target key end

     0   :  { %15 = vsyncpa [#allocation3], 0  ;;  %s10618_s0 = inlined_call_operand.hbm [shape: f32[8,1024], index: 0, kind: input, shape index: {}]   ;;  %s10619_s1 = inlined_call_operand.vmem [shape: bf16[1024,64], index: 1, kind: input, shape index: {}]   ;;  %s10620_s2 = inlined_call_operand.hbm [shape: f32[1,64], index: 2, kind: input, shape index: {}]   ;;  %s10621_s3 = inlined_call_operand.hbm [shape: bf16[64,1024], index: 3, kind: input, shape index: {}]   ;;  %s10622_s4 = inlined_call_operand.hbm [shape: f32[1,1024], index: 4, kind: input, shape index: {}]   ;;  %s10623_s5 = inlined_call_operand.hbm [shape: bf16[1024,1536], index: 5, kind: input, shape index: {}]   ;;  %s10624_s6 = inlined_call_operand.hbm [shape: f32[1,1536], index: 6, kind: input, shape index: {}]   ;;  %s10625_s7 = inlined_call_operand.vmem [shape: bf16[256,2], index: 7, kind: input, shape index: {}]   ;;  %s10626_s8 = inlined_call_operand.vmem [shape: bf16[256,2], index: 8, kind: input, shape index: {}]   ;;  %s10627_s9 = inlined_call_operand.hbm [shape: f32[1,2], index: 9, kind: input, shape index: {}]   ;;  %s10628_s10 = inlined_call_operand.vmem [shape: f32[8,2], index: 10, kind: output, shape index: {}]  }
   0x1   :  { %16 = vsyncpa [#allocation5], 0 }
   0x2   :  { %17 = vsyncpa [#allocation8], 0 }
   0x3   :  { %18 = vsyncpa [#allocation11], 0  ;;  %s10015_s13 = smov [#allocation4]   ;;  %s10016_s15 = smov [#allocation7]  }
   0x4   :  { %s37_s14 = sshll.u32 %s10015_s13, 4  ;;  %s59_s16 = sshll.u32 %s10016_s15, 4  ;;  %s38_s14 = int_to_ptr.vmem [resolvable:$true] %s37_s14  ;;  %s60_s16 = int_to_ptr.vmem [resolvable:$true] %s59_s16 }
   0x5   :  { %s9853_s19 = scalar_lea.hbm %s10620_s2, 16 }
   0x6   :  { %p9854_p0 = scmp.ne.s32.totalorder %s10620_s2, %s9853_s19  ;;  %p9857_p1 = scmp.lt.u32.totalorder %s9853_s19, %s10620_s2 }
   0x8   :  { %p9859_p2 = pnand %p9857_p1, %p9854_p0 }
   0xa   :  { %9862 = shalt.err (!%p9859_p2)
}
   0xb   :  { %s9863_s24 = scalar_lea.vmem %s38_s14, 16  ;;  %s9867_s25 = scalar_lea.vmem %s38_s14, 32 }
   0xc   :  { %p9864_p3 = scmp.ne.s32.totalorder %s38_s14, %s9863_s24  ;;  %p9868_p4 = scmp.lt.s32.totalorder %s38_s14, %s38_s14 }
   0xd   :  { %p9869_p5 = scmp.lt.s32.totalorder %s9867_s25, %s9863_s24 }
   0xf   :  { %p9870_p6 = por %p9869_p5, %p9868_p4 }
  0x11   :  { %p9871_p7 = pnand %p9870_p6, %p9864_p3 }
  0x13   :  { %9874 = shalt.err (!%p9871_p7)
}
  0x14   :  { %40 = dma.hbm_to_vmem [thread:$0]  %s10620_s2, 16, %s38_s14, [#allocation5]  }
  0x15   :  { %s9875_s30 = scalar_lea.hbm %s10622_s4, 128 }
  0x16   :  { %p9876_p8 = scmp.ne.s32.totalorder %s10622_s4, %s9875_s30  ;;  %p9879_p9 = scmp.lt.u32.totalorder %s9875_s30, %s10622_s4 }
  0x18   :  { %p9881_p10 = pnand %p9879_p9, %p9876_p8 }
  0x1a   :  { %9884 = shalt.err (!%p9881_p10)
}
  0x1b   :  { %s9885_s17 = scalar_lea.vmem %s60_s16, 128  ;;  %p9890_p12 = scmp.lt.s32.totalorder %s60_s16, %s60_s16 }
  0x1c   :  { %p9886_p11 = scmp.ne.s32.totalorder %s60_s16, %s9885_s17  ;;  %p9891_p13 = scmp.lt.s32.totalorder %s9885_s17, %s9885_s17 }
  0x1e   :  { %p9892_p0 = por %p9891_p13, %p9890_p12 }
  0x20   :  { %p9893_p1 = pnand %p9892_p0, %p9886_p11 }
  0x22   :  { %9896 = shalt.err (!%p9893_p1)
}
  0x23   :  { %62 = dma.hbm_to_vmem [thread:$0]  %s10622_s4, 128, %s60_s16, [#allocation8]  }
  0x24   :  { %s10017_s18 = smov [#allocation10]   ;;  %s10018_s20 = smov [#allocation2]  }
  0x25   :  { %s81_s19 = sshll.u32 %s10017_s18, 4  ;;  %s25_s21 = sshll.u32 %s10018_s20, 4  ;;  %s82_s19 = int_to_ptr.vmem [resolvable:$true] %s81_s19  ;;  %s26_s21 = int_to_ptr.vmem [resolvable:$true] %s25_s21 }
  0x26   :  { %s9897_s24 = scalar_lea.hbm %s10624_s6, 192 }
  0x27   :  { %p9898_p2 = scmp.ne.s32.totalorder %s10624_s6, %s9897_s24  ;;  %p9901_p3 = scmp.lt.u32.totalorder %s9897_s24, %s10624_s6 }
  0x29   :  { %p9903_p4 = pnand %p9901_p3, %p9898_p2 }
  0x2b   :  { %9906 = shalt.err (!%p9903_p4)
}
  0x2c   :  { %s9907_s4 = scalar_lea.vmem %s82_s19, 192  ;;  %p9912_p6 = scmp.lt.s32.totalorder %s82_s19, %s82_s19 }
  0x2d   :  { %p9908_p5 = scmp.ne.s32.totalorder %s82_s19, %s9907_s4  ;;  %p9913_p7 = scmp.lt.s32.totalorder %s9907_s4, %s9907_s4 }
  0x2f   :  { %p9914_p8 = por %p9913_p7, %p9912_p6 }
  0x31   :  { %p9915_p9 = pnand %p9914_p8, %p9908_p5 }
  0x33   :  { %9918 = shalt.err (!%p9915_p9)
}
  0x34   :  { %84 = dma.hbm_to_vmem [thread:$0]  %s10624_s6, 192, %s82_s19, [#allocation11]  }
  0x35   :  { %s9919_s12 = scalar_lea.hbm %s10618_s0, 1024 }
  0x36   :  { %p9920_p10 = scmp.ne.s32.totalorder %s10618_s0, %s9919_s12  ;;  %p9923_p11 = scmp.lt.u32.totalorder %s9919_s12, %s10618_s0 }
  0x38   :  { %p9925_p12 = pnand %p9923_p11, %p9920_p10 }
  0x3a   :  { %9928 = shalt.err (!%p9925_p12)
}
  0x3b   :  { %s9929_s14 = scalar_lea.vmem %s26_s21, 1024  ;;  %p9934_p0 = scmp.lt.s32.totalorder %s26_s21, %s26_s21 }
  0x3c   :  { %p9930_p13 = scmp.ne.s32.totalorder %s26_s21, %s9929_s14  ;;  %p9935_p1 = scmp.lt.s32.totalorder %s9929_s14, %s9929_s14 }
  0x3e   :  { %p9936_p2 = por %p9935_p1, %p9934_p0 }
  0x40   :  { %p9937_p3 = pnand %p9936_p2, %p9930_p13 }
  0x42   :  { %9940 = shalt.err (!%p9937_p3)
}
  0x43   :  { %28 = dma.hbm_to_vmem [thread:$0]  %s10618_s0, 1024, %s26_s21, [#allocation3]  }
  0x44   :  { %s10019_s19 = smov [#allocation6]   ;;  %s9941_s24 = scalar_lea.hbm %s10621_s3, 4096 }
  0x45   :  { %s46_s20 = sshll.u32 %s10019_s19, 4  ;;  %p9942_p4 = scmp.ne.s32.totalorder %s10621_s3, %s9941_s24  ;;  %s47_s20 = int_to_ptr.vmem [resolvable:$true] %s46_s20 }
  0x46   :  { %p9945_p5 = scmp.lt.u32.totalorder %s9941_s24, %s10621_s3 }
  0x48   :  { %p9947_p6 = pnand %p9945_p5, %p9942_p4 }
  0x4a   :  { %9950 = shalt.err (!%p9947_p6)
}
  0x4b   :  { %s9951_s4 = scalar_lea.vmem %s47_s20, 4096  ;;  %p9956_p8 = scmp.lt.s32.totalorder %s47_s20, %s47_s20 }
  0x4c   :  { %p9952_p7 = scmp.ne.s32.totalorder %s47_s20, %s9951_s4  ;;  %p9957_p9 = scmp.lt.s32.totalorder %s9951_s4, %s9951_s4 }
  0x4e   :  { %p9958_p10 = por %p9957_p9, %p9956_p8 }
  0x50   :  { %p9959_p11 = pnand %p9958_p10, %p9952_p7 }
  0x52   :  { %9962 = shalt.err (!%p9959_p11)
}
  0x53   :  { %s10020_s0 = smov 512   ;;  %s10021_s21 = smov 32  }
  0x54   :  { %52 = dma.hbm_to_vmem [thread:$0]  %s10621_s3, 4096, %s47_s20, [#allocation5], %s10020_s0, %s10020_s0, %s10021_s21  }
  0x55   :  { %s10022_s30 = smov [#allocation9]   ;;  %s9963_s15 = scalar_lea.hbm %s10623_s5, 98304 }
  0x56   :  { %s68_s11 = sshll.u32 %s10022_s30, 4  ;;  %p9964_p12 = scmp.ne.s32.totalorder %s10623_s5, %s9963_s15  ;;  %s69_s11 = int_to_ptr.vmem [resolvable:$true] %s68_s11 }
  0x57   :  { %p9967_p13 = scmp.lt.u32.totalorder %s9963_s15, %s10623_s5 }
  0x59   :  { %p9969_p0 = pnand %p9967_p13, %p9964_p12 }
  0x5b   :  { %9972 = shalt.err (!%p9969_p0)
}
  0x5c   :  { %s9973_s18 = scalar_lea.vmem %s69_s11, 98304  ;;  %p9978_p2 = scmp.lt.s32.totalorder %s69_s11, %s69_s11 }
  0x5d   :  { %p9974_p1 = scmp.ne.s32.totalorder %s69_s11, %s9973_s18  ;;  %p9979_p3 = scmp.lt.s32.totalorder %s9973_s18, %s9973_s18 }
  0x5f   :  { %p9980_p4 = por %p9979_p3, %p9978_p2 }
  0x61   :  { %p9981_p5 = pnand %p9980_p4, %p9974_p1 }
  0x63   :  { %9984 = shalt.err (!%p9981_p5)
}
  0x64   :  { %s10023_s3 = smov 768   ;;  %s10024_s19 = smov 48  }
  0x65   :  { %74 = dma.hbm_to_vmem [thread:$0]  %s10623_s5, 98304, %s69_s11, [#allocation8], %s10023_s3, %s10023_s3, %s10024_s19  }
  0x66   :  { %s10025_s23 = smov [#allocation12]   ;;  %s9985_s27 = scalar_lea.hbm %s10627_s9, 16 }
  0x67   :  { %s95_s24 = sshll.u32 %s10025_s23, 4  ;;  %p9986_p6 = scmp.ne.s32.totalorder %s10627_s9, %s9985_s27  ;;  %s96_s24 = int_to_ptr.vmem [resolvable:$true] %s95_s24 }
  0x68   :  { %p9989_p7 = scmp.lt.u32.totalorder %s9985_s27, %s10627_s9 }
  0x6a   :  { %p9991_p8 = pnand %p9989_p7, %p9986_p6 }
  0x6c   :  { %9994 = shalt.err (!%p9991_p8)
}
  0x6d   :  { %s9995_s16 = scalar_lea.vmem %s96_s24, 16  ;;  %s9999_s5 = scalar_lea.vmem %s96_s24, 32 }
  0x6e   :  { %p9996_p9 = scmp.ne.s32.totalorder %s96_s24, %s9995_s16  ;;  %p10000_p10 = scmp.lt.s32.totalorder %s96_s24, %s96_s24 }
  0x6f   :  { %p10001_p11 = scmp.lt.s32.totalorder %s9999_s5, %s9995_s16 }
  0x71   :  { %p10002_p12 = por %p10001_p11, %p10000_p10 }
  0x73   :  { %p10003_p13 = pnand %p10002_p12, %p9996_p9 }
  0x75   :  { %10006 = shalt.err (!%p10003_p13)
}
  0x76   :  { %98 = dma.hbm_to_vmem [thread:$0]  %s10627_s9, 16, %s96_s24, [#allocation11]  }
  0x77   :  { %10007 = dma.done.wait [#allocation3], 1024  }
  0x78   :  { %10008 = vsyncadd [#allocation3], 4294966272 }
  0x79   :  { %10009 = dma.done.wait [#allocation5], 4112  }
  0x7a   :  { %10010 = vsyncadd [#allocation5], 4294963184 }
  0x7b   :  { %10011 = dma.done.wait [#allocation8], 98432  }
  0x7c   :  { %10012 = vsyncadd [#allocation8], 4294868864 }
  0x7d   :  { %10013 = dma.done.wait [#allocation11], 208  }
  0x7e   :  { %10014 = vsyncadd [#allocation11], 4294967088  ;;  %v8516_v0 = vld [vmem:[%s10619_s1 + $0x40] sm:$0xff]   ;;  %v8520_v4 = vld [vmem:[%s10619_s1 + $0x48] sm:$0xff]   ;;  %vm1052_vm0 = vcmask 523264   ;;  %vm7360_vm1 = vcmask 15360  }
  0x7f   :  { %v8517_v1 = vld [vmem:[%s10619_s1 + $0xc0] sm:$0xff]   ;;  %8288 = vmatprep.subr.bf16.mxu0 %v8516_v0  ;;  %v8521_v5 = vld [vmem:[%s10619_s1 + $0xc8] sm:$0xff]   ;;  %v8524_v8 = vld [vmem:[%s10619_s1 + $0x50] sm:$0xff]  }
  0x80   :  { %v8518_v2 = vld [vmem:[%s10619_s1] sm:$0xff]   ;;  %8310 = vmatprep.subr.bf16.mxu1 %v8517_v1  ;;  %v8522_v6 = vld [vmem:[%s10619_s1 + $0x8] sm:$0xff]   ;;  %v8525_v9 = vld [vmem:[%s10619_s1 + $0xd0] sm:$0xff]  }
  0x81   :  { %v8519_v3 = vld [vmem:[%s10619_s1 + $0x80] sm:$0xff]   ;;  %8289 = vmatpush3.bf16.msra.mxu0 %v8518_v2  ;;  %v8523_v7 = vld [vmem:[%s10619_s1 + $0x88] sm:$0xff]   ;;  %v8526_v10 = vld [vmem:[%s10619_s1 + $0x10] sm:$0xff]  }
  0x82   :  { %8311 = vmatpush3.bf16.msra.mxu1 %v8519_v3  ;;  %8290 = vmatprep.subr.bf16.mxu0 %v8520_v4  ;;  %v8527_v11 = vld [vmem:[%s10619_s1 + $0x90] sm:$0xff]   ;;  %v8528_v12 = vld [vmem:[%s10619_s1 + $0x58] sm:$0xff]   ;;  %v8532_v16 = vld [vmem:[%s10619_s1 + $0x60] sm:$0xff]  }
  0x83   :  { %8312 = vmatprep.subr.bf16.mxu1 %v8521_v5  ;;  %v8529_v13 = vld [vmem:[%s10619_s1 + $0xd8] sm:$0xff]   ;;  %v8533_v17 = vld [vmem:[%s10619_s1 + $0xe0] sm:$0xff]   ;;  %v8536_v20 = vld [vmem:[%s10619_s1 + $0x68] sm:$0xff]  }
  0x84   :  { %v8530_v14 = vld [vmem:[%s10619_s1 + $0x18] sm:$0xff]   ;;  %v8534_v18 = vld [vmem:[%s10619_s1 + $0x20] sm:$0xff]   ;;  %v8537_v21 = vld [vmem:[%s10619_s1 + $0xe8] sm:$0xff]  }
  0x85   :  { %8291 = vmatpush3.bf16.msra.mxu0 %v8522_v6  ;;  %v8531_v15 = vld [vmem:[%s10619_s1 + $0x98] sm:$0xff]   ;;  %v8535_v19 = vld [vmem:[%s10619_s1 + $0xa0] sm:$0xff]   ;;  %v8538_v22 = vld [vmem:[%s10619_s1 + $0x28] sm:$0xff]  }
  0x86   :  { %8313 = vmatpush3.bf16.msra.mxu1 %v8523_v7  ;;  %8292 = vmatprep.subr.bf16.mxu0 %v8524_v8  ;;  %v8539_v23 = vld [vmem:[%s10619_s1 + $0xa8] sm:$0xff]   ;;  %v8540_v24 = vld [vmem:[%s10619_s1 + $0x70] sm:$0xff]   ;;  %v8544_v28 = vld [vmem:[%s10619_s1 + $0x78] sm:$0xff]  }
  0x87   :  { %8314 = vmatprep.subr.bf16.mxu1 %v8525_v9  ;;  %v8541_v25 = vld [vmem:[%s10619_s1 + $0xf0] sm:$0xff]   ;;  %v8545_v29 = vld [vmem:[%s10619_s1 + $0xf8] sm:$0xff]   ;;  %v122_v32 = vld [vmem:[#allocation2 + $0x8] sm:$0xff] }
  0x88   :  { %v8542_v26 = vld [vmem:[%s10619_s1 + $0x30] sm:$0xff]   ;;  %v8546_v30 = vld [vmem:[%s10619_s1 + $0x38] sm:$0xff]   ;;  %v121_v34 = vld [vmem:[#allocation2] sm:$0xff]  ;;  %v130_v35 = vpack.c.bf16 %v122_v32, %v122_v32 }
  0x89   :  { %8293 = vmatpush3.bf16.msra.mxu0 %v8526_v10  ;;  %v8543_v27 = vld [vmem:[%s10619_s1 + $0xb0] sm:$0xff]   ;;  %v8547_v31 = vld [vmem:[%s10619_s1 + $0xb8] sm:$0xff]   ;;  %v129_v37 = vpack.c.bf16 %v121_v34, %v121_v34  ;;  %v8548_v40 = vld [vmem:[%s10619_s1 + $0x140] sm:$0xff]  }
  0x8a   :  { %8315 = vmatpush3.bf16.msra.mxu1 %v8527_v11  ;;  %8294 = vmatprep.subr.bf16.mxu0 %v8528_v12  ;;  %v124_v33 = vld [vmem:[#allocation2 + $0x18] sm:$0xff]  ;;  %v123_v38 = vld [vmem:[#allocation2 + $0x10] sm:$0xff]  ;;  %v8549_v41 = vld [vmem:[%s10619_s1 + $0x1c0] sm:$0xff]  }
  0x8b   :  { %8316 = vmatprep.subr.bf16.mxu1 %v8529_v13  ;;  %v132_v36 = vpack.c.bf16 %v124_v33, %v124_v33  ;;  %v131_v39 = vpack.c.bf16 %v123_v38, %v123_v38  ;;  %688 = vmatprep.mubr.bf16.mxu0 %v130_v35  ;;  %v8550_v42 = vld [vmem:[%s10619_s1 + $0x100] sm:$0xff]   ;;  %v8552_v44 = vld [vmem:[%s10619_s1 + $0x148] sm:$0xff]   ;;  %v8556_v48 = vld [vmem:[%s10619_s1 + $0x150] sm:$0xff]  }
  0x8c   :  { %v8551_v43 = vld [vmem:[%s10619_s1 + $0x180] sm:$0xff]   ;;  %v8553_v45 = vld [vmem:[%s10619_s1 + $0x1c8] sm:$0xff]   ;;  %v8557_v49 = vld [vmem:[%s10619_s1 + $0x1d0] sm:$0xff]  }
  0x8d   :  { %8295 = vmatpush3.bf16.msra.mxu0 %v8530_v14  ;;  %728 = vmatprep.mubr.bf16.mxu1 %v132_v36  ;;  %v8554_v46 = vld [vmem:[%s10619_s1 + $0x108] sm:$0xff]   ;;  %v8558_v50 = vld [vmem:[%s10619_s1 + $0x110] sm:$0xff]   ;;  %v8560_v52 = vld [vmem:[%s10619_s1 + $0x158] sm:$0xff]  }
  0x8e   :  { %8317 = vmatpush3.bf16.msra.mxu1 %v8531_v15  ;;  %8296 = vmatprep.subr.bf16.mxu0 %v8532_v16  ;;  %v8555_v47 = vld [vmem:[%s10619_s1 + $0x188] sm:$0xff]   ;;  %v8559_v51 = vld [vmem:[%s10619_s1 + $0x190] sm:$0xff]   ;;  %v8561_v53 = vld [vmem:[%s10619_s1 + $0x1d8] sm:$0xff]  }
  0x8f   :  { %8318 = vmatprep.subr.bf16.mxu1 %v8533_v17  ;;  %v8562_v54 = vld [vmem:[%s10619_s1 + $0x118] sm:$0xff]   ;;  %v8564_v56 = vld [vmem:[%s10619_s1 + $0x160] sm:$0xff]   ;;  %v8568_v60 = vld [vmem:[%s10619_s1 + $0x168] sm:$0xff]  }
  0x90   :  { %v8563_v55 = vld [vmem:[%s10619_s1 + $0x198] sm:$0xff]   ;;  %v8565_v57 = vld [vmem:[%s10619_s1 + $0x1e0] sm:$0xff]   ;;  %v8569_v61 = vld [vmem:[%s10619_s1 + $0x1e8] sm:$0xff]  }
  0x91   :  { %8297 = vmatpush3.bf16.msra.mxu0 %v8534_v18  ;;  %v8566_v58 = vld [vmem:[%s10619_s1 + $0x120] sm:$0xff]   ;;  %v8570_v62 = vld [vmem:[%s10619_s1 + $0x128] sm:$0xff]   ;;  %v8572_v0 = vld [vmem:[%s10619_s1 + $0x170] sm:$0xff]  }
  0x92   :  { %8319 = vmatpush3.bf16.msra.mxu1 %v8535_v19  ;;  %8298 = vmatprep.subr.bf16.mxu0 %v8536_v20  ;;  %v8567_v59 = vld [vmem:[%s10619_s1 + $0x1a0] sm:$0xff]   ;;  %v8571_v63 = vld [vmem:[%s10619_s1 + $0x1a8] sm:$0xff]   ;;  %v8573_v1 = vld [vmem:[%s10619_s1 + $0x1f0] sm:$0xff]  }
  0x93   :  { %8320 = vmatprep.subr.bf16.mxu1 %v8537_v21  ;;  %v8574_v2 = vld [vmem:[%s10619_s1 + $0x130] sm:$0xff]   ;;  %v8576_v4 = vld [vmem:[%s10619_s1 + $0x178] sm:$0xff]   ;;  %v126_v8 = vld [vmem:[#allocation2 + $0x28] sm:$0xff] }
  0x94   :  { %v8575_v3 = vld [vmem:[%s10619_s1 + $0x1b0] sm:$0xff]   ;;  %v8577_v5 = vld [vmem:[%s10619_s1 + $0x1f8] sm:$0xff]   ;;  %v134_v10 = vpack.c.bf16 %v126_v8, %v126_v8  ;;  %v125_v12 = vld [vmem:[#allocation2 + $0x20] sm:$0xff] }
  0x95   :  { %8299 = vmatpush3.bf16.msra.mxu0 %v8538_v22  ;;  %v8578_v6 = vld [vmem:[%s10619_s1 + $0x138] sm:$0xff]   ;;  %v127_v13 = vld [vmem:[#allocation2 + $0x30] sm:$0xff]  ;;  %v133_v14 = vpack.c.bf16 %v125_v12, %v125_v12  ;;  %v818_v16 = vld [vmem:[#allocation6] sm:$0xff] }
  0x96   :  { %8321 = vmatpush3.bf16.msra.mxu1 %v8539_v23  ;;  %8300 = vmatprep.subr.bf16.mxu0 %v8540_v24  ;;  %v8579_v7 = vld [vmem:[%s10619_s1 + $0x1b8] sm:$0xff]   ;;  %v135_v15 = vpack.c.bf16 %v127_v13, %v127_v13  ;;  %v822_v17 = vld [vmem:[#allocation6 + $0x20] sm:$0xff]  ;;  %v819_v18 = vld [vmem:[#allocation6 + $0x8] sm:$0xff] }
  0x97   :  { %8322 = vmatprep.subr.bf16.mxu1 %v8541_v25  ;;  %v128_v9 = vld [vmem:[#allocation2 + $0x38] sm:$0xff]  ;;  %v7435_v19 = vcombine.low %v818_v16, %v822_v17  ;;  %v7436_v20 = vcombine.high %v818_v16, %v822_v17  ;;  %v823_v21 = vld [vmem:[#allocation6 + $0x28] sm:$0xff]  ;;  %v826_v22 = vld [vmem:[#allocation6 + $0x40] sm:$0xff] }
  0x98   :  { %v136_v11 = vpack.c.bf16 %v128_v9, %v128_v9  ;;  %v830_v23 = vld [vmem:[#allocation6 + $0x60] sm:$0xff]  ;;  %v7437_v24 = vcombine.low %v819_v18, %v823_v21  ;;  %v7438_v25 = vcombine.high %v819_v18, %v823_v21  ;;  %v835_v34 = vld [vmem:[#allocation6 + $0x88] sm:$0xff]  ;;  %v828_v17 = vld [vmem:[#allocation6 + $0x50] sm:$0xff] }
  0x99   :  { %8301 = vmatpush3.bf16.msra.mxu0 %v8542_v26  ;;  %v7444_v26 = vcombine.high %v826_v22, %v830_v23  ;;  %v834_v32 = vld [vmem:[#allocation6 + $0x80] sm:$0xff]  ;;  %v839_v36 = vld [vmem:[#allocation6 + $0xa8] sm:$0xff]  ;;  %v832_v18 = vld [vmem:[#allocation6 + $0x70] sm:$0xff] }
  0x9a   :  { %8323 = vmatpush3.bf16.msra.mxu1 %v8543_v27  ;;  %8302 = vmatprep.subr.bf16.mxu0 %v8544_v28  ;;  %v827_v27 = vld [vmem:[#allocation6 + $0x48] sm:$0xff]  ;;  %v838_v33 = vld [vmem:[#allocation6 + $0xa0] sm:$0xff]  ;;  %v7453_v38 = vcombine.low %v835_v34, %v839_v36 }
  0x9b   :  { %8324 = vmatprep.subr.bf16.mxu1 %v8545_v29  ;;  %v831_v28 = vld [vmem:[#allocation6 + $0x68] sm:$0xff]  ;;  %v7452_v35 = vcombine.high %v834_v32, %v838_v33 }
  0x9c   :  { %v7446_v29 = vcombine.high %v827_v27, %v831_v28 }
  0x9d   :  { %8303 = vmatpush3.bf16.msra.mxu0 %v8546_v30  ;;  %v7443_v30 = vcombine.low %v826_v22, %v830_v23  ;;  %v836_v23 = vld [vmem:[#allocation6 + $0x90] sm:$0xff] }
  0x9e   :  { %8325 = vmatpush3.bf16.msra.mxu1 %v8547_v31  ;;  %8332 = vmatprep.subr.bf16.mxu0 %v8548_v40  ;;  %v7445_v31 = vcombine.low %v827_v27, %v831_v28  ;;  %v842_v40 = vld [vmem:[#allocation6 + $0xc0] sm:$0xff]  ;;  %v7448_v28 = vcombine.high %v828_v17, %v832_v18 }
  0x9f   :  { %8354 = vmatprep.subr.bf16.mxu1 %v8549_v41  ;;  %v846_v41 = vld [vmem:[#allocation6 + $0xe0] sm:$0xff] }
  0xa0   :  { %689 = vmatmul.mubr.bf16.vlgmr.msra.gmra.mrb[0].mxu0 %v129_v37  ;;  %v7451_v37 = vcombine.low %v834_v32, %v838_v33  ;;  %v844_v32 = vld [vmem:[#allocation6 + $0xd0] sm:$0xff] }
  0xa1   :  { %729 = vmatmul.mubr.bf16.vlgmr.msra.gmra.mrb[0].mxu1 %v131_v39  ;;  %8333 = vmatpush3.bf16.msra.mxu0 %v8550_v42  ;;  %v7454_v39 = vcombine.high %v835_v34, %v839_v36  ;;  %v843_v42 = vld [vmem:[#allocation6 + $0xc8] sm:$0xff]  ;;  %v848_v33 = vld [vmem:[#allocation6 + $0xf0] sm:$0xff]  ;;  %v845_v34 = vld [vmem:[#allocation6 + $0xd8] sm:$0xff] }
  0xa2   :  { %8355 = vmatpush3.bf16.msra.mxu1 %v8551_v43  ;;  %8334 = vmatprep.subr.bf16.mxu0 %v8552_v44  ;;  %v7460_v43 = vcombine.high %v842_v40, %v846_v41  ;;  %v847_v44 = vld [vmem:[#allocation6 + $0xe8] sm:$0xff] }
  0xa3   :  { %8356 = vmatprep.subr.bf16.mxu1 %v8553_v45  ;;  %768 = vmatprep.mubr.bf16.mxu0 %v134_v10  ;;  %v7459_v45 = vcombine.low %v842_v40, %v846_v41  ;;  %v7464_v40 = vcombine.high %v844_v32, %v848_v33 }
  0xa4   :  { %808 = vmatprep.mubr.bf16.mxu1 %v136_v11 }
  0xa5   :  { %8335 = vmatpush3.bf16.msra.mxu0 %v8554_v46  ;;  %v7461_v46 = vcombine.low %v843_v42, %v847_v44 }
  0xa6   :  { %8357 = vmatpush3.bf16.msra.mxu1 %v8555_v47  ;;  %8336 = vmatprep.subr.bf16.mxu0 %v8556_v48  ;;  %v7462_v47 = vcombine.high %v843_v42, %v847_v44  ;;  %v820_v48 = vld [vmem:[#allocation6 + $0x10] sm:$0xff]  ;;  %v8582_v42 = vld [vmem:[#allocation9 + $0x4] ss:$48 sps:$4 sm:$0xff]   ;;  %v7463_v44 = vcombine.low %v844_v32, %v848_v33 }
  0xa7   :  { %8358 = vmatprep.subr.bf16.mxu1 %v8557_v49  ;;  %v824_v49 = vld [vmem:[#allocation6 + $0x30] sm:$0xff]  ;;  %v8660_v32 = vld [vmem:[#allocation9 + $0x4e4] ss:$48 sps:$4 sm:$0xff]  }
  0xa8   :  { %v8663_v33 = vld [vmem:[#allocation9 + $0x4ec] ss:$48 sps:$4 sm:$0xff]  }
  0xa9   :  { %8337 = vmatpush3.bf16.msra.mxu0 %v8558_v50  ;;  %v821_v50 = vld [vmem:[#allocation6 + $0x18] sm:$0xff] }
  0xaa   :  { %8359 = vmatpush3.bf16.msra.mxu1 %v8559_v51  ;;  %8338 = vmatprep.subr.bf16.mxu0 %v8560_v52  ;;  %v7439_v51 = vcombine.low %v820_v48, %v824_v49  ;;  %v7440_v52 = vcombine.high %v820_v48, %v824_v49  ;;  %v8588_v48 = vld [vmem:[#allocation9 + $0x64] ss:$48 sps:$4 sm:$0xff]   ;;  %v8591_v49 = vld [vmem:[#allocation9 + $0x6c] ss:$48 sps:$4 sm:$0xff]  }
  0xab   :  { %8360 = vmatprep.subr.bf16.mxu1 %v8561_v53  ;;  %v825_v53 = vld [vmem:[#allocation6 + $0x38] sm:$0xff] }
  0xad   :  { %8339 = vmatpush3.bf16.msra.mxu0 %v8562_v54  ;;  %v10026_v54 = vmov 0  }
  0xae   :  { %8361 = vmatpush3.bf16.msra.mxu1 %v8563_v55  ;;  %8340 = vmatprep.subr.bf16.mxu0 %v8564_v56  ;;  %v7441_v55 = vcombine.low %v821_v50, %v825_v53  ;;  %v7442_v56 = vcombine.high %v821_v50, %v825_v53  ;;  %v8586_v50 = vld [vmem:[#allocation9 + $0x60] ss:$48 sps:$4 sm:$0xff]   ;;  %v8597_v53 = vld [vmem:[#allocation9 + $0xcc] ss:$48 sps:$4 sm:$0xff]  }
  0xaf   :  { %8362 = vmatprep.subr.bf16.mxu1 %v8565_v57  ;;  %v7370_v57 = vld [vmem:[#allocation4] ss:$0 sm:$0xff] }
  0xb1   :  { %8341 = vmatpush3.bf16.msra.mxu0 %v8566_v58 }
  0xb2   :  { %8363 = vmatpush3.bf16.msra.mxu1 %v8567_v59  ;;  %8342 = vmatprep.subr.bf16.mxu0 %v8568_v60 }
  0xb3   :  { %8364 = vmatprep.subr.bf16.mxu1 %v8569_v61 }
  0xb5   :  { %8343 = vmatpush3.bf16.msra.mxu0 %v8570_v62 }
  0xb6   :  { %8365 = vmatpush3.bf16.msra.mxu1 %v8571_v63  ;;  %8344 = vmatprep.subr.bf16.mxu0 %v8572_v0 }
  0xb7   :  { %8366 = vmatprep.subr.bf16.mxu1 %v8573_v1 }
  0xb9   :  { %8345 = vmatpush3.bf16.msra.mxu0 %v8574_v2 }
  0xba   :  { %8367 = vmatpush3.bf16.msra.mxu1 %v8575_v3  ;;  %8346 = vmatprep.subr.bf16.mxu0 %v8576_v4 }
  0xbb   :  { %8368 = vmatprep.subr.bf16.mxu1 %v8577_v5 }
  0xbd   :  { %8347 = vmatpush3.bf16.msra.mxu0 %v8578_v6 }
  0xbe   :  { %8369 = vmatpush3.bf16.msra.mxu1 %v8579_v7  ;;  %1056 = vmatprep.subr.bf16.mxu0 %v7436_v20  ;;  %v833_v20 = vld [vmem:[#allocation6 + $0x78] sm:$0xff] }
  0xbf   :  { %1097 = vmatprep.subr.bf16.mxu1 %v7438_v25  ;;  %v837_v25 = vld [vmem:[#allocation6 + $0x98] sm:$0xff] }
  0xc0   :  { %769 = vmatmul.mubr.bf16.vlgmr.msra.gmra.mrb[4].mxu0 %v133_v14 }
  0xc1   :  { %809 = vmatmul.mubr.bf16.vlgmr.msra.gmra.mrb[4].mxu1 %v135_v15  ;;  %1057 = vmatpush1.bf16.msra.mxu0 %v7435_v19  ;;  %v829_v19 = vld [vmem:[#allocation6 + $0x58] sm:$0xff] }
  0xc2   :  { %1098 = vmatpush1.bf16.msra.mxu1 %v7437_v24  ;;  %1058 = vmatprep.subr.bf16.mxu0 %v7444_v26  ;;  %v840_v24 = vld [vmem:[#allocation6 + $0xb0] sm:$0xff]  ;;  %v841_v26 = vld [vmem:[#allocation6 + $0xb8] sm:$0xff] }
  0xc3   :  { %1099 = vmatprep.subr.bf16.mxu1 %v7446_v29  ;;  %1088 = vmatprep.mubr.bf16.mxu0 %v10026_v54  ;;  %v7450_v29 = vcombine.high %v829_v19, %v833_v20  ;;  %v7456_v36 = vcombine.high %v836_v23, %v840_v24 }
  0xc4   :  { %1129 = vmatprep.mubr.bf16.mxu1 %v10026_v54 }
  0xc5   :  { %1059 = vmatpush1.bf16.msra.mxu0 %v7443_v30  ;;  %v7447_v30 = vcombine.low %v828_v17, %v832_v18  ;;  %v8639_v17 = vld [vmem:[#allocation9 + $0x36c] ss:$48 sps:$4 sm:$0xff]   ;;  %v8634_v18 = vld [vmem:[#allocation9 + $0x360] ss:$48 sps:$4 sm:$0xff]  }
  0xc6   :  { %1100 = vmatpush1.bf16.msra.mxu1 %v7445_v31  ;;  %1060 = vmatprep.subr.bf16.mxu0 %v7452_v35  ;;  %v7449_v31 = vcombine.low %v829_v19, %v833_v20  ;;  %v849_v35 = vld [vmem:[#allocation6 + $0xf8] sm:$0xff]  ;;  %v8637_v19 = vld [vmem:[#allocation9 + $0x368] ss:$48 sps:$4 sm:$0xff]  }
  0xc7   :  { %1101 = vmatprep.subr.bf16.mxu1 %v7454_v39  ;;  %v7457_v39 = vcombine.low %v837_v25, %v841_v26  ;;  %v7466_v41 = vcombine.high %v845_v34, %v849_v35  ;;  %v8642_v20 = vld [vmem:[#allocation9 + $0x3c4] ss:$48 sps:$4 sm:$0xff]  }
  0xc9   :  { %1061 = vmatpush1.bf16.msra.mxu0 %v7451_v37  ;;  %v7458_v37 = vcombine.high %v837_v25, %v841_v26  ;;  %v8651_v25 = vld [vmem:[#allocation9 + $0x42c] ss:$48 sps:$4 sm:$0xff]   ;;  %v8646_v26 = vld [vmem:[#allocation9 + $0x420] ss:$48 sps:$4 sm:$0xff]  }
  0xca   :  { %1102 = vmatpush1.bf16.msra.mxu1 %v7453_v38  ;;  %1062 = vmatprep.subr.bf16.mxu0 %v7460_v43  ;;  %v7455_v38 = vcombine.low %v836_v23, %v840_v24  ;;  %v8585_v43 = vld [vmem:[#allocation9 + $0xc] ss:$48 sps:$4 sm:$0xff]   ;;  %v8643_v23 = vld [vmem:[#allocation9 + $0x3c8] ss:$48 sps:$4 sm:$0xff]   ;;  %v8648_v24 = vld [vmem:[#allocation9 + $0x424] ss:$48 sps:$4 sm:$0xff]  }
  0xcb   :  { %1103 = vmatprep.subr.bf16.mxu1 %v7462_v47  ;;  %v8583_v47 = vld [vmem:[#allocation9 + $0x8] ss:$48 sps:$4 sm:$0xff]  }
  0xcd   :  { %1063 = vmatpush1.bf16.msra.mxu0 %v7459_v45  ;;  %v7465_v45 = vcombine.low %v845_v34, %v849_v35  ;;  %v8658_v34 = vld [vmem:[#allocation9 + $0x4e0] ss:$48 sps:$4 sm:$0xff]   ;;  %v8661_v35 = vld [vmem:[#allocation9 + $0x4e8] ss:$48 sps:$4 sm:$0xff]  }
  0xce   :  { %1104 = vmatpush1.bf16.msra.mxu1 %v7461_v46  ;;  %1138 = vmatprep.subr.bf16.mxu0 %v7440_v52  ;;  %v8580_v46 = vld [vmem:[#allocation9] ss:$48 sps:$4 sm:$0xff]   ;;  %v8594_v52 = vld [vmem:[#allocation9 + $0xc4] ss:$48 sps:$4 sm:$0xff]  }
  0xcf   :  { %1179 = vmatprep.subr.bf16.mxu1 %v7442_v56  ;;  %v8600_v56 = vld [vmem:[#allocation9 + $0x124] ss:$48 sps:$4 sm:$0xff]  }
 0x173   :  { %v8304_v58 = vpop.f32.mrb[0].mxu0 }
 0x174   :  { %v8326_v59 = vpop.f32.mrb[0].mxu1  ;;  %v8305_v60 = vpop.f32.mrb[1].mxu0 }
 0x175   :  { %v8327_v61 = vpop.f32.mrb[1].mxu1  ;;  %v8306_v62 = vadd.f32 %v8305_v60, %v8304_v58  ;;  %v8307_v0 = vpop.f32.mrb[2].mxu0  ;;  %v8598_v58 = vld [vmem:[#allocation9 + $0x120] ss:$48 sps:$4 sm:$0xff]   ;;  %v8606_v60 = vld [vmem:[#allocation9 + $0x184] ss:$48 sps:$4 sm:$0xff]  }
 0x176   :  { %v8328_v63 = vadd.f32 %v8327_v61, %v8326_v59  ;;  %v8329_v1 = vpop.f32.mrb[2].mxu1  ;;  %v8308_v2 = vpop.f32.mrb[3].mxu0  ;;  %v8601_v59 = vld [vmem:[#allocation9 + $0x128] ss:$48 sps:$4 sm:$0xff]   ;;  %v8609_v61 = vld [vmem:[#allocation9 + $0x18c] ss:$48 sps:$4 sm:$0xff]  }
 0x177   :  { %v8330_v3 = vpop.f32.mrb[3].mxu1  ;;  %v691_v4 = vadd.f32 %v8306_v62, %v7370_v57  ;;  %v8603_v57 = vld [vmem:[#allocation9 + $0x12c] ss:$48 sps:$4 sm:$0xff]   ;;  %v8604_v62 = vld [vmem:[#allocation9 + $0x180] ss:$48 sps:$4 sm:$0xff]  }
 0x178   :  { %v8612_v0 = vld [vmem:[#allocation9 + $0x1e4] ss:$48 sps:$4 sm:$0xff]   ;;  %v8615_v1 = vld [vmem:[#allocation9 + $0x1ec] ss:$48 sps:$4 sm:$0xff]   ;;  %v8610_v2 = vld [vmem:[#allocation9 + $0x1e0] ss:$48 sps:$4 sm:$0xff]  }
 0x179   :  { %v731_v5 = vadd.f32 %v8328_v63, %v691_v4  ;;  %v8607_v63 = vld [vmem:[#allocation9 + $0x188] ss:$48 sps:$4 sm:$0xff]   ;;  %v8618_v4 = vld [vmem:[#allocation9 + $0x244] ss:$48 sps:$4 sm:$0xff]  }
 0x17a   :  { %v8613_v3 = vld [vmem:[#allocation9 + $0x1e8] ss:$48 sps:$4 sm:$0xff]  }
 0x193   :  { %v8348_v6 = vpop.f32.mrb[4].mxu0 }
 0x194   :  { %v8370_v7 = vpop.f32.mrb[4].mxu1  ;;  %v8349_v8 = vpop.f32.mrb[5].mxu0 }
 0x195   :  { %v8350_v9 = vadd.f32 %v8349_v8, %v8348_v6  ;;  %v8371_v10 = vpop.f32.mrb[5].mxu1  ;;  %v8351_v11 = vpop.f32.mrb[6].mxu0  ;;  %v8616_v6 = vld [vmem:[#allocation9 + $0x240] ss:$48 sps:$4 sm:$0xff]   ;;  %v8624_v8 = vld [vmem:[#allocation9 + $0x2a4] ss:$48 sps:$4 sm:$0xff]  }
 0x196   :  { %v8372_v12 = vadd.f32 %v8371_v10, %v8370_v7  ;;  %v8373_v13 = vpop.f32.mrb[6].mxu1  ;;  %v8352_v14 = vpop.f32.mrb[7].mxu0  ;;  %v8619_v7 = vld [vmem:[#allocation9 + $0x248] ss:$48 sps:$4 sm:$0xff]   ;;  %v8622_v10 = vld [vmem:[#allocation9 + $0x2a0] ss:$48 sps:$4 sm:$0xff]  }
 0x197   :  { %v771_v15 = vadd.f32 %v8350_v9, %v731_v5  ;;  %v8374_v16 = vpop.f32.mrb[7].mxu1  ;;  %v8621_v5 = vld [vmem:[#allocation9 + $0x24c] ss:$48 sps:$4 sm:$0xff]   ;;  %v8625_v11 = vld [vmem:[#allocation9 + $0x2a8] ss:$48 sps:$4 sm:$0xff]  }
 0x198   :  { %v8627_v9 = vld [vmem:[#allocation9 + $0x2ac] ss:$48 sps:$4 sm:$0xff]   ;;  %v8628_v14 = vld [vmem:[#allocation9 + $0x300] ss:$48 sps:$4 sm:$0xff]   ;;  %v8636_v16 = vld [vmem:[#allocation9 + $0x364] ss:$48 sps:$4 sm:$0xff]  }
 0x199   :  { %v811_v21 = vadd.f32 %v8372_v12, %v771_v15  ;;  %v8630_v12 = vld [vmem:[#allocation9 + $0x304] ss:$48 sps:$4 sm:$0xff]   ;;  %v8633_v13 = vld [vmem:[#allocation9 + $0x30c] ss:$48 sps:$4 sm:$0xff]   ;;  %v8631_v15 = vld [vmem:[#allocation9 + $0x308] ss:$48 sps:$4 sm:$0xff]  }
 0x19b   :  { %v816_v22 = vmax.f32 %v811_v21, 0.0  ;;  %v8645_v21 = vld [vmem:[#allocation9 + $0x3cc] ss:$48 sps:$4 sm:$0xff]  }
 0x19d   :  { %v817_v27 = vpack.c.bf16 %v816_v22, %v816_v22  ;;  %v8640_v22 = vld [vmem:[#allocation9 + $0x3c0] ss:$48 sps:$4 sm:$0xff]  }
 0x19f   :  { %7467 = vmatmul.mubr.msk.bf16.vlgmr.msra.gmra.mrb[8].mxu0 %vm1052_vm0, %v817_v27  ;;  %7468 = vmatmul.mubr.msk.bf16.vlgmr.msra.gmra.mrb[8].mxu1 %vm1052_vm0, %v817_v27 }
 0x1a0   :  { %1139 = vmatpush1.bf16.msra.mxu0 %v7439_v51  ;;  %1180 = vmatpush1.bf16.msra.mxu1 %v7441_v55  ;;  %v8589_v51 = vld [vmem:[#allocation9 + $0x68] ss:$48 sps:$4 sm:$0xff]  }
 0x1a1   :  { %1140 = vmatprep.subr.bf16.mxu0 %v7448_v28  ;;  %1181 = vmatprep.subr.bf16.mxu1 %v7450_v29  ;;  %v8595_v55 = vld [vmem:[#allocation9 + $0xc8] ss:$48 sps:$4 sm:$0xff]   ;;  %v8654_v28 = vld [vmem:[#allocation9 + $0x484] ss:$48 sps:$4 sm:$0xff]   ;;  %v8657_v29 = vld [vmem:[#allocation9 + $0x48c] ss:$48 sps:$4 sm:$0xff]  }
 0x1a2   :  { %1170 = vmatprep.mubr.bf16.mxu0 %v10026_v54  ;;  %1211 = vmatprep.mubr.bf16.mxu1 %v10026_v54  ;;  %v8592_v54 = vld [vmem:[#allocation9 + $0xc0] ss:$48 sps:$4 sm:$0xff]  }
 0x1a4   :  { %1141 = vmatpush1.bf16.msra.mxu0 %v7447_v30  ;;  %1182 = vmatpush1.bf16.msra.mxu1 %v7449_v31  ;;  %v8652_v30 = vld [vmem:[#allocation9 + $0x480] ss:$48 sps:$4 sm:$0xff]   ;;  %v8655_v31 = vld [vmem:[#allocation9 + $0x488] ss:$48 sps:$4 sm:$0xff]  }
 0x1a5   :  { %1142 = vmatprep.subr.bf16.mxu0 %v7456_v36  ;;  %1183 = vmatprep.subr.bf16.mxu1 %v7458_v37  ;;  %v8666_v36 = vld [vmem:[#allocation9 + $0x544] ss:$48 sps:$4 sm:$0xff]   ;;  %v8669_v37 = vld [vmem:[#allocation9 + $0x54c] ss:$48 sps:$4 sm:$0xff]  }
 0x1a8   :  { %1143 = vmatpush1.bf16.msra.mxu0 %v7455_v38  ;;  %1184 = vmatpush1.bf16.msra.mxu1 %v7457_v39  ;;  %v8664_v38 = vld [vmem:[#allocation9 + $0x540] ss:$48 sps:$4 sm:$0xff]   ;;  %v8667_v39 = vld [vmem:[#allocation9 + $0x548] ss:$48 sps:$4 sm:$0xff]  }
 0x1a9   :  { %1144 = vmatprep.subr.bf16.mxu0 %v7464_v40  ;;  %1185 = vmatprep.subr.bf16.mxu1 %v7466_v41  ;;  %v8672_v40 = vld [vmem:[#allocation9 + $0x5a4] ss:$48 sps:$4 sm:$0xff]   ;;  %v8675_v41 = vld [vmem:[#allocation9 + $0x5ac] ss:$48 sps:$4 sm:$0xff]  }
 0x1ac   :  { %1145 = vmatpush1.bf16.msra.mxu0 %v7463_v44  ;;  %1186 = vmatpush1.bf16.msra.mxu1 %v7465_v45  ;;  %v8678_v44 = vld [vmem:[#allocation9 + $0x604] ss:$48 sps:$4 sm:$0xff]   ;;  %v8681_v45 = vld [vmem:[#allocation9 + $0x60c] ss:$48 sps:$4 sm:$0xff]  }
 0x1ad   :  { %5964 = vmatprep.subr.bf16.mxu0 %v8582_v42  ;;  %6128 = vmatprep.subr.bf16.mxu1 %v8585_v43  ;;  %v8670_v42 = vld [vmem:[#allocation9 + $0x5a0] ss:$48 sps:$4 sm:$0xff]   ;;  %v8673_v43 = vld [vmem:[#allocation9 + $0x5a8] ss:$48 sps:$4 sm:$0xff]  }
 0x1af   :  { %7469 = vmatmul.mubr.msk.bf16.vlgmr.msra.gmra.mrb[12].mxu0 %vm1052_vm0, %v817_v27  ;;  %7470 = vmatmul.mubr.msk.bf16.vlgmr.msra.gmra.mrb[12].mxu1 %vm1052_vm0, %v817_v27  ;;  %v8649_v27 = vld [vmem:[#allocation9 + $0x428] ss:$48 sps:$4 sm:$0xff]  }
 0x1b0   :  { %5965 = vmatpush1.bf16.msra.mxu0 %v8580_v46  ;;  %6129 = vmatpush1.bf16.msra.mxu1 %v8583_v47  ;;  %v852_v46 = vlaneseq }
 0x1b1   :  { %5966 = vmatprep.subr.bf16.mxu0 %v8588_v48  ;;  %6130 = vmatprep.subr.bf16.mxu1 %v8591_v49  ;;  %v10367_v49 = vld [vmem:[#allocation7] sm:$0xff] }
 0x1b2   :  { %v10362_v47 = vshrl.u32 %v852_v46, 7 }
 0x1b4   :  { %5967 = vmatpush1.bf16.msra.mxu0 %v8586_v50  ;;  %6131 = vmatpush1.bf16.msra.mxu1 %v8589_v51  ;;  %v10365_v48 = vsub.s32 0, %v10362_v47  ;;  %v10370_v50 = vsub.s32 1, %v10362_v47  ;;  %v10373_v51 = vsub.s32 3, %v10362_v47  ;;  %v10404_v46 = vsub.s32 2, %v10362_v47 }
 0x1b5   :  { %5968 = vmatprep.subr.bf16.mxu0 %v8594_v52  ;;  %6132 = vmatprep.subr.bf16.mxu1 %v8597_v53 }
 0x1b6   :  { %v855_v52 = vrot.slane %v10367_v49, %v10365_v48  ;;  %v859_v53 = vrot.slane %v10367_v49, %v10370_v50 }
 0x1b8   :  { %5969 = vmatpush1.bf16.msra.mxu0 %v8592_v54  ;;  %6133 = vmatpush1.bf16.msra.mxu1 %v8595_v55  ;;  %v867_v54 = vrot.slane %v10367_v49, %v10373_v51 }
 0x1b9   :  { %5970 = vmatprep.subr.bf16.mxu0 %v8600_v56  ;;  %6134 = vmatprep.subr.bf16.mxu1 %v8603_v57 }
 0x1bc   :  { %5971 = vmatpush1.bf16.msra.mxu0 %v8598_v58  ;;  %6135 = vmatpush1.bf16.msra.mxu1 %v8601_v59 }
 0x1bd   :  { %5972 = vmatprep.subr.bf16.mxu0 %v8606_v60  ;;  %6136 = vmatprep.subr.bf16.mxu1 %v8609_v61 }
 0x1c0   :  { %5973 = vmatpush1.bf16.msra.mxu0 %v8604_v62  ;;  %6137 = vmatpush1.bf16.msra.mxu1 %v8607_v63 }
 0x1c1   :  { %5974 = vmatprep.subr.bf16.mxu0 %v8612_v0  ;;  %6138 = vmatprep.subr.bf16.mxu1 %v8615_v1 }
 0x1c4   :  { %5975 = vmatpush1.bf16.msra.mxu0 %v8610_v2  ;;  %6139 = vmatpush1.bf16.msra.mxu1 %v8613_v3 }
 0x1c5   :  { %5976 = vmatprep.subr.bf16.mxu0 %v8618_v4  ;;  %6140 = vmatprep.subr.bf16.mxu1 %v8621_v5 }
 0x1c8   :  { %5977 = vmatpush1.bf16.msra.mxu0 %v8616_v6  ;;  %6141 = vmatpush1.bf16.msra.mxu1 %v8619_v7 }
 0x1c9   :  { %5978 = vmatprep.subr.bf16.mxu0 %v8624_v8  ;;  %6142 = vmatprep.subr.bf16.mxu1 %v8627_v9 }
 0x1cc   :  { %5979 = vmatpush1.bf16.msra.mxu0 %v8622_v10  ;;  %6143 = vmatpush1.bf16.msra.mxu1 %v8625_v11 }
 0x1cd   :  { %5980 = vmatprep.subr.bf16.mxu0 %v8630_v12  ;;  %6144 = vmatprep.subr.bf16.mxu1 %v8633_v13 }
 0x1d0   :  { %5981 = vmatpush1.bf16.msra.mxu0 %v8628_v14  ;;  %6145 = vmatpush1.bf16.msra.mxu1 %v8631_v15 }
 0x1d1   :  { %5982 = vmatprep.subr.bf16.mxu0 %v8636_v16  ;;  %6146 = vmatprep.subr.bf16.mxu1 %v8639_v17 }
 0x1d4   :  { %5983 = vmatpush1.bf16.msra.mxu0 %v8634_v18  ;;  %6147 = vmatpush1.bf16.msra.mxu1 %v8637_v19 }
 0x1d5   :  { %5984 = vmatprep.subr.bf16.mxu0 %v8642_v20  ;;  %6148 = vmatprep.subr.bf16.mxu1 %v8645_v21 }
 0x1d8   :  { %5985 = vmatpush1.bf16.msra.mxu0 %v8640_v22  ;;  %6149 = vmatpush1.bf16.msra.mxu1 %v8643_v23 }
 0x1d9   :  { %5986 = vmatprep.subr.bf16.mxu0 %v8648_v24  ;;  %6150 = vmatprep.subr.bf16.mxu1 %v8651_v25  ;;  %v9844_v24 = vld [vmem:[#allocation2] sm:$0xff] }
 0x1dc   :  { %5987 = vmatpush1.bf16.msra.mxu0 %v8646_v26  ;;  %6151 = vmatpush1.bf16.msra.mxu1 %v8649_v27  ;;  %v9845_v27 = vld [vmem:[#allocation2 + $0x8] sm:$0xff] }
 0x1dd   :  { %5988 = vmatprep.subr.bf16.mxu0 %v8654_v28  ;;  %6152 = vmatprep.subr.bf16.mxu1 %v8657_v29  ;;  %v9846_v29 = vld [vmem:[#allocation2 + $0x18] sm:$0xff] }
 0x1e0   :  { %5989 = vmatpush1.bf16.msra.mxu0 %v8652_v30  ;;  %6153 = vmatpush1.bf16.msra.mxu1 %v8655_v31 }
 0x1e1   :  { %5990 = vmatprep.subr.bf16.mxu0 %v8660_v32  ;;  %6154 = vmatprep.subr.bf16.mxu1 %v8663_v33  ;;  %v8676_v32 = vld [vmem:[#allocation9 + $0x600] ss:$48 sps:$4 sm:$0xff]   ;;  %v8679_v33 = vld [vmem:[#allocation9 + $0x608] ss:$48 sps:$4 sm:$0xff]  }
 0x1e4   :  { %5991 = vmatpush1.bf16.msra.mxu0 %v8658_v34  ;;  %6155 = vmatpush1.bf16.msra.mxu1 %v8661_v35  ;;  %v8684_v35 = vld [vmem:[#allocation9 + $0x664] ss:$48 sps:$4 sm:$0xff]  }
 0x1e5   :  { %5992 = vmatprep.subr.bf16.mxu0 %v8666_v36  ;;  %6156 = vmatprep.subr.bf16.mxu1 %v8669_v37  ;;  %v8687_v36 = vld [vmem:[#allocation9 + $0x66c] ss:$48 sps:$4 sm:$0xff]  }
 0x1e8   :  { %5993 = vmatpush1.bf16.msra.mxu0 %v8664_v38  ;;  %6157 = vmatpush1.bf16.msra.mxu1 %v8667_v39  ;;  %v8682_v38 = vld [vmem:[#allocation9 + $0x660] ss:$48 sps:$4 sm:$0xff]   ;;  %v8685_v39 = vld [vmem:[#allocation9 + $0x668] ss:$48 sps:$4 sm:$0xff]  }
 0x1e9   :  { %5994 = vmatprep.subr.bf16.mxu0 %v8672_v40  ;;  %6158 = vmatprep.subr.bf16.mxu1 %v8675_v41  ;;  %v8690_v40 = vld [vmem:[#allocation9 + $0x6c4] ss:$48 sps:$4 sm:$0xff]   ;;  %v8693_v41 = vld [vmem:[#allocation9 + $0x6cc] ss:$48 sps:$4 sm:$0xff]  }
 0x1ec   :  { %5995 = vmatpush1.bf16.msra.mxu0 %v8670_v42  ;;  %6159 = vmatpush1.bf16.msra.mxu1 %v8673_v43  ;;  %v8688_v42 = vld [vmem:[#allocation9 + $0x6c0] ss:$48 sps:$4 sm:$0xff]   ;;  %v8691_v43 = vld [vmem:[#allocation9 + $0x6c8] ss:$48 sps:$4 sm:$0xff]  }
 0x1ed   :  { %6005 = vmatprep.subr.bf16.mxu0 %v8678_v44  ;;  %6169 = vmatprep.subr.bf16.mxu1 %v8681_v45  ;;  %v8696_v44 = vld [vmem:[#allocation9 + $0x724] ss:$48 sps:$4 sm:$0xff]   ;;  %v8699_v45 = vld [vmem:[#allocation9 + $0x72c] ss:$48 sps:$4 sm:$0xff]  }
 0x272   :  { %v1090_v55 = vpop.f32.mrb[8].mxu0  ;;  %v10381_v56 = vpop.f32.mrb[8].mxu1 }
 0x273   :  { %v1091_v57 = vadd.f32 %v1090_v55, %v855_v52  ;;  %v1092_v58 = vpop.f32.mrb[9].mxu0  ;;  %v1133_v59 = vpop.f32.mrb[9].mxu1  ;;  %v874_v52 = vsub.s32 5, %v10362_v47  ;;  %v8702_v55 = vld [vmem:[#allocation9 + $0x784] ss:$48 sps:$4 sm:$0xff]  }
 0x274   :  { %v1093_v60 = vadd.f32 %v1092_v58, %v859_v53  ;;  %v1134_v61 = vadd.f32 %v1133_v59, %v867_v54  ;;  %v1094_v62 = vpop.f32.mrb[10].mxu0  ;;  %v1135_v63 = vpop.f32.mrb[10].mxu1  ;;  %v8694_v53 = vld [vmem:[#allocation9 + $0x720] ss:$48 sps:$4 sm:$0xff]   ;;  %v8697_v54 = vld [vmem:[#allocation9 + $0x728] ss:$48 sps:$4 sm:$0xff]   ;;  %v863_v58 = vrot.slane %v10367_v49, %v10404_v46 }
 0x275   :  { %v1220_v0 = vadd.f32 %v1091_v57, %v1091_v57  ;;  %v1095_v1 = vpop.f32.mrb[11].mxu0  ;;  %v1136_v2 = vpop.f32.mrb[11].mxu1  ;;  %v8705_v57 = vld [vmem:[#allocation9 + $0x78c] ss:$48 sps:$4 sm:$0xff]   ;;  %v875_v59 = vrot.slane %v10367_v49, %v874_v52  ;;  %v8708_v62 = vld [vmem:[#allocation9 + $0x7e4] ss:$48 sps:$4 sm:$0xff]  }
 0x276   :  { %v1221_v3 = vadd.f32 %v1093_v60, %v1093_v60  ;;  %v1223_v4 = vadd.f32 %v1134_v61, %v1134_v61  ;;  %v8700_v60 = vld [vmem:[#allocation9 + $0x780] ss:$48 sps:$4 sm:$0xff]   ;;  %v8703_v61 = vld [vmem:[#allocation9 + $0x788] ss:$48 sps:$4 sm:$0xff]   ;;  %v8711_v63 = vld [vmem:[#allocation9 + $0x7ec] ss:$48 sps:$4 sm:$0xff]  }
 0x277   :  { %v7471_v5 = vmul.f32 -1.442695, %v1220_v0  ;;  %v1132_v0 = vadd.f32 %v10381_v56, %v863_v58  ;;  %v8706_v2 = vld [vmem:[#allocation9 + $0x7e0] ss:$48 sps:$4 sm:$0xff]   ;;  %v8723_v56 = vld [vmem:[#allocation9 + $0x8ac] ss:$48 sps:$4 sm:$0xff]  }
 0x278   :  { %v7472_v6 = vmul.f32 -1.442695, %v1221_v3  ;;  %v7474_v7 = vmul.f32 -1.442695, %v1223_v4  ;;  %v8709_v3 = vld [vmem:[#allocation9 + $0x7e8] ss:$48 sps:$4 sm:$0xff]  }
 0x279   :  { %9764 = vpow2.f32 %v7471_v5  ;;  %v8714_v4 = vld [vmem:[#allocation9 + $0x844] ss:$48 sps:$4 sm:$0xff]   ;;  %v8717_v5 = vld [vmem:[#allocation9 + $0x84c] ss:$48 sps:$4 sm:$0xff]  }
 0x27a   :  { %9766 = vpow2.f32 %v7472_v6  ;;  %v1222_v6 = vadd.f32 %v1132_v0, %v1132_v0  ;;  %v8765_v58 = vld [vmem:[#allocation9 + $0xb4c] ss:$48 sps:$4 sm:$0xff]  }
 0x27b   :  { %9768 = vpow2.f32 %v7474_v7 }
 0x282   :  { %v10383_v8 = vpop.f32.mrb[12].mxu0  ;;  %v10385_v9 = vpop.f32.mrb[12].mxu1 }
 0x283   :  { %v9765_v10 = vpop.eup %9764  ;;  %v10387_v11 = vpop.f32.mrb[13].mxu0 }
 0x284   :  { %v10389_v12 = vpop.f32.mrb[13].mxu1  ;;  %v1252_v13 = vadd.f32 1.0, %v9765_v10  ;;  %v1176_v14 = vpop.f32.mrb[14].mxu0  ;;  %v1175_v1 = vadd.f32 %v10387_v11, %v875_v59  ;;  %v8712_v10 = vld [vmem:[#allocation9 + $0x840] ss:$48 sps:$4 sm:$0xff]  }
 0x285   :  { %v1217_v15 = vpop.f32.mrb[14].mxu1  ;;  %v9767_v16 = vpop.eup %9766  ;;  %v8720_v14 = vld [vmem:[#allocation9 + $0x8a4] ss:$48 sps:$4 sm:$0xff]   ;;  %v8760_v59 = vld [vmem:[#allocation9 + $0xb40] ss:$48 sps:$4 sm:$0xff]  }
 0x286   :  { %v1177_v17 = vpop.f32.mrb[15].mxu0  ;;  %v1218_v18 = vpop.f32.mrb[15].mxu1  ;;  %9770 = vrcp.f32 %v1252_v13  ;;  %v1253_v20 = vadd.f32 1.0, %v9767_v16  ;;  %v1225_v7 = vadd.f32 %v1175_v1, %v1175_v1  ;;  %v8715_v13 = vld [vmem:[#allocation9 + $0x848] ss:$48 sps:$4 sm:$0xff]  }
 0x287   :  { %v9769_v19 = vpop.eup %9768  ;;  %v7473_v15 = vmul.f32 -1.442695, %v1222_v6  ;;  %v8718_v16 = vld [vmem:[#allocation9 + $0x8a0] ss:$48 sps:$4 sm:$0xff]   ;;  %v8721_v17 = vld [vmem:[#allocation9 + $0x8a8] ss:$48 sps:$4 sm:$0xff]  }
 0x288   :  { %v1255_v21 = vadd.f32 1.0, %v9769_v19  ;;  %9772 = vrcp.f32 %v1253_v20  ;;  %v7476_v11 = vmul.f32 -1.442695, %v1225_v7  ;;  %v8726_v18 = vld [vmem:[#allocation9 + $0x904] ss:$48 sps:$4 sm:$0xff]  }
 0x289   :  { %v8729_v19 = vld [vmem:[#allocation9 + $0x90c] ss:$48 sps:$4 sm:$0xff]   ;;  %v8724_v20 = vld [vmem:[#allocation9 + $0x900] ss:$48 sps:$4 sm:$0xff]  }
 0x28a   :  { %9774 = vrcp.f32 %v1255_v21  ;;  %v8727_v21 = vld [vmem:[#allocation9 + $0x908] ss:$48 sps:$4 sm:$0xff]   ;;  %v8766_v1 = vld [vmem:[#allocation9 + $0xba0] ss:$48 sps:$4 sm:$0xff]   ;;  %v8777_v6 = vld [vmem:[#allocation9 + $0xc0c] ss:$48 sps:$4 sm:$0xff]  }
 0x28b   :  { %9776 = vpow2.f32 %v7473_v15  ;;  %v9848_v7 = vld [vmem:[#allocation2 + $0x28] sm:$0xff] }
 0x28c   :  { %9778 = vpow2.f32 %v7476_v11  ;;  %v8780_v11 = vld [vmem:[#allocation9 + $0xc64] ss:$48 sps:$4 sm:$0xff]  }
 0x290   :  { %v9771_v22 = vpop.eup %9770 }
 0x291   :  { %v1276_v25 = vmul.f32 %v9844_v24, %v9771_v22  ;;  %v8732_v22 = vld [vmem:[#allocation9 + $0x964] ss:$48 sps:$4 sm:$0xff]   ;;  %v8730_v24 = vld [vmem:[#allocation9 + $0x960] ss:$48 sps:$4 sm:$0xff]  }
 0x292   :  { %v9773_v23 = vpop.eup %9772 }
 0x293   :  { %v1277_v28 = vmul.f32 %v9845_v27, %v9773_v23  ;;  %v10393_v34 = vpack.c.bf16 %v1276_v25, %v1276_v25  ;;  %v8735_v23 = vld [vmem:[#allocation9 + $0x96c] ss:$48 sps:$4 sm:$0xff]   ;;  %v8733_v25 = vld [vmem:[#allocation9 + $0x968] ss:$48 sps:$4 sm:$0xff]  }
 0x294   :  { %v9775_v26 = vpop.eup %9774  ;;  %v8741_v27 = vld [vmem:[#allocation9 + $0x9cc] ss:$48 sps:$4 sm:$0xff]  }
 0x295   :  { %v1279_v30 = vmul.f32 %v9846_v29, %v9775_v26  ;;  %v10391_v31 = vpack.c.bf16 %v1277_v28, %v1277_v28  ;;  %v8738_v26 = vld [vmem:[#allocation9 + $0x9c4] ss:$48 sps:$4 sm:$0xff]   ;;  %v8736_v28 = vld [vmem:[#allocation9 + $0x9c0] ss:$48 sps:$4 sm:$0xff]   ;;  %v8739_v29 = vld [vmem:[#allocation9 + $0x9c8] ss:$48 sps:$4 sm:$0xff]  }
 0x297   :  { %5996 = vmatprep.mubr.bf16.mxu0 %v10391_v31  ;;  %6160 = vmatprep.mubr.bf16.mxu1 %v10391_v31  ;;  %v10397_v37 = vpack.c.bf16 %v1279_v30, %v1279_v30  ;;  %v9777_v30 = vpop.eup %9776 }
 0x298   :  { %5997 = vmatmul.mubr.bf16.vlgmr.msra.gmra.mrb[16].mxu0 %v10393_v34  ;;  %6161 = vmatmul.mubr.bf16.vlgmr.msra.gmra.mrb[16].mxu1 %v10393_v34 }
 0x299   :  { %6006 = vmatpush1.bf16.msra.mxu0 %v8676_v32  ;;  %6170 = vmatpush1.bf16.msra.mxu1 %v8679_v33  ;;  %v8744_v32 = vld [vmem:[#allocation9 + $0xa24] ss:$48 sps:$4 sm:$0xff]   ;;  %v8747_v33 = vld [vmem:[#allocation9 + $0xa2c] ss:$48 sps:$4 sm:$0xff]  }
 0x29a   :  { %6037 = vmatprep.mubr.bf16.mxu0 %v10397_v37  ;;  %6201 = vmatprep.mubr.bf16.mxu1 %v10397_v37 }
 0x29b   :  { %6007 = vmatprep.subr.bf16.mxu0 %v8684_v35  ;;  %6171 = vmatprep.subr.bf16.mxu1 %v8687_v36  ;;  %v9779_v35 = vpop.eup %9778  ;;  %v1254_v36 = vadd.f32 1.0, %v9777_v30  ;;  %v8801_v30 = vld [vmem:[#allocation9 + $0xd8c] ss:$48 sps:$4 sm:$0xff]  }
 0x29d   :  { %6008 = vmatpush1.bf16.msra.mxu0 %v8682_v38  ;;  %6172 = vmatpush1.bf16.msra.mxu1 %v8685_v39  ;;  %v8742_v38 = vld [vmem:[#allocation9 + $0xa20] ss:$48 sps:$4 sm:$0xff]   ;;  %v8745_v39 = vld [vmem:[#allocation9 + $0xa28] ss:$48 sps:$4 sm:$0xff]   ;;  %9780 = vrcp.f32 %v1254_v36 }
 0x29e   :  { %6009 = vmatprep.subr.bf16.mxu0 %v8690_v40  ;;  %6173 = vmatprep.subr.bf16.mxu1 %v8693_v41  ;;  %v1257_v40 = vadd.f32 1.0, %v9779_v35  ;;  %v8750_v41 = vld [vmem:[#allocation9 + $0xa84] ss:$48 sps:$4 sm:$0xff]   ;;  %v8799_v36 = vld [vmem:[#allocation9 + $0xd88] ss:$48 sps:$4 sm:$0xff]  }
 0x2a0   :  { %9782 = vrcp.f32 %v1257_v40 }
 0x2a1   :  { %6010 = vmatpush1.bf16.msra.mxu0 %v8688_v42  ;;  %6174 = vmatpush1.bf16.msra.mxu1 %v8691_v43  ;;  %v8753_v42 = vld [vmem:[#allocation9 + $0xa8c] ss:$48 sps:$4 sm:$0xff]   ;;  %v8748_v43 = vld [vmem:[#allocation9 + $0xa80] ss:$48 sps:$4 sm:$0xff]  }
 0x2a2   :  { %6011 = vmatprep.subr.bf16.mxu0 %v8696_v44  ;;  %6175 = vmatprep.subr.bf16.mxu1 %v8699_v45  ;;  %v8751_v44 = vld [vmem:[#allocation9 + $0xa88] ss:$48 sps:$4 sm:$0xff]   ;;  %v8756_v45 = vld [vmem:[#allocation9 + $0xae4] ss:$48 sps:$4 sm:$0xff]  }
 0x2a5   :  { %6012 = vmatpush1.bf16.msra.mxu0 %v8694_v53  ;;  %6176 = vmatpush1.bf16.msra.mxu1 %v8697_v54  ;;  %v8759_v53 = vld [vmem:[#allocation9 + $0xaec] ss:$48 sps:$4 sm:$0xff]   ;;  %v8754_v54 = vld [vmem:[#allocation9 + $0xae0] ss:$48 sps:$4 sm:$0xff]  }
 0x2a6   :  { %6013 = vmatprep.subr.bf16.mxu0 %v8702_v55  ;;  %6177 = vmatprep.subr.bf16.mxu1 %v8705_v57  ;;  %v8757_v55 = vld [vmem:[#allocation9 + $0xae8] ss:$48 sps:$4 sm:$0xff]   ;;  %v8762_v57 = vld [vmem:[#allocation9 + $0xb44] ss:$48 sps:$4 sm:$0xff]  }
 0x2a9   :  { %6014 = vmatpush1.bf16.msra.mxu0 %v8700_v60  ;;  %6178 = vmatpush1.bf16.msra.mxu1 %v8703_v61  ;;  %v8763_v60 = vld [vmem:[#allocation9 + $0xb48] ss:$48 sps:$4 sm:$0xff]   ;;  %v8768_v61 = vld [vmem:[#allocation9 + $0xba4] ss:$48 sps:$4 sm:$0xff]  }
 0x2aa   :  { %6015 = vmatprep.subr.bf16.mxu0 %v8708_v62  ;;  %6179 = vmatprep.subr.bf16.mxu1 %v8711_v63  ;;  %v8771_v62 = vld [vmem:[#allocation9 + $0xbac] ss:$48 sps:$4 sm:$0xff]   ;;  %v9781_v63 = vpop.eup %9780 }
 0x2ab   :  { %v9783_v0 = vpop.eup %9782 }
 0x2ad   :  { %6016 = vmatpush1.bf16.msra.mxu0 %v8706_v2  ;;  %6180 = vmatpush1.bf16.msra.mxu1 %v8709_v3  ;;  %v8769_v2 = vld [vmem:[#allocation9 + $0xba8] ss:$48 sps:$4 sm:$0xff]  }
 0x2ae   :  { %6017 = vmatprep.subr.bf16.mxu0 %v8714_v4  ;;  %6181 = vmatprep.subr.bf16.mxu1 %v8717_v5  ;;  %v9847_v3 = vld [vmem:[#allocation2 + $0x10] sm:$0xff] }
 0x2af   :  { %v1278_v4 = vmul.f32 %v9847_v3, %v9781_v63  ;;  %v8774_v5 = vld [vmem:[#allocation9 + $0xc04] ss:$48 sps:$4 sm:$0xff]   ;;  %v8825_v63 = vld [vmem:[#allocation9 + $0xf0c] ss:$48 sps:$4 sm:$0xff]  }
 0x2b0   :  { %v8831_v3 = vld [vmem:[#allocation9 + $0xf6c] ss:$48 sps:$4 sm:$0xff]  }
 0x2b1   :  { %6018 = vmatpush1.bf16.msra.mxu0 %v8712_v10  ;;  %6182 = vmatpush1.bf16.msra.mxu1 %v8715_v13  ;;  %v1281_v10 = vmul.f32 %v9848_v7, %v9783_v0  ;;  %v8772_v13 = vld [vmem:[#allocation9 + $0xc00] ss:$48 sps:$4 sm:$0xff]   ;;  %v8837_v7 = vld [vmem:[#allocation9 + $0xfcc] ss:$48 sps:$4 sm:$0xff]  }
 0x2b2   :  { %6019 = vmatprep.subr.bf16.mxu0 %v8720_v14  ;;  %6183 = vmatprep.subr.bf16.mxu1 %v8723_v56  ;;  %v10414_v14 = vpack.c.bf16 %v1278_v4, %v1278_v4  ;;  %v8775_v56 = vld [vmem:[#allocation9 + $0xc08] ss:$48 sps:$4 sm:$0xff]   ;;  %v8820_v0 = vld [vmem:[#allocation9 + $0xf00] ss:$48 sps:$4 sm:$0xff]  }
 0x2b3   :  { %v10416_v15 = vpack.c.bf16 %v1281_v10, %v1281_v10  ;;  %v8826_v4 = vld [vmem:[#allocation9 + $0xf60] ss:$48 sps:$4 sm:$0xff]  }
 0x2b4   :  { %v8832_v10 = vld [vmem:[#allocation9 + $0xfc0] ss:$48 sps:$4 sm:$0xff]  }
 0x2b5   :  { %6020 = vmatpush1.bf16.msra.mxu0 %v8718_v16  ;;  %6184 = vmatpush1.bf16.msra.mxu1 %v8721_v17  ;;  %v8783_v16 = vld [vmem:[#allocation9 + $0xc6c] ss:$48 sps:$4 sm:$0xff]   ;;  %v8778_v17 = vld [vmem:[#allocation9 + $0xc60] ss:$48 sps:$4 sm:$0xff]  }
 0x2b6   :  { %6021 = vmatprep.subr.bf16.mxu0 %v8726_v18  ;;  %6185 = vmatprep.subr.bf16.mxu1 %v8729_v19  ;;  %v8781_v18 = vld [vmem:[#allocation9 + $0xc68] ss:$48 sps:$4 sm:$0xff]   ;;  %v8786_v19 = vld [vmem:[#allocation9 + $0xcc4] ss:$48 sps:$4 sm:$0xff]  }
 0x2b9   :  { %6022 = vmatpush1.bf16.msra.mxu0 %v8724_v20  ;;  %6186 = vmatpush1.bf16.msra.mxu1 %v8727_v21  ;;  %v8789_v20 = vld [vmem:[#allocation9 + $0xccc] ss:$48 sps:$4 sm:$0xff]   ;;  %v8784_v21 = vld [vmem:[#allocation9 + $0xcc0] ss:$48 sps:$4 sm:$0xff]  }
 0x2ba   :  { %6023 = vmatprep.subr.bf16.mxu0 %v8732_v22  ;;  %6187 = vmatprep.subr.bf16.mxu1 %v8735_v23  ;;  %v8787_v22 = vld [vmem:[#allocation9 + $0xcc8] ss:$48 sps:$4 sm:$0xff]   ;;  %v8792_v23 = vld [vmem:[#allocation9 + $0xd24] ss:$48 sps:$4 sm:$0xff]  }
 0x2bd   :  { %6024 = vmatpush1.bf16.msra.mxu0 %v8730_v24  ;;  %6188 = vmatpush1.bf16.msra.mxu1 %v8733_v25  ;;  %v8795_v24 = vld [vmem:[#allocation9 + $0xd2c] ss:$48 sps:$4 sm:$0xff]   ;;  %v870_v25 = vsub.s32 4, %v10362_v47 }
 0x2be   :  { %6025 = vmatprep.subr.bf16.mxu0 %v8738_v26  ;;  %6189 = vmatprep.subr.bf16.mxu1 %v8741_v27  ;;  %v8790_v26 = vld [vmem:[#allocation9 + $0xd20] ss:$48 sps:$4 sm:$0xff]   ;;  %v882_v27 = vsub.s32 7, %v10362_v47 }
 0x2c0   :  { %v883_v35 = vrot.slane %v10367_v49, %v882_v27 }
 0x2c1   :  { %6026 = vmatpush1.bf16.msra.mxu0 %v8736_v28  ;;  %6190 = vmatpush1.bf16.msra.mxu1 %v8739_v29  ;;  %v8793_v28 = vld [vmem:[#allocation9 + $0xd28] ss:$48 sps:$4 sm:$0xff]   ;;  %v8798_v29 = vld [vmem:[#allocation9 + $0xd84] ss:$48 sps:$4 sm:$0xff]  }
 0x2c2   :  { %6027 = vmatprep.subr.bf16.mxu0 %v8744_v32  ;;  %6191 = vmatprep.subr.bf16.mxu1 %v8747_v33  ;;  %v871_v32 = vrot.slane %v10367_v49, %v870_v25  ;;  %v8796_v33 = vld [vmem:[#allocation9 + $0xd80] ss:$48 sps:$4 sm:$0xff]  }
 0x2c4   :  { %v1173_v40 = vadd.f32 %v10383_v8, %v871_v32  ;;  %v8819_v8 = vld [vmem:[#allocation9 + $0xeac] ss:$48 sps:$4 sm:$0xff]   ;;  %v8853_v32 = vld [vmem:[#allocation9 + $0x10e8] ss:$48 sps:$4 sm:$0xff]  }
 0x2c5   :  { %6028 = vmatpush1.bf16.msra.mxu0 %v8742_v38  ;;  %6192 = vmatpush1.bf16.msra.mxu1 %v8745_v39  ;;  %v8804_v38 = vld [vmem:[#allocation9 + $0xde4] ss:$48 sps:$4 sm:$0xff]   ;;  %v8807_v39 = vld [vmem:[#allocation9 + $0xdec] ss:$48 sps:$4 sm:$0xff]  }
 0x2c6   :  { %6029 = vmatprep.subr.bf16.mxu0 %v8750_v41  ;;  %6193 = vmatprep.subr.bf16.mxu1 %v8753_v42  ;;  %v8802_v41 = vld [vmem:[#allocation9 + $0xde0] ss:$48 sps:$4 sm:$0xff]   ;;  %v1216_v42 = vadd.f32 %v10389_v12, %v883_v35  ;;  %v8861_v35 = vld [vmem:[#allocation9 + $0x114c] ss:$48 sps:$4 sm:$0xff]  }
 0x2c9   :  { %6030 = vmatpush1.bf16.msra.mxu0 %v8748_v43  ;;  %6194 = vmatpush1.bf16.msra.mxu1 %v8751_v44  ;;  %v8805_v43 = vld [vmem:[#allocation9 + $0xde8] ss:$48 sps:$4 sm:$0xff]   ;;  %v8810_v44 = vld [vmem:[#allocation9 + $0xe44] ss:$48 sps:$4 sm:$0xff]  }
 0x2ca   :  { %6031 = vmatprep.subr.bf16.mxu0 %v8756_v45  ;;  %6195 = vmatprep.subr.bf16.mxu1 %v8759_v53  ;;  %v8813_v45 = vld [vmem:[#allocation9 + $0xe4c] ss:$48 sps:$4 sm:$0xff]   ;;  %v1224_v53 = vadd.f32 %v1173_v40, %v1173_v40 }
 0x2cd   :  { %6032 = vmatpush1.bf16.msra.mxu0 %v8754_v54  ;;  %6196 = vmatpush1.bf16.msra.mxu1 %v8757_v55  ;;  %v8808_v54 = vld [vmem:[#allocation9 + $0xe40] ss:$48 sps:$4 sm:$0xff]   ;;  %v1227_v55 = vadd.f32 %v1216_v42, %v1216_v42 }
 0x2ce   :  { %6033 = vmatprep.subr.bf16.mxu0 %v8762_v57  ;;  %6197 = vmatprep.subr.bf16.mxu1 %v8765_v58  ;;  %v8811_v57 = vld [vmem:[#allocation9 + $0xe48] ss:$48 sps:$4 sm:$0xff]   ;;  %v8816_v58 = vld [vmem:[#allocation9 + $0xea4] ss:$48 sps:$4 sm:$0xff]  }
 0x2cf   :  { %v7478_v12 = vmul.f32 -1.442695, %v1227_v55  ;;  %v8873_v55 = vld [vmem:[#allocation9 + $0x120c] ss:$48 sps:$4 sm:$0xff]  }
 0x2d1   :  { %6034 = vmatpush1.bf16.msra.mxu0 %v8760_v59  ;;  %6198 = vmatpush1.bf16.msra.mxu1 %v8763_v60  ;;  %v7475_v59 = vmul.f32 -1.442695, %v1224_v53  ;;  %v8814_v60 = vld [vmem:[#allocation9 + $0xea0] ss:$48 sps:$4 sm:$0xff]   ;;  %v8865_v53 = vld [vmem:[#allocation9 + $0x11a8] ss:$48 sps:$4 sm:$0xff]  }
 0x2d2   :  { %6035 = vmatprep.subr.bf16.mxu0 %v8768_v61  ;;  %6199 = vmatprep.subr.bf16.mxu1 %v8771_v62  ;;  %v8817_v61 = vld [vmem:[#allocation9 + $0xea8] ss:$48 sps:$4 sm:$0xff]   ;;  %v8822_v62 = vld [vmem:[#allocation9 + $0xf04] ss:$48 sps:$4 sm:$0xff]  }
 0x2d3   :  { %9784 = vpow2.f32 %v7475_v59 }
 0x2d4   :  { %9786 = vpow2.f32 %v7478_v12  ;;  %v8876_v12 = vld [vmem:[#allocation9 + $0x1264] ss:$48 sps:$4 sm:$0xff]  }
 0x2d5   :  { %6036 = vmatpush1.bf16.msra.mxu0 %v8766_v1  ;;  %6200 = vmatpush1.bf16.msra.mxu1 %v8769_v2  ;;  %v8823_v1 = vld [vmem:[#allocation9 + $0xf08] ss:$48 sps:$4 sm:$0xff]   ;;  %v8828_v2 = vld [vmem:[#allocation9 + $0xf64] ss:$48 sps:$4 sm:$0xff]  }
 0x2d6   :  { %6046 = vmatprep.subr.bf16.mxu0 %v8774_v5  ;;  %6210 = vmatprep.subr.bf16.mxu1 %v8777_v6  ;;  %v8829_v5 = vld [vmem:[#allocation9 + $0xf68] ss:$48 sps:$4 sm:$0xff]   ;;  %v8834_v6 = vld [vmem:[#allocation9 + $0xfc4] ss:$48 sps:$4 sm:$0xff]  }
 0x2d8   :  { %6038 = vmatmul.mubr.bf16.vlgmr.msra.gmra.mrb[16].mxu0 %v10414_v14  ;;  %6202 = vmatmul.mubr.bf16.vlgmr.msra.gmra.mrb[16].mxu1 %v10414_v14 }
 0x2d9   :  { %6047 = vmatpush1.bf16.msra.mxu0 %v8772_v13  ;;  %6078 = vmatprep.mubr.bf16.mxu0 %v10416_v15 }
 0x2da   :  { %6211 = vmatpush1.bf16.msra.mxu1 %v8775_v56  ;;  %6242 = vmatprep.mubr.bf16.mxu1 %v10416_v15  ;;  %v8835_v56 = vld [vmem:[#allocation9 + $0xfc8] ss:$48 sps:$4 sm:$0xff]  }
 0x2db   :  { %6048 = vmatprep.subr.bf16.mxu0 %v8780_v11  ;;  %6212 = vmatprep.subr.bf16.mxu1 %v8783_v16  ;;  %v8840_v11 = vld [vmem:[#allocation9 + $0x1024] ss:$48 sps:$4 sm:$0xff]   ;;  %v8843_v16 = vld [vmem:[#allocation9 + $0x102c] ss:$48 sps:$4 sm:$0xff]  }
 0x2dd   :  { %6049 = vmatpush1.bf16.msra.mxu0 %v8778_v17  ;;  %v9785_v13 = vpop.eup %9784 }
 0x2de   :  { %6213 = vmatpush1.bf16.msra.mxu1 %v8781_v18  ;;  %6050 = vmatprep.subr.bf16.mxu0 %v8786_v19  ;;  %v9787_v17 = vpop.eup %9786  ;;  %v1256_v18 = vadd.f32 1.0, %v9785_v13  ;;  %v8838_v19 = vld [vmem:[#allocation9 + $0x1020] ss:$48 sps:$4 sm:$0xff]   ;;  %v8889_v13 = vld [vmem:[#allocation9 + $0x1328] ss:$48 sps:$4 sm:$0xff]  }
 0x2df   :  { %6214 = vmatprep.subr.bf16.mxu1 %v8789_v20  ;;  %v8841_v20 = vld [vmem:[#allocation9 + $0x1028] ss:$48 sps:$4 sm:$0xff]  }
 0x2e0   :  { %9788 = vrcp.f32 %v1256_v18  ;;  %v8895_v18 = vld [vmem:[#allocation9 + $0x1388] ss:$48 sps:$4 sm:$0xff]  }
 0x2e1   :  { %6051 = vmatpush1.bf16.msra.mxu0 %v8784_v21  ;;  %v8846_v21 = vld [vmem:[#allocation9 + $0x1084] ss:$48 sps:$4 sm:$0xff]  }
 0x2e2   :  { %6215 = vmatpush1.bf16.msra.mxu1 %v8787_v22  ;;  %6052 = vmatprep.subr.bf16.mxu0 %v8792_v23  ;;  %v1259_v22 = vadd.f32 1.0, %v9787_v17  ;;  %v8849_v23 = vld [vmem:[#allocation9 + $0x108c] ss:$48 sps:$4 sm:$0xff]   ;;  %v8892_v17 = vld [vmem:[#allocation9 + $0x1380] ss:$48 sps:$4 sm:$0xff]  }
 0x2e3   :  { %6216 = vmatprep.subr.bf16.mxu1 %v8795_v24  ;;  %v8844_v24 = vld [vmem:[#allocation9 + $0x1080] ss:$48 sps:$4 sm:$0xff]  }
 0x2e4   :  { %9790 = vrcp.f32 %v1259_v22  ;;  %v8898_v22 = vld [vmem:[#allocation9 + $0x13e0] ss:$48 sps:$4 sm:$0xff]  }
 0x2e5   :  { %6053 = vmatpush1.bf16.msra.mxu0 %v8790_v26  ;;  %v8847_v26 = vld [vmem:[#allocation9 + $0x1088] ss:$48 sps:$4 sm:$0xff]  }
 0x2e6   :  { %6217 = vmatpush1.bf16.msra.mxu1 %v8793_v28  ;;  %6054 = vmatprep.subr.bf16.mxu0 %v8798_v29  ;;  %v8852_v28 = vld [vmem:[#allocation9 + $0x10e4] ss:$48 sps:$4 sm:$0xff]   ;;  %v8855_v29 = vld [vmem:[#allocation9 + $0x10ec] ss:$48 sps:$4 sm:$0xff]  }
 0x2e7   :  { %6218 = vmatprep.subr.bf16.mxu1 %v8801_v30  ;;  %v8850_v30 = vld [vmem:[#allocation9 + $0x10e0] ss:$48 sps:$4 sm:$0xff]  }
 0x2e9   :  { %6055 = vmatpush1.bf16.msra.mxu0 %v8796_v33  ;;  %v8858_v33 = vld [vmem:[#allocation9 + $0x1144] ss:$48 sps:$4 sm:$0xff]  }
 0x2ea   :  { %6219 = vmatpush1.bf16.msra.mxu1 %v8799_v36  ;;  %6056 = vmatprep.subr.bf16.mxu0 %v8804_v38  ;;  %v8856_v36 = vld [vmem:[#allocation9 + $0x1140] ss:$48 sps:$4 sm:$0xff]   ;;  %v8859_v38 = vld [vmem:[#allocation9 + $0x1148] ss:$48 sps:$4 sm:$0xff]   ;;  %v9789_v40 = vpop.eup %9788 }
 0x2eb   :  { %6220 = vmatprep.subr.bf16.mxu1 %v8807_v39  ;;  %v8864_v39 = vld [vmem:[#allocation9 + $0x11a4] ss:$48 sps:$4 sm:$0xff]  }
 0x2ed   :  { %6057 = vmatpush1.bf16.msra.mxu0 %v8802_v41  ;;  %v8867_v41 = vld [vmem:[#allocation9 + $0x11ac] ss:$48 sps:$4 sm:$0xff]  }
 0x2ee   :  { %6221 = vmatpush1.bf16.msra.mxu1 %v8805_v43  ;;  %6058 = vmatprep.subr.bf16.mxu0 %v8810_v44  ;;  %v9791_v42 = vpop.eup %9790  ;;  %v8862_v43 = vld [vmem:[#allocation9 + $0x11a0] ss:$48 sps:$4 sm:$0xff]   ;;  %v9849_v44 = vld [vmem:[#allocation2 + $0x20] sm:$0xff] }
 0x2ef   :  { %6222 = vmatprep.subr.bf16.mxu1 %v8813_v45  ;;  %v1280_v45 = vmul.f32 %v9849_v44, %v9789_v40  ;;  %v8919_v40 = vld [vmem:[#allocation9 + $0x1508] ss:$48 sps:$4 sm:$0xff]  }
 0x2f0   :  { %v8925_v44 = vld [vmem:[#allocation9 + $0x1568] ss:$48 sps:$4 sm:$0xff]  }
 0x2f1   :  { %6059 = vmatpush1.bf16.msra.mxu0 %v8808_v54  ;;  %v8870_v54 = vld [vmem:[#allocation9 + $0x1204] ss:$48 sps:$4 sm:$0xff]   ;;  %v10432_v59 = vpack.c.bf16 %v1280_v45, %v1280_v45 }
 0x2f2   :  { %6223 = vmatpush1.bf16.msra.mxu1 %v8811_v57  ;;  %6060 = vmatprep.subr.bf16.mxu0 %v8816_v58  ;;  %v9850_v57 = vld [vmem:[#allocation2 + $0x38] sm:$0xff] }
 0x2f3   :  { %6224 = vmatprep.subr.bf16.mxu1 %v8819_v8  ;;  %v1283_v58 = vmul.f32 %v9850_v57, %v9791_v42  ;;  %v8868_v8 = vld [vmem:[#allocation9 + $0x1200] ss:$48 sps:$4 sm:$0xff]   ;;  %v8927_v42 = vld [vmem:[#allocation9 + $0x156c] ss:$48 sps:$4 sm:$0xff]   ;;  %v8930_v45 = vld [vmem:[#allocation9 + $0x15c4] ss:$48 sps:$4 sm:$0xff]  }
 0x2f4   :  { %v8931_v57 = vld [vmem:[#allocation9 + $0x15c8] ss:$48 sps:$4 sm:$0xff]  }
 0x2f5   :  { %6061 = vmatpush1.bf16.msra.mxu0 %v8814_v60  ;;  %v8871_v60 = vld [vmem:[#allocation9 + $0x1208] ss:$48 sps:$4 sm:$0xff]  }
 0x2f6   :  { %6225 = vmatpush1.bf16.msra.mxu1 %v8817_v61  ;;  %6062 = vmatprep.subr.bf16.mxu0 %v8822_v62  ;;  %v10434_v61 = vpack.c.bf16 %v1283_v58, %v1283_v58  ;;  %v8879_v62 = vld [vmem:[#allocation9 + $0x126c] ss:$48 sps:$4 sm:$0xff]   ;;  %v8936_v58 = vld [vmem:[#allocation9 + $0x1624] ss:$48 sps:$4 sm:$0xff]  }
 0x2f7   :  { %6226 = vmatprep.subr.bf16.mxu1 %v8825_v63  ;;  %v8874_v63 = vld [vmem:[#allocation9 + $0x1260] ss:$48 sps:$4 sm:$0xff]  }
 0x2f9   :  { %6063 = vmatpush1.bf16.msra.mxu0 %v8820_v0  ;;  %v8877_v0 = vld [vmem:[#allocation9 + $0x1268] ss:$48 sps:$4 sm:$0xff]  }
 0x2fa   :  { %6227 = vmatpush1.bf16.msra.mxu1 %v8823_v1  ;;  %6064 = vmatprep.subr.bf16.mxu0 %v8828_v2  ;;  %v8882_v1 = vld [vmem:[#allocation9 + $0x12c4] ss:$48 sps:$4 sm:$0xff]   ;;  %v8885_v2 = vld [vmem:[#allocation9 + $0x12cc] ss:$48 sps:$4 sm:$0xff]  }
 0x2fb   :  { %6228 = vmatprep.subr.bf16.mxu1 %v8831_v3  ;;  %v8880_v3 = vld [vmem:[#allocation9 + $0x12c0] ss:$48 sps:$4 sm:$0xff]  }
 0x2fd   :  { %6065 = vmatpush1.bf16.msra.mxu0 %v8826_v4  ;;  %v8883_v4 = vld [vmem:[#allocation9 + $0x12c8] ss:$48 sps:$4 sm:$0xff]  }
 0x2fe   :  { %6229 = vmatpush1.bf16.msra.mxu1 %v8829_v5  ;;  %6066 = vmatprep.subr.bf16.mxu0 %v8834_v6  ;;  %v8888_v5 = vld [vmem:[#allocation9 + $0x1324] ss:$48 sps:$4 sm:$0xff]   ;;  %v8891_v6 = vld [vmem:[#allocation9 + $0x132c] ss:$48 sps:$4 sm:$0xff]  }
 0x2ff   :  { %6230 = vmatprep.subr.bf16.mxu1 %v8837_v7  ;;  %v878_v7 = vsub.s32 6, %v10362_v47 }
 0x301   :  { %6067 = vmatpush1.bf16.msra.mxu0 %v8832_v10  ;;  %v8886_v10 = vld [vmem:[#allocation9 + $0x1320] ss:$48 sps:$4 sm:$0xff]  }
 0x302   :  { %6231 = vmatpush1.bf16.msra.mxu1 %v8835_v56  ;;  %6068 = vmatprep.subr.bf16.mxu0 %v8840_v11  ;;  %v8894_v56 = vld [vmem:[#allocation9 + $0x1384] ss:$48 sps:$4 sm:$0xff]   ;;  %v8897_v11 = vld [vmem:[#allocation9 + $0x138c] ss:$48 sps:$4 sm:$0xff]  }
 0x303   :  { %6232 = vmatprep.subr.bf16.mxu1 %v8843_v16  ;;  %v879_v16 = vrot.slane %v10367_v49, %v878_v7  ;;  %v8904_v49 = vld [vmem:[#allocation9 + $0x1440] ss:$48 sps:$4 sm:$0xff]  }
 0x305   :  { %6069 = vmatpush1.bf16.msra.mxu0 %v8838_v19  ;;  %v8900_v19 = vld [vmem:[#allocation9 + $0x13e4] ss:$48 sps:$4 sm:$0xff]  }
 0x306   :  { %6233 = vmatpush1.bf16.msra.mxu1 %v8841_v20  ;;  %6070 = vmatprep.subr.bf16.mxu0 %v8846_v21  ;;  %v8903_v20 = vld [vmem:[#allocation9 + $0x13ec] ss:$48 sps:$4 sm:$0xff]   ;;  %v1214_v21 = vadd.f32 %v10385_v9, %v879_v16  ;;  %v8910_v9 = vld [vmem:[#allocation9 + $0x14a0] ss:$48 sps:$4 sm:$0xff]   ;;  %v8960_v16 = vld [vmem:[#allocation9 + $0x17a4] ss:$48 sps:$4 sm:$0xff]  }
 0x307   :  { %6234 = vmatprep.subr.bf16.mxu1 %v8849_v23  ;;  %v8901_v23 = vld [vmem:[#allocation9 + $0x13e8] ss:$48 sps:$4 sm:$0xff]  }
 0x309   :  { %6071 = vmatpush1.bf16.msra.mxu0 %v8844_v24  ;;  %v8906_v24 = vld [vmem:[#allocation9 + $0x1444] ss:$48 sps:$4 sm:$0xff]  }
 0x30a   :  { %6235 = vmatpush1.bf16.msra.mxu1 %v8847_v26  ;;  %6072 = vmatprep.subr.bf16.mxu0 %v8852_v28  ;;  %v8909_v26 = vld [vmem:[#allocation9 + $0x144c] ss:$48 sps:$4 sm:$0xff]   ;;  %v1226_v28 = vadd.f32 %v1214_v21, %v1214_v21 }
 0x30b   :  { %6236 = vmatprep.subr.bf16.mxu1 %v8855_v29  ;;  %v8907_v29 = vld [vmem:[#allocation9 + $0x1448] ss:$48 sps:$4 sm:$0xff]  }
 0x30d   :  { %6073 = vmatpush1.bf16.msra.mxu0 %v8850_v30  ;;  %v8912_v30 = vld [vmem:[#allocation9 + $0x14a4] ss:$48 sps:$4 sm:$0xff]  }
 0x30e   :  { %6237 = vmatpush1.bf16.msra.mxu1 %v8853_v32  ;;  %6074 = vmatprep.subr.bf16.mxu0 %v8858_v33  ;;  %v8915_v32 = vld [vmem:[#allocation9 + $0x14ac] ss:$48 sps:$4 sm:$0xff]   ;;  %v7477_v33 = vmul.f32 -1.442695, %v1226_v28 }
 0x30f   :  { %6238 = vmatprep.subr.bf16.mxu1 %v8861_v35  ;;  %v8913_v35 = vld [vmem:[#allocation9 + $0x14a8] ss:$48 sps:$4 sm:$0xff]  }
 0x310   :  { %9792 = vpow2.f32 %v7477_v33  ;;  %v8973_v33 = vld [vmem:[#allocation9 + $0x78] ss:$48 sps:$4 sm:$0xff]  }
 0x311   :  { %6075 = vmatpush1.bf16.msra.mxu0 %v8856_v36  ;;  %v8918_v36 = vld [vmem:[#allocation9 + $0x1504] ss:$48 sps:$4 sm:$0xff]  }
 0x312   :  { %6239 = vmatpush1.bf16.msra.mxu1 %v8859_v38  ;;  %6076 = vmatprep.subr.bf16.mxu0 %v8864_v39  ;;  %v8921_v38 = vld [vmem:[#allocation9 + $0x150c] ss:$48 sps:$4 sm:$0xff]   ;;  %v8916_v39 = vld [vmem:[#allocation9 + $0x1500] ss:$48 sps:$4 sm:$0xff]  }
 0x313   :  { %6240 = vmatprep.subr.bf16.mxu1 %v8867_v41  ;;  %v8924_v41 = vld [vmem:[#allocation9 + $0x1564] ss:$48 sps:$4 sm:$0xff]  }
 0x315   :  { %6077 = vmatpush1.bf16.msra.mxu0 %v8862_v43  ;;  %v8922_v43 = vld [vmem:[#allocation9 + $0x1560] ss:$48 sps:$4 sm:$0xff]  }
 0x316   :  { %6241 = vmatpush1.bf16.msra.mxu1 %v8865_v53  ;;  %6087 = vmatprep.subr.bf16.mxu0 %v8870_v54  ;;  %v8933_v53 = vld [vmem:[#allocation9 + $0x15cc] ss:$48 sps:$4 sm:$0xff]   ;;  %v8928_v54 = vld [vmem:[#allocation9 + $0x15c0] ss:$48 sps:$4 sm:$0xff]  }
 0x317   :  { %6251 = vmatprep.subr.bf16.mxu1 %v8873_v55 }
 0x318   :  { %6079 = vmatmul.mubr.bf16.vlgmr.msra.gmra.mrb[16].mxu0 %v10432_v59 }
 0x319   :  { %6243 = vmatmul.mubr.bf16.vlgmr.msra.gmra.mrb[16].mxu1 %v10432_v59  ;;  %6088 = vmatpush1.bf16.msra.mxu0 %v8868_v8  ;;  %v8939_v8 = vld [vmem:[#allocation9 + $0x162c] ss:$48 sps:$4 sm:$0xff]  }
 0x31a   :  { %6119 = vmatprep.mubr.bf16.mxu0 %v10434_v61  ;;  %6252 = vmatpush1.bf16.msra.mxu1 %v8871_v60  ;;  %v9793_v55 = vpop.eup %9792 }
 0x31b   :  { %6283 = vmatprep.mubr.bf16.mxu1 %v10434_v61  ;;  %6089 = vmatprep.subr.bf16.mxu0 %v8876_v12  ;;  %v1258_v60 = vadd.f32 1.0, %v9793_v55  ;;  %v8934_v12 = vld [vmem:[#allocation9 + $0x1620] ss:$48 sps:$4 sm:$0xff]   ;;  %v8999_v55 = vld [vmem:[#allocation9 + $0x1fc] ss:$48 sps:$4 sm:$0xff]  }
 0x31c   :  { %6253 = vmatprep.subr.bf16.mxu1 %v8879_v62  ;;  %v8937_v62 = vld [vmem:[#allocation9 + $0x1628] ss:$48 sps:$4 sm:$0xff]  }
 0x31d   :  { %6090 = vmatpush1.bf16.msra.mxu0 %v8874_v63  ;;  %v8942_v63 = vld [vmem:[#allocation9 + $0x1684] ss:$48 sps:$4 sm:$0xff]   ;;  %9794 = vrcp.f32 %v1258_v60  ;;  %v9005_v60 = vld [vmem:[#allocation9 + $0x25c] ss:$48 sps:$4 sm:$0xff]  }
 0x31e   :  { %6254 = vmatpush1.bf16.msra.mxu1 %v8877_v0  ;;  %6091 = vmatprep.subr.bf16.mxu0 %v8882_v1  ;;  %v8945_v0 = vld [vmem:[#allocation9 + $0x168c] ss:$48 sps:$4 sm:$0xff]   ;;  %v8940_v1 = vld [vmem:[#allocation9 + $0x1680] ss:$48 sps:$4 sm:$0xff]  }
 0x31f   :  { %6255 = vmatprep.subr.bf16.mxu1 %v8885_v2  ;;  %v8943_v2 = vld [vmem:[#allocation9 + $0x1688] ss:$48 sps:$4 sm:$0xff]  }
 0x321   :  { %6092 = vmatpush1.bf16.msra.mxu0 %v8880_v3  ;;  %v8948_v3 = vld [vmem:[#allocation9 + $0x16e4] ss:$48 sps:$4 sm:$0xff]  }
 0x322   :  { %6256 = vmatpush1.bf16.msra.mxu1 %v8883_v4  ;;  %6093 = vmatprep.subr.bf16.mxu0 %v8888_v5  ;;  %v8951_v4 = vld [vmem:[#allocation9 + $0x16ec] ss:$48 sps:$4 sm:$0xff]   ;;  %v8946_v5 = vld [vmem:[#allocation9 + $0x16e0] ss:$48 sps:$4 sm:$0xff]  }
 0x323   :  { %6257 = vmatprep.subr.bf16.mxu1 %v8891_v6  ;;  %v8949_v6 = vld [vmem:[#allocation9 + $0x16e8] ss:$48 sps:$4 sm:$0xff]  }
 0x325   :  { %6094 = vmatpush1.bf16.msra.mxu0 %v8886_v10  ;;  %v8954_v10 = vld [vmem:[#allocation9 + $0x1744] ss:$48 sps:$4 sm:$0xff]  }
 0x326   :  { %6258 = vmatpush1.bf16.msra.mxu1 %v8889_v13  ;;  %6095 = vmatprep.subr.bf16.mxu0 %v8894_v56  ;;  %v8957_v13 = vld [vmem:[#allocation9 + $0x174c] ss:$48 sps:$4 sm:$0xff]   ;;  %v8952_v56 = vld [vmem:[#allocation9 + $0x1740] ss:$48 sps:$4 sm:$0xff]  }
 0x327   :  { %6259 = vmatprep.subr.bf16.mxu1 %v8897_v11  ;;  %v8955_v11 = vld [vmem:[#allocation9 + $0x1748] ss:$48 sps:$4 sm:$0xff]  }
 0x329   :  { %6096 = vmatpush1.bf16.msra.mxu0 %v8892_v17  ;;  %v9795_v17 = vpop.eup %9794 }
 0x32a   :  { %6260 = vmatpush1.bf16.msra.mxu1 %v8895_v18  ;;  %6097 = vmatprep.subr.bf16.mxu0 %v8900_v19  ;;  %v8963_v18 = vld [vmem:[#allocation9 + $0x17ac] ss:$48 sps:$4 sm:$0xff]   ;;  %v8958_v19 = vld [vmem:[#allocation9 + $0x17a0] ss:$48 sps:$4 sm:$0xff]  }
 0x32b   :  { %6261 = vmatprep.subr.bf16.mxu1 %v8903_v20  ;;  %v9851_v20 = vld [vmem:[#allocation2 + $0x30] sm:$0xff] }
 0x32c   :  { %v1282_v21 = vmul.f32 %v9851_v20, %v9795_v17  ;;  %v9029_v17 = vld [vmem:[#allocation9 + $0x3dc] ss:$48 sps:$4 sm:$0xff]   ;;  %v9032_v20 = vld [vmem:[#allocation9 + $0x434] ss:$48 sps:$4 sm:$0xff]  }
 0x32d   :  { %6098 = vmatpush1.bf16.msra.mxu0 %v8898_v22  ;;  %v8961_v22 = vld [vmem:[#allocation9 + $0x17a8] ss:$48 sps:$4 sm:$0xff]  }
 0x32e   :  { %6262 = vmatpush1.bf16.msra.mxu1 %v8901_v23  ;;  %6099 = vmatprep.subr.bf16.mxu0 %v8906_v24  ;;  %v8966_v23 = vld [vmem:[#allocation9 + $0x14] ss:$48 sps:$4 sm:$0xff]   ;;  %v8969_v24 = vld [vmem:[#allocation9 + $0x1c] ss:$48 sps:$4 sm:$0xff]   ;;  %v10445_v28 = vpack.c.bf16 %v1282_v21, %v1282_v21 }
 0x32f   :  { %6263 = vmatprep.subr.bf16.mxu1 %v8909_v26  ;;  %v8964_v26 = vld [vmem:[#allocation9 + $0x10] ss:$48 sps:$4 sm:$0xff]   ;;  %v9035_v21 = vld [vmem:[#allocation9 + $0x43c] ss:$48 sps:$4 sm:$0xff]  }
 0x331   :  { %6100 = vmatpush1.bf16.msra.mxu0 %v8904_v49  ;;  %v8967_v49 = vld [vmem:[#allocation9 + $0x18] ss:$48 sps:$4 sm:$0xff]  }
 0x332   :  { %6264 = vmatpush1.bf16.msra.mxu1 %v8907_v29  ;;  %6101 = vmatprep.subr.bf16.mxu0 %v8912_v30  ;;  %v8972_v29 = vld [vmem:[#allocation9 + $0x74] ss:$48 sps:$4 sm:$0xff]   ;;  %v8975_v30 = vld [vmem:[#allocation9 + $0x7c] ss:$48 sps:$4 sm:$0xff]  }
 0x333   :  { %6265 = vmatprep.subr.bf16.mxu1 %v8915_v32  ;;  %v8970_v32 = vld [vmem:[#allocation9 + $0x70] ss:$48 sps:$4 sm:$0xff]  }
 0x335   :  { %6102 = vmatpush1.bf16.msra.mxu0 %v8910_v9  ;;  %v8978_v9 = vld [vmem:[#allocation9 + $0xd4] ss:$48 sps:$4 sm:$0xff]  }
 0x336   :  { %6266 = vmatpush1.bf16.msra.mxu1 %v8913_v35  ;;  %6103 = vmatprep.subr.bf16.mxu0 %v8918_v36  ;;  %v8981_v35 = vld [vmem:[#allocation9 + $0xdc] ss:$48 sps:$4 sm:$0xff]   ;;  %v8976_v36 = vld [vmem:[#allocation9 + $0xd0] ss:$48 sps:$4 sm:$0xff]  }
 0x337   :  { %6267 = vmatprep.subr.bf16.mxu1 %v8921_v38  ;;  %v8979_v38 = vld [vmem:[#allocation9 + $0xd8] ss:$48 sps:$4 sm:$0xff]  }
 0x339   :  { %6104 = vmatpush1.bf16.msra.mxu0 %v8916_v39  ;;  %v8984_v39 = vld [vmem:[#allocation9 + $0x134] ss:$48 sps:$4 sm:$0xff]  }
 0x33a   :  { %6268 = vmatpush1.bf16.msra.mxu1 %v8919_v40  ;;  %6105 = vmatprep.subr.bf16.mxu0 %v8924_v41  ;;  %v8987_v40 = vld [vmem:[#allocation9 + $0x13c] ss:$48 sps:$4 sm:$0xff]   ;;  %v8982_v41 = vld [vmem:[#allocation9 + $0x130] ss:$48 sps:$4 sm:$0xff]  }
 0x33b   :  { %6269 = vmatprep.subr.bf16.mxu1 %v8927_v42  ;;  %v8985_v42 = vld [vmem:[#allocation9 + $0x138] ss:$48 sps:$4 sm:$0xff]  }
 0x33d   :  { %6106 = vmatpush1.bf16.msra.mxu0 %v8922_v43  ;;  %v8990_v43 = vld [vmem:[#allocation9 + $0x194] ss:$48 sps:$4 sm:$0xff]  }
 0x33e   :  { %6270 = vmatpush1.bf16.msra.mxu1 %v8925_v44  ;;  %6107 = vmatprep.subr.bf16.mxu0 %v8930_v45  ;;  %v8993_v44 = vld [vmem:[#allocation9 + $0x19c] ss:$48 sps:$4 sm:$0xff]   ;;  %v8988_v45 = vld [vmem:[#allocation9 + $0x190] ss:$48 sps:$4 sm:$0xff]  }
 0x33f   :  { %6271 = vmatprep.subr.bf16.mxu1 %v8933_v53  ;;  %v8991_v53 = vld [vmem:[#allocation9 + $0x198] ss:$48 sps:$4 sm:$0xff]  }
 0x341   :  { %6108 = vmatpush1.bf16.msra.mxu0 %v8928_v54  ;;  %v8996_v54 = vld [vmem:[#allocation9 + $0x1f4] ss:$48 sps:$4 sm:$0xff]  }
 0x342   :  { %6272 = vmatpush1.bf16.msra.mxu1 %v8931_v57  ;;  %6109 = vmatprep.subr.bf16.mxu0 %v8936_v58  ;;  %v8994_v57 = vld [vmem:[#allocation9 + $0x1f0] ss:$48 sps:$4 sm:$0xff]   ;;  %v8997_v58 = vld [vmem:[#allocation9 + $0x1f8] ss:$48 sps:$4 sm:$0xff]  }
 0x343   :  { %6273 = vmatprep.subr.bf16.mxu1 %v8939_v8  ;;  %v9002_v8 = vld [vmem:[#allocation9 + $0x254] ss:$48 sps:$4 sm:$0xff]  }
 0x345   :  { %6110 = vmatpush1.bf16.msra.mxu0 %v8934_v12  ;;  %v9000_v12 = vld [vmem:[#allocation9 + $0x250] ss:$48 sps:$4 sm:$0xff]  }
 0x346   :  { %6274 = vmatpush1.bf16.msra.mxu1 %v8937_v62  ;;  %6111 = vmatprep.subr.bf16.mxu0 %v8942_v63  ;;  %v9003_v62 = vld [vmem:[#allocation9 + $0x258] ss:$48 sps:$4 sm:$0xff]   ;;  %v9008_v63 = vld [vmem:[#allocation9 + $0x2b4] ss:$48 sps:$4 sm:$0xff]  }
 0x347   :  { %6275 = vmatprep.subr.bf16.mxu1 %v8945_v0  ;;  %v9011_v0 = vld [vmem:[#allocation9 + $0x2bc] ss:$48 sps:$4 sm:$0xff]  }
 0x349   :  { %6112 = vmatpush1.bf16.msra.mxu0 %v8940_v1  ;;  %v9006_v1 = vld [vmem:[#allocation9 + $0x2b0] ss:$48 sps:$4 sm:$0xff]  }
 0x34a   :  { %6276 = vmatpush1.bf16.msra.mxu1 %v8943_v2  ;;  %6113 = vmatprep.subr.bf16.mxu0 %v8948_v3  ;;  %v9009_v2 = vld [vmem:[#allocation9 + $0x2b8] ss:$48 sps:$4 sm:$0xff]   ;;  %v9014_v3 = vld [vmem:[#allocation9 + $0x314] ss:$48 sps:$4 sm:$0xff]  }
 0x34b   :  { %6277 = vmatprep.subr.bf16.mxu1 %v8951_v4  ;;  %v9017_v4 = vld [vmem:[#allocation9 + $0x31c] ss:$48 sps:$4 sm:$0xff]  }
 0x34d   :  { %6114 = vmatpush1.bf16.msra.mxu0 %v8946_v5  ;;  %v9012_v5 = vld [vmem:[#allocation9 + $0x310] ss:$48 sps:$4 sm:$0xff]  }
 0x34e   :  { %6278 = vmatpush1.bf16.msra.mxu1 %v8949_v6  ;;  %6115 = vmatprep.subr.bf16.mxu0 %v8954_v10  ;;  %v9015_v6 = vld [vmem:[#allocation9 + $0x318] ss:$48 sps:$4 sm:$0xff]   ;;  %v9020_v10 = vld [vmem:[#allocation9 + $0x374] ss:$48 sps:$4 sm:$0xff]  }
 0x34f   :  { %6279 = vmatprep.subr.bf16.mxu1 %v8957_v13  ;;  %v9023_v13 = vld [vmem:[#allocation9 + $0x37c] ss:$48 sps:$4 sm:$0xff]  }
 0x351   :  { %6116 = vmatpush1.bf16.msra.mxu0 %v8952_v56  ;;  %v9018_v56 = vld [vmem:[#allocation9 + $0x370] ss:$48 sps:$4 sm:$0xff]  }
 0x352   :  { %6280 = vmatpush1.bf16.msra.mxu1 %v8955_v11  ;;  %6117 = vmatprep.subr.bf16.mxu0 %v8960_v16  ;;  %v9021_v11 = vld [vmem:[#allocation9 + $0x378] ss:$48 sps:$4 sm:$0xff]   ;;  %v9026_v16 = vld [vmem:[#allocation9 + $0x3d4] ss:$48 sps:$4 sm:$0xff]  }
 0x353   :  { %6281 = vmatprep.subr.bf16.mxu1 %v8963_v18  ;;  %v9024_v18 = vld [vmem:[#allocation9 + $0x3d0] ss:$48 sps:$4 sm:$0xff]  }
 0x355   :  { %6118 = vmatpush1.bf16.msra.mxu0 %v8958_v19  ;;  %v9027_v19 = vld [vmem:[#allocation9 + $0x3d8] ss:$48 sps:$4 sm:$0xff]  }
 0x356   :  { %6282 = vmatpush1.bf16.msra.mxu1 %v8961_v22  ;;  %6292 = vmatprep.subr.bf16.mxu0 %v8966_v23  ;;  %v9030_v22 = vld [vmem:[#allocation9 + $0x430] ss:$48 sps:$4 sm:$0xff]   ;;  %v9033_v23 = vld [vmem:[#allocation9 + $0x438] ss:$48 sps:$4 sm:$0xff]  }
 0x357   :  { %6456 = vmatprep.subr.bf16.mxu1 %v8969_v24  ;;  %v9038_v24 = vld [vmem:[#allocation9 + $0x494] ss:$48 sps:$4 sm:$0xff]  }
 0x358   :  { %6120 = vmatmul.mubr.bf16.vlgmr.msra.gmra.mrb[16].mxu0 %v10445_v28 }
 0x359   :  { %6284 = vmatmul.mubr.bf16.vlgmr.msra.gmra.mrb[16].mxu1 %v10445_v28  ;;  %6293 = vmatpush1.bf16.msra.mxu0 %v8964_v26  ;;  %v9041_v26 = vld [vmem:[#allocation9 + $0x49c] ss:$48 sps:$4 sm:$0xff]  }
 0x35a   :  { %6324 = vmatprep.mubr.bf16.mxu0 %v10391_v31  ;;  %6457 = vmatpush1.bf16.msra.mxu1 %v8967_v49  ;;  %v9036_v49 = vld [vmem:[#allocation9 + $0x490] ss:$48 sps:$4 sm:$0xff]  }
 0x35b   :  { %6488 = vmatprep.mubr.bf16.mxu1 %v10391_v31  ;;  %6294 = vmatprep.subr.bf16.mxu0 %v8972_v29  ;;  %v9039_v29 = vld [vmem:[#allocation9 + $0x498] ss:$48 sps:$4 sm:$0xff]  }
 0x35c   :  { %6458 = vmatprep.subr.bf16.mxu1 %v8975_v30  ;;  %v9044_v30 = vld [vmem:[#allocation9 + $0x4f4] ss:$48 sps:$4 sm:$0xff]  }
 0x35d   :  { %6295 = vmatpush1.bf16.msra.mxu0 %v8970_v32  ;;  %v9047_v32 = vld [vmem:[#allocation9 + $0x4fc] ss:$48 sps:$4 sm:$0xff]  }
 0x35e   :  { %6459 = vmatpush1.bf16.msra.mxu1 %v8973_v33  ;;  %6296 = vmatprep.subr.bf16.mxu0 %v8978_v9  ;;  %v9042_v33 = vld [vmem:[#allocation9 + $0x4f0] ss:$48 sps:$4 sm:$0xff]   ;;  %v9045_v9 = vld [vmem:[#allocation9 + $0x4f8] ss:$48 sps:$4 sm:$0xff]  }
 0x35f   :  { %6460 = vmatprep.subr.bf16.mxu1 %v8981_v35  ;;  %v9050_v35 = vld [vmem:[#allocation9 + $0x554] ss:$48 sps:$4 sm:$0xff]  }
 0x361   :  { %6297 = vmatpush1.bf16.msra.mxu0 %v8976_v36  ;;  %v9053_v36 = vld [vmem:[#allocation9 + $0x55c] ss:$48 sps:$4 sm:$0xff]  }
 0x362   :  { %6461 = vmatpush1.bf16.msra.mxu1 %v8979_v38  ;;  %6298 = vmatprep.subr.bf16.mxu0 %v8984_v39  ;;  %v9048_v38 = vld [vmem:[#allocation9 + $0x550] ss:$48 sps:$4 sm:$0xff]   ;;  %v9051_v39 = vld [vmem:[#allocation9 + $0x558] ss:$48 sps:$4 sm:$0xff]  }
 0x363   :  { %6462 = vmatprep.subr.bf16.mxu1 %v8987_v40  ;;  %v9056_v40 = vld [vmem:[#allocation9 + $0x5b4] ss:$48 sps:$4 sm:$0xff]  }
 0x365   :  { %6299 = vmatpush1.bf16.msra.mxu0 %v8982_v41  ;;  %v9059_v41 = vld [vmem:[#allocation9 + $0x5bc] ss:$48 sps:$4 sm:$0xff]  }
 0x366   :  { %6463 = vmatpush1.bf16.msra.mxu1 %v8985_v42  ;;  %6300 = vmatprep.subr.bf16.mxu0 %v8990_v43  ;;  %v9054_v42 = vld [vmem:[#allocation9 + $0x5b0] ss:$48 sps:$4 sm:$0xff]   ;;  %v9057_v43 = vld [vmem:[#allocation9 + $0x5b8] ss:$48 sps:$4 sm:$0xff]  }
 0x367   :  { %6464 = vmatprep.subr.bf16.mxu1 %v8993_v44  ;;  %v9062_v44 = vld [vmem:[#allocation9 + $0x614] ss:$48 sps:$4 sm:$0xff]  }
 0x369   :  { %6301 = vmatpush1.bf16.msra.mxu0 %v8988_v45  ;;  %v9065_v45 = vld [vmem:[#allocation9 + $0x61c] ss:$48 sps:$4 sm:$0xff]  }
 0x36a   :  { %6465 = vmatpush1.bf16.msra.mxu1 %v8991_v53  ;;  %6302 = vmatprep.subr.bf16.mxu0 %v8996_v54  ;;  %v9060_v53 = vld [vmem:[#allocation9 + $0x610] ss:$48 sps:$4 sm:$0xff]   ;;  %v9063_v54 = vld [vmem:[#allocation9 + $0x618] ss:$48 sps:$4 sm:$0xff]  }
 0x36b   :  { %6466 = vmatprep.subr.bf16.mxu1 %v8999_v55  ;;  %v9068_v55 = vld [vmem:[#allocation9 + $0x674] ss:$48 sps:$4 sm:$0xff]  }
 0x36d   :  { %6303 = vmatpush1.bf16.msra.mxu0 %v8994_v57  ;;  %v9071_v57 = vld [vmem:[#allocation9 + $0x67c] ss:$48 sps:$4 sm:$0xff]  }
 0x36e   :  { %6467 = vmatpush1.bf16.msra.mxu1 %v8997_v58  ;;  %6304 = vmatprep.subr.bf16.mxu0 %v9002_v8  ;;  %v9066_v58 = vld [vmem:[#allocation9 + $0x670] ss:$48 sps:$4 sm:$0xff]   ;;  %v9069_v8 = vld [vmem:[#allocation9 + $0x678] ss:$48 sps:$4 sm:$0xff]  }
 0x36f   :  { %6468 = vmatprep.subr.bf16.mxu1 %v9005_v60  ;;  %v9074_v60 = vld [vmem:[#allocation9 + $0x6d4] ss:$48 sps:$4 sm:$0xff]  }
 0x371   :  { %6305 = vmatpush1.bf16.msra.mxu0 %v9000_v12  ;;  %v9077_v12 = vld [vmem:[#allocation9 + $0x6dc] ss:$48 sps:$4 sm:$0xff]  }
 0x372   :  { %6469 = vmatpush1.bf16.msra.mxu1 %v9003_v62  ;;  %6306 = vmatprep.subr.bf16.mxu0 %v9008_v63  ;;  %v9072_v62 = vld [vmem:[#allocation9 + $0x6d0] ss:$48 sps:$4 sm:$0xff]   ;;  %v9075_v63 = vld [vmem:[#allocation9 + $0x6d8] ss:$48 sps:$4 sm:$0xff]  }
 0x373   :  { %6470 = vmatprep.subr.bf16.mxu1 %v9011_v0  ;;  %v9080_v0 = vld [vmem:[#allocation9 + $0x734] ss:$48 sps:$4 sm:$0xff]  }
 0x375   :  { %6307 = vmatpush1.bf16.msra.mxu0 %v9006_v1  ;;  %v9083_v1 = vld [vmem:[#allocation9 + $0x73c] ss:$48 sps:$4 sm:$0xff]  }
 0x376   :  { %6471 = vmatpush1.bf16.msra.mxu1 %v9009_v2  ;;  %6308 = vmatprep.subr.bf16.mxu0 %v9014_v3  ;;  %v9078_v2 = vld [vmem:[#allocation9 + $0x730] ss:$48 sps:$4 sm:$0xff]   ;;  %v9081_v3 = vld [vmem:[#allocation9 + $0x738] ss:$48 sps:$4 sm:$0xff]  }
 0x377   :  { %6472 = vmatprep.subr.bf16.mxu1 %v9017_v4  ;;  %v9086_v4 = vld [vmem:[#allocation9 + $0x794] ss:$48 sps:$4 sm:$0xff]  }
 0x379   :  { %6309 = vmatpush1.bf16.msra.mxu0 %v9012_v5  ;;  %v9089_v5 = vld [vmem:[#allocation9 + $0x79c] ss:$48 sps:$4 sm:$0xff]  }
 0x37a   :  { %6473 = vmatpush1.bf16.msra.mxu1 %v9015_v6  ;;  %6310 = vmatprep.subr.bf16.mxu0 %v9020_v10  ;;  %v9084_v6 = vld [vmem:[#allocation9 + $0x790] ss:$48 sps:$4 sm:$0xff]   ;;  %v9087_v10 = vld [vmem:[#allocation9 + $0x798] ss:$48 sps:$4 sm:$0xff]  }
 0x37b   :  { %6474 = vmatprep.subr.bf16.mxu1 %v9023_v13  ;;  %v9092_v13 = vld [vmem:[#allocation9 + $0x7f4] ss:$48 sps:$4 sm:$0xff]  }
 0x37d   :  { %6311 = vmatpush1.bf16.msra.mxu0 %v9018_v56  ;;  %v9095_v56 = vld [vmem:[#allocation9 + $0x7fc] ss:$48 sps:$4 sm:$0xff]  }
 0x37e   :  { %6475 = vmatpush1.bf16.msra.mxu1 %v9021_v11  ;;  %6312 = vmatprep.subr.bf16.mxu0 %v9026_v16  ;;  %v9090_v11 = vld [vmem:[#allocation9 + $0x7f0] ss:$48 sps:$4 sm:$0xff]   ;;  %v9093_v16 = vld [vmem:[#allocation9 + $0x7f8] ss:$48 sps:$4 sm:$0xff]  }
 0x37f   :  { %6476 = vmatprep.subr.bf16.mxu1 %v9029_v17  ;;  %v9098_v17 = vld [vmem:[#allocation9 + $0x854] ss:$48 sps:$4 sm:$0xff]  }
 0x381   :  { %6313 = vmatpush1.bf16.msra.mxu0 %v9024_v18  ;;  %v9101_v18 = vld [vmem:[#allocation9 + $0x85c] ss:$48 sps:$4 sm:$0xff]  }
 0x382   :  { %6477 = vmatpush1.bf16.msra.mxu1 %v9027_v19  ;;  %6314 = vmatprep.subr.bf16.mxu0 %v9032_v20  ;;  %v9096_v19 = vld [vmem:[#allocation9 + $0x850] ss:$48 sps:$4 sm:$0xff]   ;;  %v9099_v20 = vld [vmem:[#allocation9 + $0x858] ss:$48 sps:$4 sm:$0xff]  }
 0x383   :  { %6478 = vmatprep.subr.bf16.mxu1 %v9035_v21  ;;  %v9104_v21 = vld [vmem:[#allocation9 + $0x8b4] ss:$48 sps:$4 sm:$0xff]  }
 0x385   :  { %6315 = vmatpush1.bf16.msra.mxu0 %v9030_v22  ;;  %v9107_v22 = vld [vmem:[#allocation9 + $0x8bc] ss:$48 sps:$4 sm:$0xff]  }
 0x386   :  { %6479 = vmatpush1.bf16.msra.mxu1 %v9033_v23  ;;  %6316 = vmatprep.subr.bf16.mxu0 %v9038_v24  ;;  %v9102_v23 = vld [vmem:[#allocation9 + $0x8b0] ss:$48 sps:$4 sm:$0xff]   ;;  %v9105_v24 = vld [vmem:[#allocation9 + $0x8b8] ss:$48 sps:$4 sm:$0xff]  }
 0x387   :  { %6480 = vmatprep.subr.bf16.mxu1 %v9041_v26  ;;  %v9110_v26 = vld [vmem:[#allocation9 + $0x914] ss:$48 sps:$4 sm:$0xff]  }
 0x389   :  { %6317 = vmatpush1.bf16.msra.mxu0 %v9036_v49  ;;  %v9113_v49 = vld [vmem:[#allocation9 + $0x91c] ss:$48 sps:$4 sm:$0xff]  }
 0x38a   :  { %6481 = vmatpush1.bf16.msra.mxu1 %v9039_v29  ;;  %6318 = vmatprep.subr.bf16.mxu0 %v9044_v30  ;;  %v9108_v29 = vld [vmem:[#allocation9 + $0x910] ss:$48 sps:$4 sm:$0xff]   ;;  %v9111_v30 = vld [vmem:[#allocation9 + $0x918] ss:$48 sps:$4 sm:$0xff]  }
 0x38b   :  { %6482 = vmatprep.subr.bf16.mxu1 %v9047_v32  ;;  %v9116_v32 = vld [vmem:[#allocation9 + $0x974] ss:$48 sps:$4 sm:$0xff]  }
 0x38d   :  { %6319 = vmatpush1.bf16.msra.mxu0 %v9042_v33  ;;  %v9119_v33 = vld [vmem:[#allocation9 + $0x97c] ss:$48 sps:$4 sm:$0xff]  }
 0x38e   :  { %6483 = vmatpush1.bf16.msra.mxu1 %v9045_v9  ;;  %6320 = vmatprep.subr.bf16.mxu0 %v9050_v35  ;;  %v9114_v9 = vld [vmem:[#allocation9 + $0x970] ss:$48 sps:$4 sm:$0xff]   ;;  %v9117_v35 = vld [vmem:[#allocation9 + $0x978] ss:$48 sps:$4 sm:$0xff]  }
 0x38f   :  { %6484 = vmatprep.subr.bf16.mxu1 %v9053_v36  ;;  %v9122_v36 = vld [vmem:[#allocation9 + $0x9d4] ss:$48 sps:$4 sm:$0xff]  }
 0x391   :  { %6321 = vmatpush1.bf16.msra.mxu0 %v9048_v38  ;;  %v9125_v38 = vld [vmem:[#allocation9 + $0x9dc] ss:$48 sps:$4 sm:$0xff]  }
 0x392   :  { %6485 = vmatpush1.bf16.msra.mxu1 %v9051_v39  ;;  %6322 = vmatprep.subr.bf16.mxu0 %v9056_v40  ;;  %v9120_v39 = vld [vmem:[#allocation9 + $0x9d0] ss:$48 sps:$4 sm:$0xff]   ;;  %v9123_v40 = vld [vmem:[#allocation9 + $0x9d8] ss:$48 sps:$4 sm:$0xff]  }
 0x393   :  { %6486 = vmatprep.subr.bf16.mxu1 %v9059_v41  ;;  %v9128_v41 = vld [vmem:[#allocation9 + $0xa34] ss:$48 sps:$4 sm:$0xff]  }
 0x395   :  { %6323 = vmatpush1.bf16.msra.mxu0 %v9054_v42  ;;  %v9131_v42 = vld [vmem:[#allocation9 + $0xa3c] ss:$48 sps:$4 sm:$0xff]  }
 0x396   :  { %6487 = vmatpush1.bf16.msra.mxu1 %v9057_v43  ;;  %6333 = vmatprep.subr.bf16.mxu0 %v9062_v44  ;;  %v9126_v43 = vld [vmem:[#allocation9 + $0xa30] ss:$48 sps:$4 sm:$0xff]   ;;  %v9129_v44 = vld [vmem:[#allocation9 + $0xa38] ss:$48 sps:$4 sm:$0xff]  }
 0x397   :  { %6497 = vmatprep.subr.bf16.mxu1 %v9065_v45  ;;  %v9134_v45 = vld [vmem:[#allocation9 + $0xa94] ss:$48 sps:$4 sm:$0xff]  }
 0x398   :  { %6325 = vmatmul.mubr.bf16.vlgmr.msra.gmra.mrb[20].mxu0 %v10393_v34 }
 0x399   :  { %6489 = vmatmul.mubr.bf16.vlgmr.msra.gmra.mrb[20].mxu1 %v10393_v34  ;;  %6334 = vmatpush1.bf16.msra.mxu0 %v9060_v53  ;;  %v9137_v53 = vld [vmem:[#allocation9 + $0xa9c] ss:$48 sps:$4 sm:$0xff]  }
 0x39a   :  { %6365 = vmatprep.mubr.bf16.mxu0 %v10397_v37  ;;  %6498 = vmatpush1.bf16.msra.mxu1 %v9063_v54  ;;  %v9132_v54 = vld [vmem:[#allocation9 + $0xa90] ss:$48 sps:$4 sm:$0xff]  }
 0x39b   :  { %6529 = vmatprep.mubr.bf16.mxu1 %v10397_v37  ;;  %6335 = vmatprep.subr.bf16.mxu0 %v9068_v55  ;;  %v9135_v55 = vld [vmem:[#allocation9 + $0xa98] ss:$48 sps:$4 sm:$0xff]  }
 0x39c   :  { %6499 = vmatprep.subr.bf16.mxu1 %v9071_v57  ;;  %v9140_v57 = vld [vmem:[#allocation9 + $0xaf4] ss:$48 sps:$4 sm:$0xff]  }
 0x39d   :  { %6336 = vmatpush1.bf16.msra.mxu0 %v9066_v58  ;;  %v9143_v58 = vld [vmem:[#allocation9 + $0xafc] ss:$48 sps:$4 sm:$0xff]  }
 0x39e   :  { %6500 = vmatpush1.bf16.msra.mxu1 %v9069_v8  ;;  %6337 = vmatprep.subr.bf16.mxu0 %v9074_v60  ;;  %v9138_v8 = vld [vmem:[#allocation9 + $0xaf0] ss:$48 sps:$4 sm:$0xff]   ;;  %v9141_v60 = vld [vmem:[#allocation9 + $0xaf8] ss:$48 sps:$4 sm:$0xff]  }
 0x39f   :  { %6501 = vmatprep.subr.bf16.mxu1 %v9077_v12  ;;  %v9146_v12 = vld [vmem:[#allocation9 + $0xb54] ss:$48 sps:$4 sm:$0xff]  }
 0x3a1   :  { %6338 = vmatpush1.bf16.msra.mxu0 %v9072_v62  ;;  %v9149_v62 = vld [vmem:[#allocation9 + $0xb5c] ss:$48 sps:$4 sm:$0xff]  }
 0x3a2   :  { %6502 = vmatpush1.bf16.msra.mxu1 %v9075_v63  ;;  %6339 = vmatprep.subr.bf16.mxu0 %v9080_v0  ;;  %v9144_v63 = vld [vmem:[#allocation9 + $0xb50] ss:$48 sps:$4 sm:$0xff]   ;;  %v9147_v0 = vld [vmem:[#allocation9 + $0xb58] ss:$48 sps:$4 sm:$0xff]  }
 0x3a3   :  { %6503 = vmatprep.subr.bf16.mxu1 %v9083_v1  ;;  %v9152_v1 = vld [vmem:[#allocation9 + $0xbb4] ss:$48 sps:$4 sm:$0xff]  }
 0x3a5   :  { %6340 = vmatpush1.bf16.msra.mxu0 %v9078_v2  ;;  %v9155_v2 = vld [vmem:[#allocation9 + $0xbbc] ss:$48 sps:$4 sm:$0xff]  }
 0x3a6   :  { %6504 = vmatpush1.bf16.msra.mxu1 %v9081_v3  ;;  %6341 = vmatprep.subr.bf16.mxu0 %v9086_v4  ;;  %v9150_v3 = vld [vmem:[#allocation9 + $0xbb0] ss:$48 sps:$4 sm:$0xff]   ;;  %v9153_v4 = vld [vmem:[#allocation9 + $0xbb8] ss:$48 sps:$4 sm:$0xff]  }
 0x3a7   :  { %6505 = vmatprep.subr.bf16.mxu1 %v9089_v5  ;;  %v9158_v5 = vld [vmem:[#allocation9 + $0xc14] ss:$48 sps:$4 sm:$0xff]  }
 0x3a9   :  { %6342 = vmatpush1.bf16.msra.mxu0 %v9084_v6  ;;  %v9161_v6 = vld [vmem:[#allocation9 + $0xc1c] ss:$48 sps:$4 sm:$0xff]  }
 0x3aa   :  { %6506 = vmatpush1.bf16.msra.mxu1 %v9087_v10  ;;  %6343 = vmatprep.subr.bf16.mxu0 %v9092_v13  ;;  %v9156_v10 = vld [vmem:[#allocation9 + $0xc10] ss:$48 sps:$4 sm:$0xff]   ;;  %v9159_v13 = vld [vmem:[#allocation9 + $0xc18] ss:$48 sps:$4 sm:$0xff]  }
 0x3ab   :  { %6507 = vmatprep.subr.bf16.mxu1 %v9095_v56  ;;  %v9164_v56 = vld [vmem:[#allocation9 + $0xc74] ss:$48 sps:$4 sm:$0xff]  }
 0x3ad   :  { %6344 = vmatpush1.bf16.msra.mxu0 %v9090_v11  ;;  %v9167_v11 = vld [vmem:[#allocation9 + $0xc7c] ss:$48 sps:$4 sm:$0xff]  }
 0x3ae   :  { %6508 = vmatpush1.bf16.msra.mxu1 %v9093_v16  ;;  %6345 = vmatprep.subr.bf16.mxu0 %v9098_v17  ;;  %v9162_v16 = vld [vmem:[#allocation9 + $0xc70] ss:$48 sps:$4 sm:$0xff]   ;;  %v9165_v17 = vld [vmem:[#allocation9 + $0xc78] ss:$48 sps:$4 sm:$0xff]  }
 0x3af   :  { %6509 = vmatprep.subr.bf16.mxu1 %v9101_v18  ;;  %v9170_v18 = vld [vmem:[#allocation9 + $0xcd4] ss:$48 sps:$4 sm:$0xff]  }
 0x3b1   :  { %6346 = vmatpush1.bf16.msra.mxu0 %v9096_v19  ;;  %v9173_v19 = vld [vmem:[#allocation9 + $0xcdc] ss:$48 sps:$4 sm:$0xff]  }
 0x3b2   :  { %6510 = vmatpush1.bf16.msra.mxu1 %v9099_v20  ;;  %6347 = vmatprep.subr.bf16.mxu0 %v9104_v21  ;;  %v9168_v20 = vld [vmem:[#allocation9 + $0xcd0] ss:$48 sps:$4 sm:$0xff]   ;;  %v9171_v21 = vld [vmem:[#allocation9 + $0xcd8] ss:$48 sps:$4 sm:$0xff]  }
 0x3b3   :  { %6511 = vmatprep.subr.bf16.mxu1 %v9107_v22  ;;  %v9176_v22 = vld [vmem:[#allocation9 + $0xd34] ss:$48 sps:$4 sm:$0xff]  }
 0x3b5   :  { %6348 = vmatpush1.bf16.msra.mxu0 %v9102_v23  ;;  %v9179_v23 = vld [vmem:[#allocation9 + $0xd3c] ss:$48 sps:$4 sm:$0xff]  }
 0x3b6   :  { %6512 = vmatpush1.bf16.msra.mxu1 %v9105_v24  ;;  %6349 = vmatprep.subr.bf16.mxu0 %v9110_v26  ;;  %v9174_v24 = vld [vmem:[#allocation9 + $0xd30] ss:$48 sps:$4 sm:$0xff]   ;;  %v9177_v26 = vld [vmem:[#allocation9 + $0xd38] ss:$48 sps:$4 sm:$0xff]  }
 0x3b7   :  { %6513 = vmatprep.subr.bf16.mxu1 %v9113_v49  ;;  %v9182_v49 = vld [vmem:[#allocation9 + $0xd94] ss:$48 sps:$4 sm:$0xff]  }
 0x3b9   :  { %6350 = vmatpush1.bf16.msra.mxu0 %v9108_v29  ;;  %v9185_v29 = vld [vmem:[#allocation9 + $0xd9c] ss:$48 sps:$4 sm:$0xff]  }
 0x3ba   :  { %6514 = vmatpush1.bf16.msra.mxu1 %v9111_v30  ;;  %6351 = vmatprep.subr.bf16.mxu0 %v9116_v32  ;;  %v9180_v30 = vld [vmem:[#allocation9 + $0xd90] ss:$48 sps:$4 sm:$0xff]   ;;  %v9183_v32 = vld [vmem:[#allocation9 + $0xd98] ss:$48 sps:$4 sm:$0xff]  }
 0x3bb   :  { %6515 = vmatprep.subr.bf16.mxu1 %v9119_v33  ;;  %v9188_v33 = vld [vmem:[#allocation9 + $0xdf4] ss:$48 sps:$4 sm:$0xff]  }
 0x3bd   :  { %6352 = vmatpush1.bf16.msra.mxu0 %v9114_v9  ;;  %v9191_v9 = vld [vmem:[#allocation9 + $0xdfc] ss:$48 sps:$4 sm:$0xff]  }
 0x3be   :  { %6516 = vmatpush1.bf16.msra.mxu1 %v9117_v35  ;;  %6353 = vmatprep.subr.bf16.mxu0 %v9122_v36  ;;  %v9186_v35 = vld [vmem:[#allocation9 + $0xdf0] ss:$48 sps:$4 sm:$0xff]   ;;  %v9189_v36 = vld [vmem:[#allocation9 + $0xdf8] ss:$48 sps:$4 sm:$0xff]  }
 0x3bf   :  { %6517 = vmatprep.subr.bf16.mxu1 %v9125_v38  ;;  %v9194_v38 = vld [vmem:[#allocation9 + $0xe54] ss:$48 sps:$4 sm:$0xff]  }
 0x3c1   :  { %6354 = vmatpush1.bf16.msra.mxu0 %v9120_v39  ;;  %v9197_v39 = vld [vmem:[#allocation9 + $0xe5c] ss:$48 sps:$4 sm:$0xff]  }
 0x3c2   :  { %6518 = vmatpush1.bf16.msra.mxu1 %v9123_v40  ;;  %6355 = vmatprep.subr.bf16.mxu0 %v9128_v41  ;;  %v9192_v40 = vld [vmem:[#allocation9 + $0xe50] ss:$48 sps:$4 sm:$0xff]   ;;  %v9195_v41 = vld [vmem:[#allocation9 + $0xe58] ss:$48 sps:$4 sm:$0xff]  }
 0x3c3   :  { %6519 = vmatprep.subr.bf16.mxu1 %v9131_v42  ;;  %v9200_v42 = vld [vmem:[#allocation9 + $0xeb4] ss:$48 sps:$4 sm:$0xff]  }
 0x3c5   :  { %6356 = vmatpush1.bf16.msra.mxu0 %v9126_v43  ;;  %v9203_v43 = vld [vmem:[#allocation9 + $0xebc] ss:$48 sps:$4 sm:$0xff]  }
 0x3c6   :  { %6520 = vmatpush1.bf16.msra.mxu1 %v9129_v44  ;;  %6357 = vmatprep.subr.bf16.mxu0 %v9134_v45  ;;  %v9198_v44 = vld [vmem:[#allocation9 + $0xeb0] ss:$48 sps:$4 sm:$0xff]   ;;  %v9201_v45 = vld [vmem:[#allocation9 + $0xeb8] ss:$48 sps:$4 sm:$0xff]  }
 0x3c7   :  { %6521 = vmatprep.subr.bf16.mxu1 %v9137_v53  ;;  %v9206_v53 = vld [vmem:[#allocation9 + $0xf14] ss:$48 sps:$4 sm:$0xff]  }
 0x3c9   :  { %6358 = vmatpush1.bf16.msra.mxu0 %v9132_v54  ;;  %v9209_v54 = vld [vmem:[#allocation9 + $0xf1c] ss:$48 sps:$4 sm:$0xff]  }
 0x3ca   :  { %6522 = vmatpush1.bf16.msra.mxu1 %v9135_v55  ;;  %6359 = vmatprep.subr.bf16.mxu0 %v9140_v57  ;;  %v9204_v55 = vld [vmem:[#allocation9 + $0xf10] ss:$48 sps:$4 sm:$0xff]   ;;  %v9207_v57 = vld [vmem:[#allocation9 + $0xf18] ss:$48 sps:$4 sm:$0xff]  }
 0x3cb   :  { %6523 = vmatprep.subr.bf16.mxu1 %v9143_v58  ;;  %v9212_v58 = vld [vmem:[#allocation9 + $0xf74] ss:$48 sps:$4 sm:$0xff]  }
 0x3cd   :  { %6360 = vmatpush1.bf16.msra.mxu0 %v9138_v8  ;;  %v9215_v8 = vld [vmem:[#allocation9 + $0xf7c] ss:$48 sps:$4 sm:$0xff]  }
 0x3ce   :  { %6524 = vmatpush1.bf16.msra.mxu1 %v9141_v60  ;;  %6361 = vmatprep.subr.bf16.mxu0 %v9146_v12  ;;  %v9210_v60 = vld [vmem:[#allocation9 + $0xf70] ss:$48 sps:$4 sm:$0xff]   ;;  %v9213_v12 = vld [vmem:[#allocation9 + $0xf78] ss:$48 sps:$4 sm:$0xff]  }
 0x3cf   :  { %6525 = vmatprep.subr.bf16.mxu1 %v9149_v62  ;;  %v9218_v62 = vld [vmem:[#allocation9 + $0xfd4] ss:$48 sps:$4 sm:$0xff]  }
 0x3d1   :  { %6362 = vmatpush1.bf16.msra.mxu0 %v9144_v63  ;;  %v9221_v63 = vld [vmem:[#allocation9 + $0xfdc] ss:$48 sps:$4 sm:$0xff]  }
 0x3d2   :  { %6526 = vmatpush1.bf16.msra.mxu1 %v9147_v0  ;;  %6363 = vmatprep.subr.bf16.mxu0 %v9152_v1  ;;  %v9216_v0 = vld [vmem:[#allocation9 + $0xfd0] ss:$48 sps:$4 sm:$0xff]   ;;  %v9219_v1 = vld [vmem:[#allocation9 + $0xfd8] ss:$48 sps:$4 sm:$0xff]  }
 0x3d3   :  { %6527 = vmatprep.subr.bf16.mxu1 %v9155_v2  ;;  %v9224_v2 = vld [vmem:[#allocation9 + $0x1034] ss:$48 sps:$4 sm:$0xff]  }
 0x3d5   :  { %6364 = vmatpush1.bf16.msra.mxu0 %v9150_v3  ;;  %v9227_v3 = vld [vmem:[#allocation9 + $0x103c] ss:$48 sps:$4 sm:$0xff]  }
 0x3d6   :  { %6528 = vmatpush1.bf16.msra.mxu1 %v9153_v4  ;;  %6374 = vmatprep.subr.bf16.mxu0 %v9158_v5  ;;  %v9222_v4 = vld [vmem:[#allocation9 + $0x1030] ss:$48 sps:$4 sm:$0xff]   ;;  %v9225_v5 = vld [vmem:[#allocation9 + $0x1038] ss:$48 sps:$4 sm:$0xff]  }
 0x3d7   :  { %6538 = vmatprep.subr.bf16.mxu1 %v9161_v6  ;;  %v9230_v6 = vld [vmem:[#allocation9 + $0x1094] ss:$48 sps:$4 sm:$0xff]  }
 0x3d8   :  { %6366 = vmatmul.mubr.bf16.vlgmr.msra.gmra.mrb[20].mxu0 %v10414_v14 }
 0x3d9   :  { %6530 = vmatmul.mubr.bf16.vlgmr.msra.gmra.mrb[20].mxu1 %v10414_v14  ;;  %6375 = vmatpush1.bf16.msra.mxu0 %v9156_v10  ;;  %v9233_v10 = vld [vmem:[#allocation9 + $0x109c] ss:$48 sps:$4 sm:$0xff]  }
 0x3da   :  { %6406 = vmatprep.mubr.bf16.mxu0 %v10416_v15  ;;  %6539 = vmatpush1.bf16.msra.mxu1 %v9159_v13  ;;  %v9228_v13 = vld [vmem:[#allocation9 + $0x1090] ss:$48 sps:$4 sm:$0xff]  }
 0x3db   :  { %6570 = vmatprep.mubr.bf16.mxu1 %v10416_v15  ;;  %6376 = vmatprep.subr.bf16.mxu0 %v9164_v56  ;;  %v9231_v56 = vld [vmem:[#allocation9 + $0x1098] ss:$48 sps:$4 sm:$0xff]  }
 0x3dc   :  { %6540 = vmatprep.subr.bf16.mxu1 %v9167_v11  ;;  %v9236_v11 = vld [vmem:[#allocation9 + $0x10f4] ss:$48 sps:$4 sm:$0xff]  }
 0x3dd   :  { %6377 = vmatpush1.bf16.msra.mxu0 %v9162_v16  ;;  %v9239_v16 = vld [vmem:[#allocation9 + $0x10fc] ss:$48 sps:$4 sm:$0xff]  }
 0x3de   :  { %6541 = vmatpush1.bf16.msra.mxu1 %v9165_v17  ;;  %6378 = vmatprep.subr.bf16.mxu0 %v9170_v18  ;;  %v9234_v17 = vld [vmem:[#allocation9 + $0x10f0] ss:$48 sps:$4 sm:$0xff]   ;;  %v9237_v18 = vld [vmem:[#allocation9 + $0x10f8] ss:$48 sps:$4 sm:$0xff]  }
 0x3df   :  { %6542 = vmatprep.subr.bf16.mxu1 %v9173_v19  ;;  %v9242_v19 = vld [vmem:[#allocation9 + $0x1154] ss:$48 sps:$4 sm:$0xff]  }
 0x3e1   :  { %6379 = vmatpush1.bf16.msra.mxu0 %v9168_v20  ;;  %v9245_v20 = vld [vmem:[#allocation9 + $0x115c] ss:$48 sps:$4 sm:$0xff]  }
 0x3e2   :  { %6543 = vmatpush1.bf16.msra.mxu1 %v9171_v21  ;;  %6380 = vmatprep.subr.bf16.mxu0 %v9176_v22  ;;  %v9240_v21 = vld [vmem:[#allocation9 + $0x1150] ss:$48 sps:$4 sm:$0xff]   ;;  %v9243_v22 = vld [vmem:[#allocation9 + $0x1158] ss:$48 sps:$4 sm:$0xff]  }
 0x3e3   :  { %6544 = vmatprep.subr.bf16.mxu1 %v9179_v23  ;;  %v9248_v23 = vld [vmem:[#allocation9 + $0x11b4] ss:$48 sps:$4 sm:$0xff]  }
 0x3e5   :  { %6381 = vmatpush1.bf16.msra.mxu0 %v9174_v24  ;;  %v9251_v24 = vld [vmem:[#allocation9 + $0x11bc] ss:$48 sps:$4 sm:$0xff]  }
 0x3e6   :  { %6545 = vmatpush1.bf16.msra.mxu1 %v9177_v26  ;;  %6382 = vmatprep.subr.bf16.mxu0 %v9182_v49  ;;  %v9246_v26 = vld [vmem:[#allocation9 + $0x11b0] ss:$48 sps:$4 sm:$0xff]   ;;  %v9249_v49 = vld [vmem:[#allocation9 + $0x11b8] ss:$48 sps:$4 sm:$0xff]  }
 0x3e7   :  { %6546 = vmatprep.subr.bf16.mxu1 %v9185_v29  ;;  %v9254_v29 = vld [vmem:[#allocation9 + $0x1214] ss:$48 sps:$4 sm:$0xff]  }
 0x3e9   :  { %6383 = vmatpush1.bf16.msra.mxu0 %v9180_v30  ;;  %v9257_v30 = vld [vmem:[#allocation9 + $0x121c] ss:$48 sps:$4 sm:$0xff]  }
 0x3ea   :  { %6547 = vmatpush1.bf16.msra.mxu1 %v9183_v32  ;;  %6384 = vmatprep.subr.bf16.mxu0 %v9188_v33  ;;  %v9252_v32 = vld [vmem:[#allocation9 + $0x1210] ss:$48 sps:$4 sm:$0xff]   ;;  %v9255_v33 = vld [vmem:[#allocation9 + $0x1218] ss:$48 sps:$4 sm:$0xff]  }
 0x3eb   :  { %6548 = vmatprep.subr.bf16.mxu1 %v9191_v9  ;;  %v9260_v9 = vld [vmem:[#allocation9 + $0x1274] ss:$48 sps:$4 sm:$0xff]  }
 0x3ed   :  { %6385 = vmatpush1.bf16.msra.mxu0 %v9186_v35  ;;  %v9263_v35 = vld [vmem:[#allocation9 + $0x127c] ss:$48 sps:$4 sm:$0xff]  }
 0x3ee   :  { %6549 = vmatpush1.bf16.msra.mxu1 %v9189_v36  ;;  %6386 = vmatprep.subr.bf16.mxu0 %v9194_v38  ;;  %v9258_v36 = vld [vmem:[#allocation9 + $0x1270] ss:$48 sps:$4 sm:$0xff]   ;;  %v9261_v38 = vld [vmem:[#allocation9 + $0x1278] ss:$48 sps:$4 sm:$0xff]  }
 0x3ef   :  { %6550 = vmatprep.subr.bf16.mxu1 %v9197_v39  ;;  %v9266_v39 = vld [vmem:[#allocation9 + $0x12d4] ss:$48 sps:$4 sm:$0xff]  }
 0x3f1   :  { %6387 = vmatpush1.bf16.msra.mxu0 %v9192_v40  ;;  %v9269_v40 = vld [vmem:[#allocation9 + $0x12dc] ss:$48 sps:$4 sm:$0xff]  }
 0x3f2   :  { %6551 = vmatpush1.bf16.msra.mxu1 %v9195_v41  ;;  %6388 = vmatprep.subr.bf16.mxu0 %v9200_v42  ;;  %v9264_v41 = vld [vmem:[#allocation9 + $0x12d0] ss:$48 sps:$4 sm:$0xff]   ;;  %v9267_v42 = vld [vmem:[#allocation9 + $0x12d8] ss:$48 sps:$4 sm:$0xff]  }
 0x3f3   :  { %6552 = vmatprep.subr.bf16.mxu1 %v9203_v43  ;;  %v9272_v43 = vld [vmem:[#allocation9 + $0x1334] ss:$48 sps:$4 sm:$0xff]  }
 0x3f5   :  { %6389 = vmatpush1.bf16.msra.mxu0 %v9198_v44  ;;  %v9275_v44 = vld [vmem:[#allocation9 + $0x133c] ss:$48 sps:$4 sm:$0xff]  }
 0x3f6   :  { %6553 = vmatpush1.bf16.msra.mxu1 %v9201_v45  ;;  %6390 = vmatprep.subr.bf16.mxu0 %v9206_v53  ;;  %v9270_v45 = vld [vmem:[#allocation9 + $0x1330] ss:$48 sps:$4 sm:$0xff]   ;;  %v9273_v53 = vld [vmem:[#allocation9 + $0x1338] ss:$48 sps:$4 sm:$0xff]  }
 0x3f7   :  { %6554 = vmatprep.subr.bf16.mxu1 %v9209_v54  ;;  %v9278_v54 = vld [vmem:[#allocation9 + $0x1394] ss:$48 sps:$4 sm:$0xff]  }
 0x3f9   :  { %6391 = vmatpush1.bf16.msra.mxu0 %v9204_v55  ;;  %v9281_v55 = vld [vmem:[#allocation9 + $0x139c] ss:$48 sps:$4 sm:$0xff]  }
 0x3fa   :  { %6555 = vmatpush1.bf16.msra.mxu1 %v9207_v57  ;;  %6392 = vmatprep.subr.bf16.mxu0 %v9212_v58  ;;  %v9276_v57 = vld [vmem:[#allocation9 + $0x1390] ss:$48 sps:$4 sm:$0xff]  }
 0x3fb   :  { %6556 = vmatprep.subr.bf16.mxu1 %v9215_v8  ;;  %v2060_v58 = vld [vmem:[#allocation10] sm:$0xff]  ;;  %v9279_v8 = vld [vmem:[#allocation9 + $0x1398] ss:$48 sps:$4 sm:$0xff]  }
 0x3fd   :  { %6393 = vmatpush1.bf16.msra.mxu0 %v9210_v60  ;;  %v9284_v60 = vld [vmem:[#allocation9 + $0x13f4] ss:$48 sps:$4 sm:$0xff]  }
 0x3fe   :  { %6557 = vmatpush1.bf16.msra.mxu1 %v9213_v12  ;;  %6394 = vmatprep.subr.bf16.mxu0 %v9218_v62  ;;  %v9287_v12 = vld [vmem:[#allocation9 + $0x13fc] ss:$48 sps:$4 sm:$0xff]   ;;  %v2067_v62 = vrot.slane %v2060_v58, %v10365_v48 }
 0x3ff   :  { %6558 = vmatprep.subr.bf16.mxu1 %v9221_v63  ;;  %v2071_v63 = vrot.slane %v2060_v58, %v10370_v50 }
 0x401   :  { %6395 = vmatpush1.bf16.msra.mxu0 %v9216_v0  ;;  %v9282_v0 = vld [vmem:[#allocation9 + $0x13f0] ss:$48 sps:$4 sm:$0xff]  }
 0x402   :  { %6559 = vmatpush1.bf16.msra.mxu1 %v9219_v1  ;;  %6396 = vmatprep.subr.bf16.mxu0 %v9224_v2  ;;  %v9285_v1 = vld [vmem:[#allocation9 + $0x13f8] ss:$48 sps:$4 sm:$0xff]   ;;  %v9290_v2 = vld [vmem:[#allocation9 + $0x1454] ss:$48 sps:$4 sm:$0xff]  }
 0x403   :  { %6560 = vmatprep.subr.bf16.mxu1 %v9227_v3 }
 0x405   :  { %6397 = vmatpush1.bf16.msra.mxu0 %v9222_v4  ;;  %v9293_v4 = vld [vmem:[#allocation9 + $0x145c] ss:$48 sps:$4 sm:$0xff]  }
 0x406   :  { %6561 = vmatpush1.bf16.msra.mxu1 %v9225_v5  ;;  %6398 = vmatprep.subr.bf16.mxu0 %v9230_v6 }
 0x407   :  { %6562 = vmatprep.subr.bf16.mxu1 %v9233_v10 }
 0x409   :  { %6399 = vmatpush1.bf16.msra.mxu0 %v9228_v13 }
 0x40a   :  { %6563 = vmatpush1.bf16.msra.mxu1 %v9231_v56  ;;  %6400 = vmatprep.subr.bf16.mxu0 %v9236_v11 }
 0x40b   :  { %6564 = vmatprep.subr.bf16.mxu1 %v9239_v16  ;;  %v9288_v16 = vld [vmem:[#allocation9 + $0x1450] ss:$48 sps:$4 sm:$0xff]  }
 0x40d   :  { %6401 = vmatpush1.bf16.msra.mxu0 %v9234_v17  ;;  %v9291_v17 = vld [vmem:[#allocation9 + $0x1458] ss:$48 sps:$4 sm:$0xff]  }
 0x40e   :  { %6565 = vmatpush1.bf16.msra.mxu1 %v9237_v18  ;;  %6402 = vmatprep.subr.bf16.mxu0 %v9242_v19 }
 0x40f   :  { %6566 = vmatprep.subr.bf16.mxu1 %v9245_v20 }
 0x411   :  { %6403 = vmatpush1.bf16.msra.mxu0 %v9240_v21  ;;  %v9296_v21 = vld [vmem:[#allocation9 + $0x14b4] ss:$48 sps:$4 sm:$0xff]  }
 0x412   :  { %6567 = vmatpush1.bf16.msra.mxu1 %v9243_v22  ;;  %6404 = vmatprep.subr.bf16.mxu0 %v9248_v23 }
 0x413   :  { %6568 = vmatprep.subr.bf16.mxu1 %v9251_v24  ;;  %v9299_v24 = vld [vmem:[#allocation9 + $0x14bc] ss:$48 sps:$4 sm:$0xff]  }
 0x415   :  { %6405 = vmatpush1.bf16.msra.mxu0 %v9246_v26  ;;  %v9294_v26 = vld [vmem:[#allocation9 + $0x14b0] ss:$48 sps:$4 sm:$0xff]  }
 0x416   :  { %6569 = vmatpush1.bf16.msra.mxu1 %v9249_v49  ;;  %6415 = vmatprep.subr.bf16.mxu0 %v9254_v29  ;;  %v9297_v49 = vld [vmem:[#allocation9 + $0x14b8] ss:$48 sps:$4 sm:$0xff]   ;;  %v9302_v29 = vld [vmem:[#allocation9 + $0x1514] ss:$48 sps:$4 sm:$0xff]  }
 0x417   :  { %6579 = vmatprep.subr.bf16.mxu1 %v9257_v30  ;;  %v2075_v30 = vrot.slane %v2060_v58, %v10404_v46 }
 0x418   :  { %6407 = vmatmul.mubr.bf16.vlgmr.msra.gmra.mrb[20].mxu0 %v10432_v59 }
 0x419   :  { %6571 = vmatmul.mubr.bf16.vlgmr.msra.gmra.mrb[20].mxu1 %v10432_v59  ;;  %6416 = vmatpush1.bf16.msra.mxu0 %v9252_v32  ;;  %v9305_v32 = vld [vmem:[#allocation9 + $0x151c] ss:$48 sps:$4 sm:$0xff]  }
 0x41a   :  { %6447 = vmatprep.mubr.bf16.mxu0 %v10434_v61  ;;  %6580 = vmatpush1.bf16.msra.mxu1 %v9255_v33  ;;  %v2079_v33 = vrot.slane %v2060_v58, %v10373_v51  ;;  %v9315_v58 = vld [vmem:[#allocation9 + $0x15d8] ss:$48 sps:$4 sm:$0xff]  }
 0x41b   :  { %6611 = vmatprep.mubr.bf16.mxu1 %v10434_v61  ;;  %6417 = vmatprep.subr.bf16.mxu0 %v9260_v9  ;;  %v9300_v9 = vld [vmem:[#allocation9 + $0x1510] ss:$48 sps:$4 sm:$0xff]  }
 0x41c   :  { %6581 = vmatprep.subr.bf16.mxu1 %v9263_v35  ;;  %v9303_v35 = vld [vmem:[#allocation9 + $0x1518] ss:$48 sps:$4 sm:$0xff]  }
 0x41d   :  { %6418 = vmatpush1.bf16.msra.mxu0 %v9258_v36  ;;  %v9308_v36 = vld [vmem:[#allocation9 + $0x1574] ss:$48 sps:$4 sm:$0xff]  }
 0x41e   :  { %6582 = vmatpush1.bf16.msra.mxu1 %v9261_v38  ;;  %6419 = vmatprep.subr.bf16.mxu0 %v9266_v39  ;;  %v9311_v39 = vld [vmem:[#allocation9 + $0x157c] ss:$48 sps:$4 sm:$0xff]  }
 0x41f   :  { %6583 = vmatprep.subr.bf16.mxu1 %v9269_v40 }
 0x421   :  { %6420 = vmatpush1.bf16.msra.mxu0 %v9264_v41  ;;  %v9306_v41 = vld [vmem:[#allocation9 + $0x1570] ss:$48 sps:$4 sm:$0xff]  }
 0x422   :  { %6584 = vmatpush1.bf16.msra.mxu1 %v9267_v42  ;;  %6421 = vmatprep.subr.bf16.mxu0 %v9272_v43  ;;  %v9309_v43 = vld [vmem:[#allocation9 + $0x1578] ss:$48 sps:$4 sm:$0xff]  }
 0x423   :  { %6585 = vmatprep.subr.bf16.mxu1 %v9275_v44  ;;  %v9314_v44 = vld [vmem:[#allocation9 + $0x15d4] ss:$48 sps:$4 sm:$0xff]  }
 0x425   :  { %6422 = vmatpush1.bf16.msra.mxu0 %v9270_v45 }
 0x426   :  { %6586 = vmatpush1.bf16.msra.mxu1 %v9273_v53  ;;  %6423 = vmatprep.subr.bf16.mxu0 %v9278_v54  ;;  %v9317_v54 = vld [vmem:[#allocation9 + $0x15dc] ss:$48 sps:$4 sm:$0xff]  }
 0x427   :  { %6587 = vmatprep.subr.bf16.mxu1 %v9281_v55 }
 0x429   :  { %6424 = vmatpush1.bf16.msra.mxu0 %v9276_v57  ;;  %v9312_v57 = vld [vmem:[#allocation9 + $0x15d0] ss:$48 sps:$4 sm:$0xff]  }
 0x42a   :  { %6588 = vmatpush1.bf16.msra.mxu1 %v9279_v8  ;;  %6425 = vmatprep.subr.bf16.mxu0 %v9284_v60  ;;  %v9320_v8 = vld [vmem:[#allocation9 + $0x1634] ss:$48 sps:$4 sm:$0xff]   ;;  %v9323_v60 = vld [vmem:[#allocation9 + $0x163c] ss:$48 sps:$4 sm:$0xff]  }
 0x42b   :  { %v6121_v3 = vpop.f32.mrb[16].mxu0  ;;  %6589 = vmatprep.subr.bf16.mxu1 %v9287_v12  ;;  %v9318_v12 = vld [vmem:[#allocation9 + $0x1630] ss:$48 sps:$4 sm:$0xff]  }
 0x42c   :  { %v8420_v5 = vadd.f32 %v6121_v3, %v2067_v62  ;;  %v6285_v6 = vpop.f32.mrb[16].mxu1  ;;  %v6123_v10 = vpop.f32.mrb[17].mxu0  ;;  %v9321_v62 = vld [vmem:[#allocation9 + $0x1638] ss:$48 sps:$4 sm:$0xff]  }
 0x42d   :  { %v8421_v13 = vadd.f32 %v6123_v10, %v2071_v63  ;;  %v6287_v56 = vpop.f32.mrb[17].mxu1  ;;  %v6125_v11 = vpop.f32.mrb[18].mxu0  ;;  %6426 = vmatpush1.bf16.msra.mxu0 %v9282_v0  ;;  %v8422_v38 = vadd.f32 %v6285_v6, %v2075_v30  ;;  %v9326_v63 = vld [vmem:[#allocation9 + $0x1694] ss:$48 sps:$4 sm:$0xff]   ;;  %v9329_v0 = vld [vmem:[#allocation9 + $0x169c] ss:$48 sps:$4 sm:$0xff]  }
 0x42e   :  { %v8247_v18 = vmul.f32 -1.442695, %v8420_v5  ;;  %v6289_v19 = vpop.f32.mrb[18].mxu1  ;;  %6590 = vmatpush1.bf16.msra.mxu1 %v9285_v1  ;;  %v6126_v20 = vpop.f32.mrb[19].mxu0  ;;  %6427 = vmatprep.subr.bf16.mxu0 %v9290_v2  ;;  %v8423_v40 = vadd.f32 %v6287_v56, %v2079_v33  ;;  %v9324_v2 = vld [vmem:[#allocation9 + $0x1690] ss:$48 sps:$4 sm:$0xff]  }
 0x42f   :  { %v8248_v22 = vmul.f32 -1.442695, %v8421_v13  ;;  %v6290_v23 = vpop.f32.mrb[19].mxu1  ;;  %6591 = vmatprep.subr.bf16.mxu1 %v9293_v4  ;;  %v9327_v4 = vld [vmem:[#allocation9 + $0x1698] ss:$48 sps:$4 sm:$0xff]  }
 0x430   :  { %9796 = vpow2.f32 %v8247_v18  ;;  %v9332_v5 = vld [vmem:[#allocation9 + $0x16f4] ss:$48 sps:$4 sm:$0xff]   ;;  %v9335_v10 = vld [vmem:[#allocation9 + $0x16fc] ss:$48 sps:$4 sm:$0xff]   ;;  %v9336_v20 = vld [vmem:[#allocation9 + $0x1750] ss:$48 sps:$4 sm:$0xff]  }
 0x431   :  { %9798 = vpow2.f32 %v8248_v22  ;;  %6428 = vmatpush1.bf16.msra.mxu0 %v9288_v16  ;;  %v9330_v16 = vld [vmem:[#allocation9 + $0x16f0] ss:$48 sps:$4 sm:$0xff]   ;;  %v9338_v18 = vld [vmem:[#allocation9 + $0x1754] ss:$48 sps:$4 sm:$0xff]   ;;  %v9341_v19 = vld [vmem:[#allocation9 + $0x175c] ss:$48 sps:$4 sm:$0xff]  }
 0x432   :  { %6592 = vmatpush1.bf16.msra.mxu1 %v9291_v17  ;;  %6429 = vmatprep.subr.bf16.mxu0 %v9296_v21  ;;  %9800 = vtanh.f32 %v8422_v38  ;;  %v9333_v17 = vld [vmem:[#allocation9 + $0x16f8] ss:$48 sps:$4 sm:$0xff]   ;;  %v9344_v22 = vld [vmem:[#allocation9 + $0x17b4] ss:$48 sps:$4 sm:$0xff]   ;;  %v9347_v23 = vld [vmem:[#allocation9 + $0x17bc] ss:$48 sps:$4 sm:$0xff]  }
 0x433   :  { %6593 = vmatprep.subr.bf16.mxu1 %v9299_v24  ;;  %9802 = vtanh.f32 %v8423_v40  ;;  %v9339_v21 = vld [vmem:[#allocation9 + $0x1758] ss:$48 sps:$4 sm:$0xff]   ;;  %v9342_v24 = vld [vmem:[#allocation9 + $0x17b0] ss:$48 sps:$4 sm:$0xff]   ;;  %v9356_v33 = vld [vmem:[#allocation9 + $0x84] ss:$48 sps:$4 sm:$0xff]  }
 0x434   :  { %v9348_v30 = vld [vmem:[#allocation9 + $0x20] ss:$48 sps:$4 sm:$0xff]   ;;  %v9362_v38 = vld [vmem:[#allocation9 + $0xe4] ss:$48 sps:$4 sm:$0xff]  }
 0x435   :  { %6430 = vmatpush1.bf16.msra.mxu0 %v9294_v26  ;;  %v9345_v26 = vld [vmem:[#allocation9 + $0x17b8] ss:$48 sps:$4 sm:$0xff]   ;;  %v9360_v40 = vld [vmem:[#allocation9 + $0xe0] ss:$48 sps:$4 sm:$0xff]  }
 0x436   :  { %6594 = vmatpush1.bf16.msra.mxu1 %v9297_v49  ;;  %6431 = vmatprep.subr.bf16.mxu0 %v9302_v29  ;;  %v9350_v49 = vld [vmem:[#allocation9 + $0x24] ss:$48 sps:$4 sm:$0xff]   ;;  %v9353_v29 = vld [vmem:[#allocation9 + $0x2c] ss:$48 sps:$4 sm:$0xff]  }
 0x437   :  { %6595 = vmatprep.subr.bf16.mxu1 %v9305_v32  ;;  %v9351_v32 = vld [vmem:[#allocation9 + $0x28] ss:$48 sps:$4 sm:$0xff]  }
 0x439   :  { %6432 = vmatpush1.bf16.msra.mxu0 %v9300_v9  ;;  %v9359_v9 = vld [vmem:[#allocation9 + $0x8c] ss:$48 sps:$4 sm:$0xff]  }
 0x43a   :  { %v9797_v42 = vpop.eup %9796  ;;  %6596 = vmatpush1.bf16.msra.mxu1 %v9303_v35  ;;  %6433 = vmatprep.subr.bf16.mxu0 %v9308_v36  ;;  %v9354_v35 = vld [vmem:[#allocation9 + $0x80] ss:$48 sps:$4 sm:$0xff]   ;;  %v9357_v36 = vld [vmem:[#allocation9 + $0x88] ss:$48 sps:$4 sm:$0xff]  }
 0x43b   :  { %v9799_v45 = vpop.eup %9798  ;;  %v6954_v53 = vadd.f32 1.0, %v9797_v42  ;;  %6597 = vmatprep.subr.bf16.mxu1 %v9311_v39  ;;  %v9365_v39 = vld [vmem:[#allocation9 + $0xec] ss:$48 sps:$4 sm:$0xff]   ;;  %v9368_v42 = vld [vmem:[#allocation9 + $0x144] ss:$48 sps:$4 sm:$0xff]  }
 0x43c   :  { %v6955_v55 = vadd.f32 1.0, %v9799_v45  ;;  %v9801_v1 = vpop.eup %9800  ;;  %v9369_v45 = vld [vmem:[#allocation9 + $0x148] ss:$48 sps:$4 sm:$0xff]  }
 0x43d   :  { %9804 = vrcp.f32 %v6954_v53  ;;  %6434 = vmatpush1.bf16.msra.mxu0 %v9306_v41  ;;  %v9803_v3 = vpop.eup %9802  ;;  %v9363_v41 = vld [vmem:[#allocation9 + $0xe8] ss:$48 sps:$4 sm:$0xff]   ;;  %v9374_v53 = vld [vmem:[#allocation9 + $0x1a4] ss:$48 sps:$4 sm:$0xff]  }
 0x43e   :  { %9806 = vrcp.f32 %v6955_v55  ;;  %6598 = vmatpush1.bf16.msra.mxu1 %v9309_v43  ;;  %6435 = vmatprep.subr.bf16.mxu0 %v9314_v44  ;;  %v9371_v43 = vld [vmem:[#allocation9 + $0x14c] ss:$48 sps:$4 sm:$0xff]   ;;  %v9366_v44 = vld [vmem:[#allocation9 + $0x140] ss:$48 sps:$4 sm:$0xff]   ;;  %v9375_v55 = vld [vmem:[#allocation9 + $0x1a8] ss:$48 sps:$4 sm:$0xff]  }
 0x43f   :  { %6599 = vmatprep.subr.bf16.mxu1 %v9317_v54  ;;  %v9377_v54 = vld [vmem:[#allocation9 + $0x1ac] ss:$48 sps:$4 sm:$0xff]  }
 0x441   :  { %6436 = vmatpush1.bf16.msra.mxu0 %v9312_v57  ;;  %v9380_v57 = vld [vmem:[#allocation9 + $0x204] ss:$48 sps:$4 sm:$0xff]  }
 0x442   :  { %6600 = vmatpush1.bf16.msra.mxu1 %v9315_v58  ;;  %6437 = vmatprep.subr.bf16.mxu0 %v9320_v8  ;;  %v9383_v58 = vld [vmem:[#allocation9 + $0x20c] ss:$48 sps:$4 sm:$0xff]   ;;  %v9378_v8 = vld [vmem:[#allocation9 + $0x200] ss:$48 sps:$4 sm:$0xff]  }
 0x443   :  { %6601 = vmatprep.subr.bf16.mxu1 %v9323_v60  ;;  %v9381_v60 = vld [vmem:[#allocation9 + $0x208] ss:$48 sps:$4 sm:$0xff]  }
 0x445   :  { %6438 = vmatpush1.bf16.msra.mxu0 %v9318_v12  ;;  %v9386_v12 = vld [vmem:[#allocation9 + $0x264] ss:$48 sps:$4 sm:$0xff]  }
 0x446   :  { %6602 = vmatpush1.bf16.msra.mxu1 %v9321_v62  ;;  %6439 = vmatprep.subr.bf16.mxu0 %v9326_v63  ;;  %v9389_v62 = vld [vmem:[#allocation9 + $0x26c] ss:$48 sps:$4 sm:$0xff]   ;;  %v9384_v63 = vld [vmem:[#allocation9 + $0x260] ss:$48 sps:$4 sm:$0xff]  }
 0x447   :  { %v9805_v6 = vpop.eup %9804  ;;  %6603 = vmatprep.subr.bf16.mxu1 %v9329_v0  ;;  %v9387_v0 = vld [vmem:[#allocation9 + $0x268] ss:$48 sps:$4 sm:$0xff]  }
 0x448   :  { %v9807_v13 = vpop.eup %9806  ;;  %v10467_v56 = vmul.f32 %v9805_v6, %v9801_v1  ;;  %v9392_v1 = vld [vmem:[#allocation9 + $0x2c4] ss:$48 sps:$4 sm:$0xff]   ;;  %v9401_v6 = vld [vmem:[#allocation9 + $0x32c] ss:$48 sps:$4 sm:$0xff]  }
 0x449   :  { %v10469_v11 = vmul.f32 %v9807_v13, %v9803_v3  ;;  %6440 = vmatpush1.bf16.msra.mxu0 %v9324_v2  ;;  %v9395_v2 = vld [vmem:[#allocation9 + $0x2cc] ss:$48 sps:$4 sm:$0xff]   ;;  %v9390_v3 = vld [vmem:[#allocation9 + $0x2c0] ss:$48 sps:$4 sm:$0xff]   ;;  %v9399_v13 = vld [vmem:[#allocation9 + $0x328] ss:$48 sps:$4 sm:$0xff]  }
 0x44a   :  { %6604 = vmatpush1.bf16.msra.mxu1 %v9327_v4  ;;  %6441 = vmatprep.subr.bf16.mxu0 %v9332_v5  ;;  %v9393_v4 = vld [vmem:[#allocation9 + $0x2c8] ss:$48 sps:$4 sm:$0xff]   ;;  %v9398_v5 = vld [vmem:[#allocation9 + $0x324] ss:$48 sps:$4 sm:$0xff]  }
 0x44b   :  { %6605 = vmatprep.subr.bf16.mxu1 %v9335_v10  ;;  %v9396_v10 = vld [vmem:[#allocation9 + $0x320] ss:$48 sps:$4 sm:$0xff]  }
 0x44d   :  { %6442 = vmatpush1.bf16.msra.mxu0 %v9330_v16  ;;  %v9404_v16 = vld [vmem:[#allocation9 + $0x384] ss:$48 sps:$4 sm:$0xff]  }
 0x44e   :  { %6606 = vmatpush1.bf16.msra.mxu1 %v9333_v17  ;;  %6443 = vmatprep.subr.bf16.mxu0 %v9338_v18  ;;  %v9407_v17 = vld [vmem:[#allocation9 + $0x38c] ss:$48 sps:$4 sm:$0xff]   ;;  %v9402_v18 = vld [vmem:[#allocation9 + $0x380] ss:$48 sps:$4 sm:$0xff]  }
 0x44f   :  { %6607 = vmatprep.subr.bf16.mxu1 %v9341_v19  ;;  %v9405_v19 = vld [vmem:[#allocation9 + $0x388] ss:$48 sps:$4 sm:$0xff]  }
 0x451   :  { %6444 = vmatpush1.bf16.msra.mxu0 %v9336_v20  ;;  %v9410_v20 = vld [vmem:[#allocation9 + $0x3e4] ss:$48 sps:$4 sm:$0xff]  }
 0x452   :  { %6608 = vmatpush1.bf16.msra.mxu1 %v9339_v21  ;;  %6445 = vmatprep.subr.bf16.mxu0 %v9344_v22  ;;  %v9413_v21 = vld [vmem:[#allocation9 + $0x3ec] ss:$48 sps:$4 sm:$0xff]   ;;  %v9408_v22 = vld [vmem:[#allocation9 + $0x3e0] ss:$48 sps:$4 sm:$0xff]  }
 0x453   :  { %6609 = vmatprep.subr.bf16.mxu1 %v9347_v23  ;;  %v9411_v23 = vld [vmem:[#allocation9 + $0x3e8] ss:$48 sps:$4 sm:$0xff]  }
 0x455   :  { %6446 = vmatpush1.bf16.msra.mxu0 %v9342_v24  ;;  %v9416_v24 = vld [vmem:[#allocation9 + $0x444] ss:$48 sps:$4 sm:$0xff]  }
 0x456   :  { %6610 = vmatpush1.bf16.msra.mxu1 %v9345_v26  ;;  %6620 = vmatprep.subr.bf16.mxu0 %v9350_v49  ;;  %v9419_v26 = vld [vmem:[#allocation9 + $0x44c] ss:$48 sps:$4 sm:$0xff]   ;;  %v9414_v49 = vld [vmem:[#allocation9 + $0x440] ss:$48 sps:$4 sm:$0xff]  }
 0x457   :  { %6784 = vmatprep.subr.bf16.mxu1 %v9353_v29  ;;  %v9417_v29 = vld [vmem:[#allocation9 + $0x448] ss:$48 sps:$4 sm:$0xff]  }
 0x458   :  { %6448 = vmatmul.mubr.bf16.vlgmr.msra.gmra.mrb[20].mxu0 %v10445_v28 }
 0x459   :  { %6612 = vmatmul.mubr.bf16.vlgmr.msra.gmra.mrb[20].mxu1 %v10445_v28  ;;  %6621 = vmatpush1.bf16.msra.mxu0 %v9348_v30  ;;  %v9422_v30 = vld [vmem:[#allocation9 + $0x4a4] ss:$48 sps:$4 sm:$0xff]  }
 0x45a   :  { %6652 = vmatprep.mubr.bf16.mxu0 %v10391_v31  ;;  %6785 = vmatpush1.bf16.msra.mxu1 %v9351_v32  ;;  %v9425_v32 = vld [vmem:[#allocation9 + $0x4ac] ss:$48 sps:$4 sm:$0xff]  }
 0x45b   :  { %6816 = vmatprep.mubr.bf16.mxu1 %v10391_v31  ;;  %6622 = vmatprep.subr.bf16.mxu0 %v9356_v33  ;;  %v9372_v31 = vld [vmem:[#allocation9 + $0x1a0] ss:$48 sps:$4 sm:$0xff]  }
 0x45c   :  { %6786 = vmatprep.subr.bf16.mxu1 %v9359_v9  ;;  %v9420_v33 = vld [vmem:[#allocation9 + $0x4a0] ss:$48 sps:$4 sm:$0xff]   ;;  %v9423_v9 = vld [vmem:[#allocation9 + $0x4a8] ss:$48 sps:$4 sm:$0xff]  }
 0x45d   :  { %6623 = vmatpush1.bf16.msra.mxu0 %v9354_v35  ;;  %v9428_v35 = vld [vmem:[#allocation9 + $0x504] ss:$48 sps:$4 sm:$0xff]  }
 0x45e   :  { %6787 = vmatpush1.bf16.msra.mxu1 %v9357_v36  ;;  %6624 = vmatprep.subr.bf16.mxu0 %v9362_v38  ;;  %v9431_v36 = vld [vmem:[#allocation9 + $0x50c] ss:$48 sps:$4 sm:$0xff]   ;;  %v9426_v38 = vld [vmem:[#allocation9 + $0x500] ss:$48 sps:$4 sm:$0xff]  }
 0x45f   :  { %6788 = vmatprep.subr.bf16.mxu1 %v9365_v39  ;;  %v9429_v39 = vld [vmem:[#allocation9 + $0x508] ss:$48 sps:$4 sm:$0xff]  }
 0x461   :  { %6625 = vmatpush1.bf16.msra.mxu0 %v9360_v40  ;;  %v9434_v40 = vld [vmem:[#allocation9 + $0x564] ss:$48 sps:$4 sm:$0xff]  }
 0x462   :  { %6789 = vmatpush1.bf16.msra.mxu1 %v9363_v41  ;;  %6626 = vmatprep.subr.bf16.mxu0 %v9368_v42  ;;  %v9437_v41 = vld [vmem:[#allocation9 + $0x56c] ss:$48 sps:$4 sm:$0xff]   ;;  %v9432_v42 = vld [vmem:[#allocation9 + $0x560] ss:$48 sps:$4 sm:$0xff]  }
 0x463   :  { %6790 = vmatprep.subr.bf16.mxu1 %v9371_v43  ;;  %v9435_v43 = vld [vmem:[#allocation9 + $0x568] ss:$48 sps:$4 sm:$0xff]  }
 0x465   :  { %6627 = vmatpush1.bf16.msra.mxu0 %v9366_v44  ;;  %v9440_v44 = vld [vmem:[#allocation9 + $0x5c4] ss:$48 sps:$4 sm:$0xff]  }
 0x466   :  { %6791 = vmatpush1.bf16.msra.mxu1 %v9369_v45  ;;  %6628 = vmatprep.subr.bf16.mxu0 %v9374_v53  ;;  %v9443_v45 = vld [vmem:[#allocation9 + $0x5cc] ss:$48 sps:$4 sm:$0xff]   ;;  %v9438_v53 = vld [vmem:[#allocation9 + $0x5c0] ss:$48 sps:$4 sm:$0xff]  }
 0x467   :  { %6792 = vmatprep.subr.bf16.mxu1 %v9377_v54  ;;  %v9441_v54 = vld [vmem:[#allocation9 + $0x5c8] ss:$48 sps:$4 sm:$0xff]  }
 0x469   :  { %6629 = vmatpush1.bf16.msra.mxu0 %v9372_v31  ;;  %v9446_v31 = vld [vmem:[#allocation9 + $0x624] ss:$48 sps:$4 sm:$0xff]  }
 0x46a   :  { %6793 = vmatpush1.bf16.msra.mxu1 %v9375_v55  ;;  %6630 = vmatprep.subr.bf16.mxu0 %v9380_v57  ;;  %v9449_v55 = vld [vmem:[#allocation9 + $0x62c] ss:$48 sps:$4 sm:$0xff]   ;;  %v9444_v57 = vld [vmem:[#allocation9 + $0x620] ss:$48 sps:$4 sm:$0xff]  }
 0x46b   :  { %6794 = vmatprep.subr.bf16.mxu1 %v9383_v58  ;;  %v9447_v58 = vld [vmem:[#allocation9 + $0x628] ss:$48 sps:$4 sm:$0xff]  }
 0x46d   :  { %6631 = vmatpush1.bf16.msra.mxu0 %v9378_v8  ;;  %v9452_v8 = vld [vmem:[#allocation9 + $0x684] ss:$48 sps:$4 sm:$0xff]  }
 0x46e   :  { %6795 = vmatpush1.bf16.msra.mxu1 %v9381_v60  ;;  %6632 = vmatprep.subr.bf16.mxu0 %v9386_v12  ;;  %v9455_v60 = vld [vmem:[#allocation9 + $0x68c] ss:$48 sps:$4 sm:$0xff]   ;;  %v9450_v12 = vld [vmem:[#allocation9 + $0x680] ss:$48 sps:$4 sm:$0xff]  }
 0x46f   :  { %6796 = vmatprep.subr.bf16.mxu1 %v9389_v62  ;;  %v9453_v62 = vld [vmem:[#allocation9 + $0x688] ss:$48 sps:$4 sm:$0xff]  }
 0x471   :  { %6633 = vmatpush1.bf16.msra.mxu0 %v9384_v63  ;;  %v9458_v63 = vld [vmem:[#allocation9 + $0x6e4] ss:$48 sps:$4 sm:$0xff]  }
 0x472   :  { %6797 = vmatpush1.bf16.msra.mxu1 %v9387_v0  ;;  %6634 = vmatprep.subr.bf16.mxu0 %v9392_v1  ;;  %v9461_v0 = vld [vmem:[#allocation9 + $0x6ec] ss:$48 sps:$4 sm:$0xff]   ;;  %v9456_v1 = vld [vmem:[#allocation9 + $0x6e0] ss:$48 sps:$4 sm:$0xff]  }
 0x473   :  { %6798 = vmatprep.subr.bf16.mxu1 %v9395_v2  ;;  %v9459_v2 = vld [vmem:[#allocation9 + $0x6e8] ss:$48 sps:$4 sm:$0xff]  }
 0x475   :  { %6635 = vmatpush1.bf16.msra.mxu0 %v9390_v3  ;;  %v9464_v3 = vld [vmem:[#allocation9 + $0x744] ss:$48 sps:$4 sm:$0xff]  }
 0x476   :  { %6799 = vmatpush1.bf16.msra.mxu1 %v9393_v4  ;;  %6636 = vmatprep.subr.bf16.mxu0 %v9398_v5  ;;  %v9462_v4 = vld [vmem:[#allocation9 + $0x740] ss:$48 sps:$4 sm:$0xff]   ;;  %v9465_v5 = vld [vmem:[#allocation9 + $0x748] ss:$48 sps:$4 sm:$0xff]  }
 0x477   :  { %6800 = vmatprep.subr.bf16.mxu1 %v9401_v6  ;;  %v9470_v6 = vld [vmem:[#allocation9 + $0x7a4] ss:$48 sps:$4 sm:$0xff]  }
 0x479   :  { %6637 = vmatpush1.bf16.msra.mxu0 %v9396_v10  ;;  %v9473_v10 = vld [vmem:[#allocation9 + $0x7ac] ss:$48 sps:$4 sm:$0xff]  }
 0x47a   :  { %6801 = vmatpush1.bf16.msra.mxu1 %v9399_v13  ;;  %6638 = vmatprep.subr.bf16.mxu0 %v9404_v16  ;;  %v9471_v13 = vld [vmem:[#allocation9 + $0x7a8] ss:$48 sps:$4 sm:$0xff]   ;;  %v9476_v16 = vld [vmem:[#allocation9 + $0x804] ss:$48 sps:$4 sm:$0xff]  }
 0x47b   :  { %6802 = vmatprep.subr.bf16.mxu1 %v9407_v17  ;;  %v9479_v17 = vld [vmem:[#allocation9 + $0x80c] ss:$48 sps:$4 sm:$0xff]  }
 0x47d   :  { %6639 = vmatpush1.bf16.msra.mxu0 %v9402_v18  ;;  %v9474_v18 = vld [vmem:[#allocation9 + $0x800] ss:$48 sps:$4 sm:$0xff]  }
 0x47e   :  { %6803 = vmatpush1.bf16.msra.mxu1 %v9405_v19  ;;  %6640 = vmatprep.subr.bf16.mxu0 %v9410_v20  ;;  %v9477_v19 = vld [vmem:[#allocation9 + $0x808] ss:$48 sps:$4 sm:$0xff]   ;;  %v9482_v20 = vld [vmem:[#allocation9 + $0x864] ss:$48 sps:$4 sm:$0xff]  }
 0x47f   :  { %6804 = vmatprep.subr.bf16.mxu1 %v9413_v21  ;;  %v9485_v21 = vld [vmem:[#allocation9 + $0x86c] ss:$48 sps:$4 sm:$0xff]  }
 0x481   :  { %6641 = vmatpush1.bf16.msra.mxu0 %v9408_v22  ;;  %v9480_v22 = vld [vmem:[#allocation9 + $0x860] ss:$48 sps:$4 sm:$0xff]  }
 0x482   :  { %6805 = vmatpush1.bf16.msra.mxu1 %v9411_v23  ;;  %6642 = vmatprep.subr.bf16.mxu0 %v9416_v24  ;;  %v9483_v23 = vld [vmem:[#allocation9 + $0x868] ss:$48 sps:$4 sm:$0xff]   ;;  %v9488_v24 = vld [vmem:[#allocation9 + $0x8c4] ss:$48 sps:$4 sm:$0xff]  }
 0x483   :  { %6806 = vmatprep.subr.bf16.mxu1 %v9419_v26  ;;  %v9491_v26 = vld [vmem:[#allocation9 + $0x8cc] ss:$48 sps:$4 sm:$0xff]  }
 0x485   :  { %6643 = vmatpush1.bf16.msra.mxu0 %v9414_v49  ;;  %v9486_v49 = vld [vmem:[#allocation9 + $0x8c0] ss:$48 sps:$4 sm:$0xff]  }
 0x486   :  { %6807 = vmatpush1.bf16.msra.mxu1 %v9417_v29  ;;  %6644 = vmatprep.subr.bf16.mxu0 %v9422_v30  ;;  %v9489_v29 = vld [vmem:[#allocation9 + $0x8c8] ss:$48 sps:$4 sm:$0xff]   ;;  %v9494_v30 = vld [vmem:[#allocation9 + $0x924] ss:$48 sps:$4 sm:$0xff]  }
 0x487   :  { %6808 = vmatprep.subr.bf16.mxu1 %v9425_v32  ;;  %v9497_v32 = vld [vmem:[#allocation9 + $0x92c] ss:$48 sps:$4 sm:$0xff]  }
 0x489   :  { %6645 = vmatpush1.bf16.msra.mxu0 %v9420_v33  ;;  %v9492_v33 = vld [vmem:[#allocation9 + $0x920] ss:$48 sps:$4 sm:$0xff]  }
 0x48a   :  { %6809 = vmatpush1.bf16.msra.mxu1 %v9423_v9  ;;  %6646 = vmatprep.subr.bf16.mxu0 %v9428_v35  ;;  %v9495_v9 = vld [vmem:[#allocation9 + $0x928] ss:$48 sps:$4 sm:$0xff]   ;;  %v9500_v35 = vld [vmem:[#allocation9 + $0x984] ss:$48 sps:$4 sm:$0xff]  }
 0x48b   :  { %6810 = vmatprep.subr.bf16.mxu1 %v9431_v36  ;;  %v9503_v36 = vld [vmem:[#allocation9 + $0x98c] ss:$48 sps:$4 sm:$0xff]  }
 0x48d   :  { %6647 = vmatpush1.bf16.msra.mxu0 %v9426_v38  ;;  %v9498_v38 = vld [vmem:[#allocation9 + $0x980] ss:$48 sps:$4 sm:$0xff]  }
 0x48e   :  { %6811 = vmatpush1.bf16.msra.mxu1 %v9429_v39  ;;  %6648 = vmatprep.subr.bf16.mxu0 %v9434_v40  ;;  %v9501_v39 = vld [vmem:[#allocation9 + $0x988] ss:$48 sps:$4 sm:$0xff]   ;;  %v9506_v40 = vld [vmem:[#allocation9 + $0x9e4] ss:$48 sps:$4 sm:$0xff]  }
 0x48f   :  { %6812 = vmatprep.subr.bf16.mxu1 %v9437_v41  ;;  %v9509_v41 = vld [vmem:[#allocation9 + $0x9ec] ss:$48 sps:$4 sm:$0xff]  }
 0x491   :  { %6649 = vmatpush1.bf16.msra.mxu0 %v9432_v42  ;;  %v9504_v42 = vld [vmem:[#allocation9 + $0x9e0] ss:$48 sps:$4 sm:$0xff]  }
 0x492   :  { %6813 = vmatpush1.bf16.msra.mxu1 %v9435_v43  ;;  %6650 = vmatprep.subr.bf16.mxu0 %v9440_v44  ;;  %v9507_v43 = vld [vmem:[#allocation9 + $0x9e8] ss:$48 sps:$4 sm:$0xff]   ;;  %v9512_v44 = vld [vmem:[#allocation9 + $0xa44] ss:$48 sps:$4 sm:$0xff]  }
 0x493   :  { %6814 = vmatprep.subr.bf16.mxu1 %v9443_v45  ;;  %v9515_v45 = vld [vmem:[#allocation9 + $0xa4c] ss:$48 sps:$4 sm:$0xff]  }
 0x495   :  { %6651 = vmatpush1.bf16.msra.mxu0 %v9438_v53  ;;  %v9510_v53 = vld [vmem:[#allocation9 + $0xa40] ss:$48 sps:$4 sm:$0xff]  }
 0x496   :  { %6815 = vmatpush1.bf16.msra.mxu1 %v9441_v54  ;;  %6661 = vmatprep.subr.bf16.mxu0 %v9446_v31  ;;  %v9513_v54 = vld [vmem:[#allocation9 + $0xa48] ss:$48 sps:$4 sm:$0xff]   ;;  %v9518_v31 = vld [vmem:[#allocation9 + $0xaa4] ss:$48 sps:$4 sm:$0xff]  }
 0x497   :  { %6825 = vmatprep.subr.bf16.mxu1 %v9449_v55  ;;  %v9521_v55 = vld [vmem:[#allocation9 + $0xaac] ss:$48 sps:$4 sm:$0xff]  }
 0x498   :  { %6653 = vmatmul.mubr.bf16.vlgmr.msra.gmra.mrb[24].mxu0 %v10393_v34 }
 0x499   :  { %6817 = vmatmul.mubr.bf16.vlgmr.msra.gmra.mrb[24].mxu1 %v10393_v34  ;;  %6662 = vmatpush1.bf16.msra.mxu0 %v9444_v57  ;;  %v9467_v34 = vld [vmem:[#allocation9 + $0x74c] ss:$48 sps:$4 sm:$0xff]   ;;  %v9516_v57 = vld [vmem:[#allocation9 + $0xaa0] ss:$48 sps:$4 sm:$0xff]  }
 0x49a   :  { %6693 = vmatprep.mubr.bf16.mxu0 %v10397_v37  ;;  %6826 = vmatpush1.bf16.msra.mxu1 %v9447_v58  ;;  %v9519_v58 = vld [vmem:[#allocation9 + $0xaa8] ss:$48 sps:$4 sm:$0xff]  }
 0x49b   :  { %6857 = vmatprep.mubr.bf16.mxu1 %v10397_v37  ;;  %6663 = vmatprep.subr.bf16.mxu0 %v9452_v8  ;;  %v9468_v37 = vld [vmem:[#allocation9 + $0x7a0] ss:$48 sps:$4 sm:$0xff]   ;;  %v9524_v8 = vld [vmem:[#allocation9 + $0xb04] ss:$48 sps:$4 sm:$0xff]  }
 0x49c   :  { %6827 = vmatprep.subr.bf16.mxu1 %v9455_v60  ;;  %v9527_v60 = vld [vmem:[#allocation9 + $0xb0c] ss:$48 sps:$4 sm:$0xff]  }
 0x49d   :  { %6664 = vmatpush1.bf16.msra.mxu0 %v9450_v12  ;;  %v9522_v12 = vld [vmem:[#allocation9 + $0xb00] ss:$48 sps:$4 sm:$0xff]  }
 0x49e   :  { %6828 = vmatpush1.bf16.msra.mxu1 %v9453_v62  ;;  %6665 = vmatprep.subr.bf16.mxu0 %v9458_v63  ;;  %v9525_v62 = vld [vmem:[#allocation9 + $0xb08] ss:$48 sps:$4 sm:$0xff]   ;;  %v9530_v63 = vld [vmem:[#allocation9 + $0xb64] ss:$48 sps:$4 sm:$0xff]  }
 0x49f   :  { %6829 = vmatprep.subr.bf16.mxu1 %v9461_v0  ;;  %v9533_v0 = vld [vmem:[#allocation9 + $0xb6c] ss:$48 sps:$4 sm:$0xff]  }
 0x4a1   :  { %6666 = vmatpush1.bf16.msra.mxu0 %v9456_v1  ;;  %v9528_v1 = vld [vmem:[#allocation9 + $0xb60] ss:$48 sps:$4 sm:$0xff]  }
 0x4a2   :  { %6830 = vmatpush1.bf16.msra.mxu1 %v9459_v2  ;;  %6667 = vmatprep.subr.bf16.mxu0 %v9464_v3  ;;  %v9531_v2 = vld [vmem:[#allocation9 + $0xb68] ss:$48 sps:$4 sm:$0xff]   ;;  %v9536_v3 = vld [vmem:[#allocation9 + $0xbc4] ss:$48 sps:$4 sm:$0xff]  }
 0x4a3   :  { %6831 = vmatprep.subr.bf16.mxu1 %v9467_v34  ;;  %v9539_v34 = vld [vmem:[#allocation9 + $0xbcc] ss:$48 sps:$4 sm:$0xff]  }
 0x4a5   :  { %6668 = vmatpush1.bf16.msra.mxu0 %v9462_v4  ;;  %v9534_v4 = vld [vmem:[#allocation9 + $0xbc0] ss:$48 sps:$4 sm:$0xff]  }
 0x4a6   :  { %6832 = vmatpush1.bf16.msra.mxu1 %v9465_v5  ;;  %6669 = vmatprep.subr.bf16.mxu0 %v9470_v6  ;;  %v9537_v5 = vld [vmem:[#allocation9 + $0xbc8] ss:$48 sps:$4 sm:$0xff]   ;;  %v9542_v6 = vld [vmem:[#allocation9 + $0xc24] ss:$48 sps:$4 sm:$0xff]  }
 0x4a7   :  { %6833 = vmatprep.subr.bf16.mxu1 %v9473_v10  ;;  %v9545_v10 = vld [vmem:[#allocation9 + $0xc2c] ss:$48 sps:$4 sm:$0xff]  }
 0x4a9   :  { %6670 = vmatpush1.bf16.msra.mxu0 %v9468_v37  ;;  %v9540_v37 = vld [vmem:[#allocation9 + $0xc20] ss:$48 sps:$4 sm:$0xff]  }
 0x4aa   :  { %6834 = vmatpush1.bf16.msra.mxu1 %v9471_v13  ;;  %6671 = vmatprep.subr.bf16.mxu0 %v9476_v16  ;;  %v9543_v13 = vld [vmem:[#allocation9 + $0xc28] ss:$48 sps:$4 sm:$0xff]   ;;  %v9548_v16 = vld [vmem:[#allocation9 + $0xc84] ss:$48 sps:$4 sm:$0xff]  }
 0x4ab   :  { %6835 = vmatprep.subr.bf16.mxu1 %v9479_v17  ;;  %v9551_v17 = vld [vmem:[#allocation9 + $0xc8c] ss:$48 sps:$4 sm:$0xff]  }
 0x4ad   :  { %6672 = vmatpush1.bf16.msra.mxu0 %v9474_v18  ;;  %v9546_v18 = vld [vmem:[#allocation9 + $0xc80] ss:$48 sps:$4 sm:$0xff]  }
 0x4ae   :  { %6836 = vmatpush1.bf16.msra.mxu1 %v9477_v19  ;;  %6673 = vmatprep.subr.bf16.mxu0 %v9482_v20  ;;  %v9549_v19 = vld [vmem:[#allocation9 + $0xc88] ss:$48 sps:$4 sm:$0xff]   ;;  %v9554_v20 = vld [vmem:[#allocation9 + $0xce4] ss:$48 sps:$4 sm:$0xff]  }
 0x4af   :  { %6837 = vmatprep.subr.bf16.mxu1 %v9485_v21  ;;  %v9557_v21 = vld [vmem:[#allocation9 + $0xcec] ss:$48 sps:$4 sm:$0xff]  }
 0x4b1   :  { %6674 = vmatpush1.bf16.msra.mxu0 %v9480_v22  ;;  %v9552_v22 = vld [vmem:[#allocation9 + $0xce0] ss:$48 sps:$4 sm:$0xff]  }
 0x4b2   :  { %6838 = vmatpush1.bf16.msra.mxu1 %v9483_v23  ;;  %6675 = vmatprep.subr.bf16.mxu0 %v9488_v24  ;;  %v9555_v23 = vld [vmem:[#allocation9 + $0xce8] ss:$48 sps:$4 sm:$0xff]   ;;  %v9560_v24 = vld [vmem:[#allocation9 + $0xd44] ss:$48 sps:$4 sm:$0xff]  }
 0x4b3   :  { %6839 = vmatprep.subr.bf16.mxu1 %v9491_v26  ;;  %v9558_v26 = vld [vmem:[#allocation9 + $0xd40] ss:$48 sps:$4 sm:$0xff]  }
 0x4b5   :  { %6676 = vmatpush1.bf16.msra.mxu0 %v9486_v49  ;;  %v9561_v49 = vld [vmem:[#allocation9 + $0xd48] ss:$48 sps:$4 sm:$0xff]  }
 0x4b6   :  { %6840 = vmatpush1.bf16.msra.mxu1 %v9489_v29  ;;  %6677 = vmatprep.subr.bf16.mxu0 %v9494_v30  ;;  %v9566_v29 = vld [vmem:[#allocation9 + $0xda4] ss:$48 sps:$4 sm:$0xff]   ;;  %v9569_v30 = vld [vmem:[#allocation9 + $0xdac] ss:$48 sps:$4 sm:$0xff]  }
 0x4b7   :  { %6841 = vmatprep.subr.bf16.mxu1 %v9497_v32  ;;  %v9567_v32 = vld [vmem:[#allocation9 + $0xda8] ss:$48 sps:$4 sm:$0xff]  }
 0x4b9   :  { %6678 = vmatpush1.bf16.msra.mxu0 %v9492_v33  ;;  %v9572_v33 = vld [vmem:[#allocation9 + $0xe04] ss:$48 sps:$4 sm:$0xff]  }
 0x4ba   :  { %6842 = vmatpush1.bf16.msra.mxu1 %v9495_v9  ;;  %6679 = vmatprep.subr.bf16.mxu0 %v9500_v35  ;;  %v9575_v9 = vld [vmem:[#allocation9 + $0xe0c] ss:$48 sps:$4 sm:$0xff]   ;;  %v9570_v35 = vld [vmem:[#allocation9 + $0xe00] ss:$48 sps:$4 sm:$0xff]  }
 0x4bb   :  { %6843 = vmatprep.subr.bf16.mxu1 %v9503_v36  ;;  %v9573_v36 = vld [vmem:[#allocation9 + $0xe08] ss:$48 sps:$4 sm:$0xff]  }
 0x4bd   :  { %6680 = vmatpush1.bf16.msra.mxu0 %v9498_v38  ;;  %v9578_v38 = vld [vmem:[#allocation9 + $0xe64] ss:$48 sps:$4 sm:$0xff]  }
 0x4be   :  { %6844 = vmatpush1.bf16.msra.mxu1 %v9501_v39  ;;  %6681 = vmatprep.subr.bf16.mxu0 %v9506_v40  ;;  %v9581_v39 = vld [vmem:[#allocation9 + $0xe6c] ss:$48 sps:$4 sm:$0xff]   ;;  %v9576_v40 = vld [vmem:[#allocation9 + $0xe60] ss:$48 sps:$4 sm:$0xff]  }
 0x4bf   :  { %6845 = vmatprep.subr.bf16.mxu1 %v9509_v41  ;;  %v9579_v41 = vld [vmem:[#allocation9 + $0xe68] ss:$48 sps:$4 sm:$0xff]  }
 0x4c1   :  { %6682 = vmatpush1.bf16.msra.mxu0 %v9504_v42  ;;  %v9584_v42 = vld [vmem:[#allocation9 + $0xec4] ss:$48 sps:$4 sm:$0xff]  }
 0x4c2   :  { %6846 = vmatpush1.bf16.msra.mxu1 %v9507_v43  ;;  %6683 = vmatprep.subr.bf16.mxu0 %v9512_v44  ;;  %v9587_v43 = vld [vmem:[#allocation9 + $0xecc] ss:$48 sps:$4 sm:$0xff]   ;;  %v9582_v44 = vld [vmem:[#allocation9 + $0xec0] ss:$48 sps:$4 sm:$0xff]  }
 0x4c3   :  { %6847 = vmatprep.subr.bf16.mxu1 %v9515_v45  ;;  %v9585_v45 = vld [vmem:[#allocation9 + $0xec8] ss:$48 sps:$4 sm:$0xff]  }
 0x4c5   :  { %6684 = vmatpush1.bf16.msra.mxu0 %v9510_v53  ;;  %v9590_v53 = vld [vmem:[#allocation9 + $0xf24] ss:$48 sps:$4 sm:$0xff]  }
 0x4c6   :  { %6848 = vmatpush1.bf16.msra.mxu1 %v9513_v54  ;;  %6685 = vmatprep.subr.bf16.mxu0 %v9518_v31  ;;  %v9593_v54 = vld [vmem:[#allocation9 + $0xf2c] ss:$48 sps:$4 sm:$0xff]   ;;  %v9588_v31 = vld [vmem:[#allocation9 + $0xf20] ss:$48 sps:$4 sm:$0xff]  }
 0x4c7   :  { %6849 = vmatprep.subr.bf16.mxu1 %v9521_v55  ;;  %v9591_v55 = vld [vmem:[#allocation9 + $0xf28] ss:$48 sps:$4 sm:$0xff]  }
 0x4c9   :  { %6686 = vmatpush1.bf16.msra.mxu0 %v9516_v57  ;;  %v9596_v57 = vld [vmem:[#allocation9 + $0xf84] ss:$48 sps:$4 sm:$0xff]  }
 0x4ca   :  { %6850 = vmatpush1.bf16.msra.mxu1 %v9519_v58  ;;  %6687 = vmatprep.subr.bf16.mxu0 %v9524_v8  ;;  %v9599_v58 = vld [vmem:[#allocation9 + $0xf8c] ss:$48 sps:$4 sm:$0xff]   ;;  %v9594_v8 = vld [vmem:[#allocation9 + $0xf80] ss:$48 sps:$4 sm:$0xff]  }
 0x4cb   :  { %6851 = vmatprep.subr.bf16.mxu1 %v9527_v60  ;;  %v9597_v60 = vld [vmem:[#allocation9 + $0xf88] ss:$48 sps:$4 sm:$0xff]  }
 0x4cd   :  { %6688 = vmatpush1.bf16.msra.mxu0 %v9522_v12  ;;  %v9602_v12 = vld [vmem:[#allocation9 + $0xfe4] ss:$48 sps:$4 sm:$0xff]  }
 0x4ce   :  { %6852 = vmatpush1.bf16.msra.mxu1 %v9525_v62  ;;  %6689 = vmatprep.subr.bf16.mxu0 %v9530_v63  ;;  %v9605_v62 = vld [vmem:[#allocation9 + $0xfec] ss:$48 sps:$4 sm:$0xff]   ;;  %v9600_v63 = vld [vmem:[#allocation9 + $0xfe0] ss:$48 sps:$4 sm:$0xff]  }
 0x4cf   :  { %6853 = vmatprep.subr.bf16.mxu1 %v9533_v0  ;;  %v9603_v0 = vld [vmem:[#allocation9 + $0xfe8] ss:$48 sps:$4 sm:$0xff]  }
 0x4d1   :  { %6690 = vmatpush1.bf16.msra.mxu0 %v9528_v1  ;;  %v9608_v1 = vld [vmem:[#allocation9 + $0x1044] ss:$48 sps:$4 sm:$0xff]  }
 0x4d2   :  { %6854 = vmatpush1.bf16.msra.mxu1 %v9531_v2  ;;  %6691 = vmatprep.subr.bf16.mxu0 %v9536_v3  ;;  %v9611_v2 = vld [vmem:[#allocation9 + $0x104c] ss:$48 sps:$4 sm:$0xff]   ;;  %v9606_v3 = vld [vmem:[#allocation9 + $0x1040] ss:$48 sps:$4 sm:$0xff]  }
 0x4d3   :  { %6855 = vmatprep.subr.bf16.mxu1 %v9539_v34  ;;  %v9609_v34 = vld [vmem:[#allocation9 + $0x1048] ss:$48 sps:$4 sm:$0xff]  }
 0x4d5   :  { %6692 = vmatpush1.bf16.msra.mxu0 %v9534_v4  ;;  %v9614_v4 = vld [vmem:[#allocation9 + $0x10a4] ss:$48 sps:$4 sm:$0xff]  }
 0x4d6   :  { %6856 = vmatpush1.bf16.msra.mxu1 %v9537_v5  ;;  %6702 = vmatprep.subr.bf16.mxu0 %v9542_v6  ;;  %v9617_v5 = vld [vmem:[#allocation9 + $0x10ac] ss:$48 sps:$4 sm:$0xff]   ;;  %v9612_v6 = vld [vmem:[#allocation9 + $0x10a0] ss:$48 sps:$4 sm:$0xff]  }
 0x4d7   :  { %6866 = vmatprep.subr.bf16.mxu1 %v9545_v10  ;;  %v9615_v10 = vld [vmem:[#allocation9 + $0x10a8] ss:$48 sps:$4 sm:$0xff]  }
 0x4d8   :  { %6694 = vmatmul.mubr.bf16.vlgmr.msra.gmra.mrb[24].mxu0 %v10414_v14 }
 0x4d9   :  { %6858 = vmatmul.mubr.bf16.vlgmr.msra.gmra.mrb[24].mxu1 %v10414_v14  ;;  %6703 = vmatpush1.bf16.msra.mxu0 %v9540_v37  ;;  %v9563_v14 = vld [vmem:[#allocation9 + $0xd4c] ss:$48 sps:$4 sm:$0xff]   ;;  %v9620_v37 = vld [vmem:[#allocation9 + $0x1104] ss:$48 sps:$4 sm:$0xff]  }
 0x4da   :  { %6734 = vmatprep.mubr.bf16.mxu0 %v10416_v15  ;;  %6867 = vmatpush1.bf16.msra.mxu1 %v9543_v13  ;;  %v9623_v13 = vld [vmem:[#allocation9 + $0x110c] ss:$48 sps:$4 sm:$0xff]  }
 0x4db   :  { %6898 = vmatprep.mubr.bf16.mxu1 %v10416_v15  ;;  %6704 = vmatprep.subr.bf16.mxu0 %v9548_v16  ;;  %v9564_v15 = vld [vmem:[#allocation9 + $0xda0] ss:$48 sps:$4 sm:$0xff]  }
 0x4dc   :  { %6868 = vmatprep.subr.bf16.mxu1 %v9551_v17  ;;  %v9618_v16 = vld [vmem:[#allocation9 + $0x1100] ss:$48 sps:$4 sm:$0xff]   ;;  %v9621_v17 = vld [vmem:[#allocation9 + $0x1108] ss:$48 sps:$4 sm:$0xff]  }
 0x4dd   :  { %6705 = vmatpush1.bf16.msra.mxu0 %v9546_v18  ;;  %v9626_v18 = vld [vmem:[#allocation9 + $0x1164] ss:$48 sps:$4 sm:$0xff]  }
 0x4de   :  { %6869 = vmatpush1.bf16.msra.mxu1 %v9549_v19  ;;  %6706 = vmatprep.subr.bf16.mxu0 %v9554_v20  ;;  %v9629_v19 = vld [vmem:[#allocation9 + $0x116c] ss:$48 sps:$4 sm:$0xff]   ;;  %v9624_v20 = vld [vmem:[#allocation9 + $0x1160] ss:$48 sps:$4 sm:$0xff]  }
 0x4df   :  { %6870 = vmatprep.subr.bf16.mxu1 %v9557_v21  ;;  %v9627_v21 = vld [vmem:[#allocation9 + $0x1168] ss:$48 sps:$4 sm:$0xff]  }
 0x4e1   :  { %6707 = vmatpush1.bf16.msra.mxu0 %v9552_v22  ;;  %v9632_v22 = vld [vmem:[#allocation9 + $0x11c4] ss:$48 sps:$4 sm:$0xff]  }
 0x4e2   :  { %6871 = vmatpush1.bf16.msra.mxu1 %v9555_v23  ;;  %6708 = vmatprep.subr.bf16.mxu0 %v9560_v24  ;;  %v9635_v23 = vld [vmem:[#allocation9 + $0x11cc] ss:$48 sps:$4 sm:$0xff]   ;;  %v9630_v24 = vld [vmem:[#allocation9 + $0x11c0] ss:$48 sps:$4 sm:$0xff]  }
 0x4e3   :  { %6872 = vmatprep.subr.bf16.mxu1 %v9563_v14  ;;  %v9633_v14 = vld [vmem:[#allocation9 + $0x11c8] ss:$48 sps:$4 sm:$0xff]  }
 0x4e5   :  { %6709 = vmatpush1.bf16.msra.mxu0 %v9558_v26  ;;  %v9638_v26 = vld [vmem:[#allocation9 + $0x1224] ss:$48 sps:$4 sm:$0xff]  }
 0x4e6   :  { %6873 = vmatpush1.bf16.msra.mxu1 %v9561_v49  ;;  %6710 = vmatprep.subr.bf16.mxu0 %v9566_v29  ;;  %v9641_v49 = vld [vmem:[#allocation9 + $0x122c] ss:$48 sps:$4 sm:$0xff]   ;;  %v9636_v29 = vld [vmem:[#allocation9 + $0x1220] ss:$48 sps:$4 sm:$0xff]  }
 0x4e7   :  { %6874 = vmatprep.subr.bf16.mxu1 %v9569_v30  ;;  %v9639_v30 = vld [vmem:[#allocation9 + $0x1228] ss:$48 sps:$4 sm:$0xff]  }
 0x4e9   :  { %6711 = vmatpush1.bf16.msra.mxu0 %v9564_v15  ;;  %v9644_v15 = vld [vmem:[#allocation9 + $0x1284] ss:$48 sps:$4 sm:$0xff]  }
 0x4ea   :  { %6875 = vmatpush1.bf16.msra.mxu1 %v9567_v32  ;;  %6712 = vmatprep.subr.bf16.mxu0 %v9572_v33  ;;  %v9647_v32 = vld [vmem:[#allocation9 + $0x128c] ss:$48 sps:$4 sm:$0xff]   ;;  %v9642_v33 = vld [vmem:[#allocation9 + $0x1280] ss:$48 sps:$4 sm:$0xff]  }
 0x4eb   :  { %6876 = vmatprep.subr.bf16.mxu1 %v9575_v9  ;;  %v9645_v9 = vld [vmem:[#allocation9 + $0x1288] ss:$48 sps:$4 sm:$0xff]  }
 0x4ed   :  { %6713 = vmatpush1.bf16.msra.mxu0 %v9570_v35  ;;  %v9650_v35 = vld [vmem:[#allocation9 + $0x12e4] ss:$48 sps:$4 sm:$0xff]  }
 0x4ee   :  { %6877 = vmatpush1.bf16.msra.mxu1 %v9573_v36  ;;  %6714 = vmatprep.subr.bf16.mxu0 %v9578_v38  ;;  %v9653_v36 = vld [vmem:[#allocation9 + $0x12ec] ss:$48 sps:$4 sm:$0xff]   ;;  %v9648_v38 = vld [vmem:[#allocation9 + $0x12e0] ss:$48 sps:$4 sm:$0xff]  }
 0x4ef   :  { %6878 = vmatprep.subr.bf16.mxu1 %v9581_v39  ;;  %v9651_v39 = vld [vmem:[#allocation9 + $0x12e8] ss:$48 sps:$4 sm:$0xff]  }
 0x4f1   :  { %6715 = vmatpush1.bf16.msra.mxu0 %v9576_v40  ;;  %v9656_v40 = vld [vmem:[#allocation9 + $0x1344] ss:$48 sps:$4 sm:$0xff]  }
 0x4f2   :  { %6879 = vmatpush1.bf16.msra.mxu1 %v9579_v41  ;;  %6716 = vmatprep.subr.bf16.mxu0 %v9584_v42  ;;  %v9654_v41 = vld [vmem:[#allocation9 + $0x1340] ss:$48 sps:$4 sm:$0xff]   ;;  %v9657_v42 = vld [vmem:[#allocation9 + $0x1348] ss:$48 sps:$4 sm:$0xff]  }
 0x4f3   :  { %6880 = vmatprep.subr.bf16.mxu1 %v9587_v43  ;;  %v9662_v43 = vld [vmem:[#allocation9 + $0x13a4] ss:$48 sps:$4 sm:$0xff]  }
 0x4f5   :  { %6717 = vmatpush1.bf16.msra.mxu0 %v9582_v44  ;;  %v9665_v44 = vld [vmem:[#allocation9 + $0x13ac] ss:$48 sps:$4 sm:$0xff]  }
 0x4f6   :  { %6881 = vmatpush1.bf16.msra.mxu1 %v9585_v45  ;;  %6718 = vmatprep.subr.bf16.mxu0 %v9590_v53  ;;  %v9663_v45 = vld [vmem:[#allocation9 + $0x13a8] ss:$48 sps:$4 sm:$0xff]   ;;  %v9668_v53 = vld [vmem:[#allocation9 + $0x1404] ss:$48 sps:$4 sm:$0xff]  }
 0x4f7   :  { %6882 = vmatprep.subr.bf16.mxu1 %v9593_v54  ;;  %v9671_v54 = vld [vmem:[#allocation9 + $0x140c] ss:$48 sps:$4 sm:$0xff]  }
 0x4f9   :  { %6719 = vmatpush1.bf16.msra.mxu0 %v9588_v31  ;;  %v10487_v31 = vld [vmem:[#allocation10] sm:$0xff] }
 0x4fa   :  { %6883 = vmatpush1.bf16.msra.mxu1 %v9591_v55  ;;  %6720 = vmatprep.subr.bf16.mxu0 %v9596_v57  ;;  %v2083_v55 = vrot.slane %v10487_v31, %v870_v25  ;;  %v2087_v57 = vrot.slane %v10487_v31, %v874_v52 }
 0x4fb   :  { %6884 = vmatprep.subr.bf16.mxu1 %v9599_v58  ;;  %v9666_v58 = vld [vmem:[#allocation9 + $0x1400] ss:$48 sps:$4 sm:$0xff]  }
 0x4fd   :  { %6721 = vmatpush1.bf16.msra.mxu0 %v9594_v8  ;;  %v9669_v8 = vld [vmem:[#allocation9 + $0x1408] ss:$48 sps:$4 sm:$0xff]  }
 0x4fe   :  { %6885 = vmatpush1.bf16.msra.mxu1 %v9597_v60  ;;  %6722 = vmatprep.subr.bf16.mxu0 %v9602_v12  ;;  %v9674_v60 = vld [vmem:[#allocation9 + $0x1464] ss:$48 sps:$4 sm:$0xff]  }
 0x4ff   :  { %6886 = vmatprep.subr.bf16.mxu1 %v9605_v62  ;;  %v9677_v62 = vld [vmem:[#allocation9 + $0x146c] ss:$48 sps:$4 sm:$0xff]  }
 0x501   :  { %6723 = vmatpush1.bf16.msra.mxu0 %v9600_v63 }
 0x502   :  { %6887 = vmatpush1.bf16.msra.mxu1 %v9603_v0  ;;  %6724 = vmatprep.subr.bf16.mxu0 %v9608_v1 }
 0x503   :  { %6888 = vmatprep.subr.bf16.mxu1 %v9611_v2 }
 0x505   :  { %6725 = vmatpush1.bf16.msra.mxu0 %v9606_v3 }
 0x506   :  { %6889 = vmatpush1.bf16.msra.mxu1 %v9609_v34  ;;  %6726 = vmatprep.subr.bf16.mxu0 %v9614_v4  ;;  %v9672_v34 = vld [vmem:[#allocation9 + $0x1460] ss:$48 sps:$4 sm:$0xff]   ;;  %v9675_v4 = vld [vmem:[#allocation9 + $0x1468] ss:$48 sps:$4 sm:$0xff]  }
 0x507   :  { %6890 = vmatprep.subr.bf16.mxu1 %v9617_v5 }
 0x509   :  { %6727 = vmatpush1.bf16.msra.mxu0 %v9612_v6 }
 0x50a   :  { %6891 = vmatpush1.bf16.msra.mxu1 %v9615_v10  ;;  %6728 = vmatprep.subr.bf16.mxu0 %v9620_v37  ;;  %v9680_v10 = vld [vmem:[#allocation9 + $0x14c4] ss:$48 sps:$4 sm:$0xff]  }
 0x50b   :  { %6892 = vmatprep.subr.bf16.mxu1 %v9623_v13 }
 0x50d   :  { %6729 = vmatpush1.bf16.msra.mxu0 %v9618_v16  ;;  %v9683_v16 = vld [vmem:[#allocation9 + $0x14cc] ss:$48 sps:$4 sm:$0xff]  }
 0x50e   :  { %6893 = vmatpush1.bf16.msra.mxu1 %v9621_v17  ;;  %6730 = vmatprep.subr.bf16.mxu0 %v9626_v18  ;;  %v9678_v17 = vld [vmem:[#allocation9 + $0x14c0] ss:$48 sps:$4 sm:$0xff]   ;;  %v9681_v18 = vld [vmem:[#allocation9 + $0x14c8] ss:$48 sps:$4 sm:$0xff]  }
 0x50f   :  { %6894 = vmatprep.subr.bf16.mxu1 %v9629_v19  ;;  %v9686_v19 = vld [vmem:[#allocation9 + $0x1524] ss:$48 sps:$4 sm:$0xff]  }
 0x511   :  { %6731 = vmatpush1.bf16.msra.mxu0 %v9624_v20  ;;  %v9689_v20 = vld [vmem:[#allocation9 + $0x152c] ss:$48 sps:$4 sm:$0xff]  }
 0x512   :  { %6895 = vmatpush1.bf16.msra.mxu1 %v9627_v21  ;;  %6732 = vmatprep.subr.bf16.mxu0 %v9632_v22  ;;  %v9684_v21 = vld [vmem:[#allocation9 + $0x1520] ss:$48 sps:$4 sm:$0xff]   ;;  %v9687_v22 = vld [vmem:[#allocation9 + $0x1528] ss:$48 sps:$4 sm:$0xff]  }
 0x513   :  { %6896 = vmatprep.subr.bf16.mxu1 %v9635_v23  ;;  %v9692_v23 = vld [vmem:[#allocation9 + $0x1584] ss:$48 sps:$4 sm:$0xff]  }
 0x515   :  { %6733 = vmatpush1.bf16.msra.mxu0 %v9630_v24  ;;  %v9695_v24 = vld [vmem:[#allocation9 + $0x158c] ss:$48 sps:$4 sm:$0xff]  }
 0x516   :  { %6897 = vmatpush1.bf16.msra.mxu1 %v9633_v14  ;;  %6743 = vmatprep.subr.bf16.mxu0 %v9638_v26  ;;  %v9690_v14 = vld [vmem:[#allocation9 + $0x1580] ss:$48 sps:$4 sm:$0xff]  }
 0x517   :  { %6907 = vmatprep.subr.bf16.mxu1 %v9641_v49  ;;  %v9693_v49 = vld [vmem:[#allocation9 + $0x1588] ss:$48 sps:$4 sm:$0xff]  }
 0x518   :  { %6735 = vmatmul.mubr.bf16.vlgmr.msra.gmra.mrb[24].mxu0 %v10432_v59 }
 0x519   :  { %6899 = vmatmul.mubr.bf16.vlgmr.msra.gmra.mrb[24].mxu1 %v10432_v59  ;;  %6744 = vmatpush1.bf16.msra.mxu0 %v9636_v29  ;;  %v9659_v59 = vld [vmem:[#allocation9 + $0x134c] ss:$48 sps:$4 sm:$0xff]   ;;  %v9698_v29 = vld [vmem:[#allocation9 + $0x15e4] ss:$48 sps:$4 sm:$0xff]  }
 0x51a   :  { %6775 = vmatprep.mubr.bf16.mxu0 %v10434_v61  ;;  %6908 = vmatpush1.bf16.msra.mxu1 %v9639_v30 }
 0x51b   :  { %6939 = vmatprep.mubr.bf16.mxu1 %v10434_v61  ;;  %6745 = vmatprep.subr.bf16.mxu0 %v9644_v15  ;;  %v9660_v61 = vld [vmem:[#allocation9 + $0x13a0] ss:$48 sps:$4 sm:$0xff]   ;;  %v9701_v15 = vld [vmem:[#allocation9 + $0x15ec] ss:$48 sps:$4 sm:$0xff]  }
 0x51c   :  { %6909 = vmatprep.subr.bf16.mxu1 %v9647_v32 }
 0x51d   :  { %6746 = vmatpush1.bf16.msra.mxu0 %v9642_v33 }
 0x51e   :  { %6910 = vmatpush1.bf16.msra.mxu1 %v9645_v9  ;;  %6747 = vmatprep.subr.bf16.mxu0 %v9650_v35  ;;  %v9696_v9 = vld [vmem:[#allocation9 + $0x15e0] ss:$48 sps:$4 sm:$0xff]   ;;  %v9699_v35 = vld [vmem:[#allocation9 + $0x15e8] ss:$48 sps:$4 sm:$0xff]  }
 0x51f   :  { %6911 = vmatprep.subr.bf16.mxu1 %v9653_v36  ;;  %v9704_v36 = vld [vmem:[#allocation9 + $0x1644] ss:$48 sps:$4 sm:$0xff]  }
 0x521   :  { %6748 = vmatpush1.bf16.msra.mxu0 %v9648_v38  ;;  %v9707_v38 = vld [vmem:[#allocation9 + $0x164c] ss:$48 sps:$4 sm:$0xff]  }
 0x522   :  { %6912 = vmatpush1.bf16.msra.mxu1 %v9651_v39  ;;  %6749 = vmatprep.subr.bf16.mxu0 %v9656_v40  ;;  %v9702_v39 = vld [vmem:[#allocation9 + $0x1640] ss:$48 sps:$4 sm:$0xff]   ;;  %v9705_v40 = vld [vmem:[#allocation9 + $0x1648] ss:$48 sps:$4 sm:$0xff]  }
 0x523   :  { %6913 = vmatprep.subr.bf16.mxu1 %v9659_v59  ;;  %v9710_v59 = vld [vmem:[#allocation9 + $0x16a4] ss:$48 sps:$4 sm:$0xff]  }
 0x525   :  { %6750 = vmatpush1.bf16.msra.mxu0 %v9654_v41  ;;  %v9708_v41 = vld [vmem:[#allocation9 + $0x16a0] ss:$48 sps:$4 sm:$0xff]  }
 0x526   :  { %6914 = vmatpush1.bf16.msra.mxu1 %v9657_v42  ;;  %6751 = vmatprep.subr.bf16.mxu0 %v9662_v43  ;;  %v9716_v43 = vld [vmem:[#allocation9 + $0x1704] ss:$48 sps:$4 sm:$0xff]  }
 0x527   :  { %6915 = vmatprep.subr.bf16.mxu1 %v9665_v44 }
 0x529   :  { %6752 = vmatpush1.bf16.msra.mxu0 %v9660_v61  ;;  %v9719_v61 = vld [vmem:[#allocation9 + $0x170c] ss:$48 sps:$4 sm:$0xff]  }
 0x52a   :  { %6916 = vmatpush1.bf16.msra.mxu1 %v9663_v45  ;;  %6753 = vmatprep.subr.bf16.mxu0 %v9668_v53 }
 0x52b   :  { %v6449_v12 = vpop.f32.mrb[20].mxu0  ;;  %6917 = vmatprep.subr.bf16.mxu1 %v9671_v54 }
 0x52c   :  { %v8424_v63 = vadd.f32 %v6449_v12, %v2083_v55  ;;  %v10495_v0 = vpop.f32.mrb[20].mxu1  ;;  %v6451_v1 = vpop.f32.mrb[21].mxu0  ;;  %v9714_v55 = vld [vmem:[#allocation9 + $0x1700] ss:$48 sps:$4 sm:$0xff]  }
 0x52d   :  { %v8425_v2 = vadd.f32 %v6451_v1, %v2087_v57  ;;  %v10497_v3 = vpop.f32.mrb[21].mxu1  ;;  %v6453_v25 = vpop.f32.mrb[22].mxu0  ;;  %6754 = vmatpush1.bf16.msra.mxu0 %v9666_v58  ;;  %v9717_v57 = vld [vmem:[#allocation9 + $0x1708] ss:$48 sps:$4 sm:$0xff]   ;;  %v9722_v58 = vld [vmem:[#allocation9 + $0x1764] ss:$48 sps:$4 sm:$0xff]  }
 0x52e   :  { %v8249_v52 = vmul.f32 -1.442695, %v8424_v63  ;;  %v6617_v5 = vpop.f32.mrb[22].mxu1  ;;  %6918 = vmatpush1.bf16.msra.mxu1 %v9669_v8  ;;  %v6454_v6 = vpop.f32.mrb[23].mxu0  ;;  %6755 = vmatprep.subr.bf16.mxu0 %v9674_v60  ;;  %v9725_v60 = vld [vmem:[#allocation9 + $0x176c] ss:$48 sps:$4 sm:$0xff]  }
 0x52f   :  { %v8250_v37 = vmul.f32 -1.442695, %v8425_v2  ;;  %v6618_v13 = vpop.f32.mrb[23].mxu1  ;;  %6919 = vmatprep.subr.bf16.mxu1 %v9677_v62  ;;  %v9720_v12 = vld [vmem:[#allocation9 + $0x1760] ss:$48 sps:$4 sm:$0xff]  }
 0x530   :  { %9808 = vpow2.f32 %v8249_v52  ;;  %v9723_v62 = vld [vmem:[#allocation9 + $0x1768] ss:$48 sps:$4 sm:$0xff]   ;;  %v9728_v63 = vld [vmem:[#allocation9 + $0x17c4] ss:$48 sps:$4 sm:$0xff]   ;;  %v9731_v1 = vld [vmem:[#allocation9 + $0x17cc] ss:$48 sps:$4 sm:$0xff]  }
 0x531   :  { %6756 = vmatpush1.bf16.msra.mxu0 %v9672_v34  ;;  %9810 = vpow2.f32 %v8250_v37  ;;  %v9726_v2 = vld [vmem:[#allocation9 + $0x17c0] ss:$48 sps:$4 sm:$0xff]   ;;  %v9729_v25 = vld [vmem:[#allocation9 + $0x17c8] ss:$48 sps:$4 sm:$0xff]  }
 0x532   :  { %6920 = vmatpush1.bf16.msra.mxu1 %v9675_v4  ;;  %6757 = vmatprep.subr.bf16.mxu0 %v9680_v10  ;;  %9812 = vtanh.f32 %v10467_v56  ;;  %v9713_v56 = vld [vmem:[#allocation9 + $0x16ac] ss:$48 sps:$4 sm:$0xff]  }
 0x533   :  { %6921 = vmatprep.subr.bf16.mxu1 %v9683_v16  ;;  %v9732_v34 = vld [vmem:[%s10625_s7 + $0x40] sm:$0xff]   ;;  %v9734_v52 = vld [vmem:[%s10625_s7 + $0x48] sm:$0xff]   ;;  %v9736_v10 = vld [vmem:[%s10625_s7 + $0x50] sm:$0xff]  }
 0x534   :  { %v9733_v4 = vld [vmem:[%s10625_s7] sm:$0xff]   ;;  %v9735_v6 = vld [vmem:[%s10625_s7 + $0x8] sm:$0xff]   ;;  %v9737_v37 = vld [vmem:[%s10625_s7 + $0x10] sm:$0xff]  }
 0x535   :  { %6758 = vmatpush1.bf16.msra.mxu0 %v9678_v17  ;;  %v9739_v13 = vld [vmem:[%s10625_s7 + $0x18] sm:$0xff]   ;;  %v9740_v16 = vld [vmem:[%s10625_s7 + $0x60] sm:$0xff]  }
 0x536   :  { %6922 = vmatpush1.bf16.msra.mxu1 %v9681_v18  ;;  %6759 = vmatprep.subr.bf16.mxu0 %v9686_v19  ;;  %v9741_v17 = vld [vmem:[%s10625_s7 + $0x20] sm:$0xff]   ;;  %v9742_v18 = vld [vmem:[%s10625_s7 + $0x68] sm:$0xff]  }
 0x537   :  { %6923 = vmatprep.subr.bf16.mxu1 %v9689_v20  ;;  %v9743_v19 = vld [vmem:[%s10625_s7 + $0x28] sm:$0xff]   ;;  %v9744_v20 = vld [vmem:[%s10625_s7 + $0x70] sm:$0xff]  }
 0x539   :  { %6760 = vmatpush1.bf16.msra.mxu0 %v9684_v21  ;;  %v9745_v21 = vld [vmem:[%s10625_s7 + $0x30] sm:$0xff]  }
 0x53a   :  { %v9809_v26 = vpop.eup %9808  ;;  %6924 = vmatpush1.bf16.msra.mxu1 %v9687_v22  ;;  %6761 = vmatprep.subr.bf16.mxu0 %v9692_v23  ;;  %v9746_v22 = vld [vmem:[%s10625_s7 + $0x78] sm:$0xff]  }
 0x53b   :  { %v6968_v30 = vadd.f32 1.0, %v9809_v26  ;;  %6925 = vmatprep.subr.bf16.mxu1 %v9695_v24  ;;  %v9811_v32 = vpop.eup %9810  ;;  %v9747_v23 = vld [vmem:[%s10625_s7 + $0x38] sm:$0xff]   ;;  %v9749_v26 = vld [vmem:[%s10626_s8] sm:$0xff]  }
 0x53c   :  { %v6969_v33 = vadd.f32 1.0, %v9811_v32  ;;  %v9813_v42 = vpop.eup %9812  ;;  %v9754_v32 = vld [vmem:[%s10626_s8 + $0x58] sm:$0xff]  }
 0x53d   :  { %9814 = vrcp.f32 %v6968_v30  ;;  %6762 = vmatpush1.bf16.msra.mxu0 %v9690_v14  ;;  %v9748_v14 = vld [vmem:[%s10626_s8 + $0x40] sm:$0xff]   ;;  %v9752_v30 = vld [vmem:[%s10626_s8 + $0x50] sm:$0xff]  }
 0x53e   :  { %9816 = vtanh.f32 %v10469_v11  ;;  %6926 = vmatpush1.bf16.msra.mxu1 %v9693_v49  ;;  %6763 = vmatprep.subr.bf16.mxu0 %v9698_v29  ;;  %v9711_v11 = vld [vmem:[#allocation9 + $0x16a8] ss:$48 sps:$4 sm:$0xff]   ;;  %v9750_v49 = vld [vmem:[%s10626_s8 + $0x48] sm:$0xff]  }
 0x53f   :  { %9818 = vrcp.f32 %v6969_v33  ;;  %6927 = vmatprep.subr.bf16.mxu1 %v9701_v15  ;;  %v9751_v29 = vld [vmem:[%s10626_s8 + $0x8] sm:$0xff]   ;;  %v9753_v15 = vld [vmem:[%s10626_s8 + $0x10] sm:$0xff]   ;;  %v9755_v33 = vld [vmem:[%s10626_s8 + $0x18] sm:$0xff]  }
 0x541   :  { %6764 = vmatpush1.bf16.msra.mxu0 %v9696_v9  ;;  %v9756_v9 = vld [vmem:[%s10626_s8 + $0x60] sm:$0xff]  }
 0x542   :  { %6928 = vmatpush1.bf16.msra.mxu1 %v9699_v35  ;;  %6765 = vmatprep.subr.bf16.mxu0 %v9704_v36  ;;  %v9757_v35 = vld [vmem:[%s10626_s8 + $0x20] sm:$0xff]   ;;  %v9758_v36 = vld [vmem:[%s10626_s8 + $0x68] sm:$0xff]  }
 0x543   :  { %6929 = vmatprep.subr.bf16.mxu1 %v9707_v38  ;;  %v9759_v38 = vld [vmem:[%s10626_s8 + $0x28] sm:$0xff]  }
 0x545   :  { %6766 = vmatpush1.bf16.msra.mxu0 %v9702_v39  ;;  %v9760_v39 = vld [vmem:[%s10626_s8 + $0x70] sm:$0xff]  }
 0x546   :  { %6930 = vmatpush1.bf16.msra.mxu1 %v9705_v40  ;;  %6767 = vmatprep.subr.bf16.mxu0 %v9710_v59  ;;  %v9761_v40 = vld [vmem:[%s10626_s8 + $0x30] sm:$0xff]   ;;  %v9762_v59 = vld [vmem:[%s10626_s8 + $0x78] sm:$0xff]  }
 0x547   :  { %v9815_v44 = vpop.eup %9814  ;;  %6931 = vmatprep.subr.bf16.mxu1 %v9713_v56  ;;  %v9763_v56 = vld [vmem:[%s10626_s8 + $0x38] sm:$0xff]  }
 0x548   :  { %v9817_v45 = vpop.eup %9816  ;;  %v10501_v53 = vmul.f32 %v9815_v44, %v9813_v42  ;;  %v2095_v42 = vrot.slane %v10487_v31, %v882_v27 }
 0x549   :  { %v9819_v54 = vpop.eup %9818  ;;  %6768 = vmatpush1.bf16.msra.mxu0 %v9708_v41  ;;  %v2091_v41 = vrot.slane %v10487_v31, %v878_v7 }
 0x54a   :  { %6932 = vmatpush1.bf16.msra.mxu1 %v9711_v11  ;;  %6769 = vmatprep.subr.bf16.mxu0 %v9716_v43  ;;  %v6979_v8 = vmul.f32 %v9819_v54, %v9817_v45  ;;  %v7012_v24 = vpack.c.bf16 %v10501_v53, %v10501_v53  ;;  %v8427_v43 = vadd.f32 %v10497_v3, %v2095_v42  ;;  %v2061_v53 = vld [vmem:[#allocation10 + $0x8] sm:$0xf] }
 0x54b   :  { %6933 = vmatprep.subr.bf16.mxu1 %v9719_v61  ;;  %v8426_v11 = vadd.f32 %v10495_v0, %v2091_v41  ;;  %v2107_v7 = vrot.slane %v2061_v53, %v10404_v46  ;;  %v2103_v47 = vrot.slane %v2061_v53, %v10370_v50  ;;  %v2111_v27 = vrot.slane %v2061_v53, %v10373_v51 }
 0x54c   :  { %v7013_v5 = vpack.c.bf16 %v6979_v8, %v6979_v8  ;;  %v8252_v61 = vmul.f32 -1.442695, %v8427_v43 }
 0x54d   :  { %6770 = vmatpush1.bf16.msra.mxu0 %v9714_v55  ;;  %v8251_v44 = vmul.f32 -1.442695, %v8426_v11 }
 0x54e   :  { %6934 = vmatpush1.bf16.msra.mxu1 %v9717_v57  ;;  %6771 = vmatprep.subr.bf16.mxu0 %v9722_v58  ;;  %v2099_v57 = vrot.slane %v2061_v53, %v10365_v48 }
 0x54f   :  { %6935 = vmatprep.subr.bf16.mxu1 %v9725_v60  ;;  %9820 = vpow2.f32 %v8251_v44 }
 0x550   :  { %9822 = vpow2.f32 %v8252_v61 }
 0x551   :  { %6772 = vmatpush1.bf16.msra.mxu0 %v9720_v12 }
 0x552   :  { %6936 = vmatpush1.bf16.msra.mxu1 %v9723_v62  ;;  %6773 = vmatprep.subr.bf16.mxu0 %v9728_v63 }
 0x553   :  { %6937 = vmatprep.subr.bf16.mxu1 %v9731_v1 }
 0x555   :  { %6774 = vmatpush1.bf16.msra.mxu0 %v9726_v2 }
 0x556   :  { %6938 = vmatpush1.bf16.msra.mxu1 %v9729_v25  ;;  %8376 = vmatprep.subr.bf16.mxu0 %v9748_v14 }
 0x557   :  { %8398 = vmatprep.subr.bf16.mxu1 %v9732_v34 }
 0x558   :  { %6776 = vmatmul.mubr.bf16.vlgmr.msra.gmra.mrb[24].mxu0 %v10445_v28 }
 0x559   :  { %6940 = vmatmul.mubr.bf16.vlgmr.msra.gmra.mrb[24].mxu1 %v10445_v28  ;;  %v9738_v28 = vld [vmem:[%s10625_s7 + $0x58] sm:$0xff]   ;;  %8377 = vmatpush3.bf16.msra.mxu0 %v9749_v26  ;;  %v9821_v45 = vpop.eup %9820 }
 0x55a   :  { %8399 = vmatpush3.bf16.msra.mxu1 %v9733_v4  ;;  %7344 = vmatprep.mubr.bf16.mxu1 %v7013_v5  ;;  %v9823_v54 = vpop.eup %9822  ;;  %v6986_v55 = vadd.f32 1.0, %v9821_v45 }
 0x55b   :  { %8400 = vmatprep.subr.bf16.mxu1 %v9734_v52  ;;  %8378 = vmatprep.subr.bf16.mxu0 %v9750_v49  ;;  %v6987_v58 = vadd.f32 1.0, %v9823_v54 }
 0x55c   :  { %9824 = vrcp.f32 %v6986_v55 }
 0x55d   :  { %8379 = vmatpush3.bf16.msra.mxu0 %v9751_v29  ;;  %9826 = vrcp.f32 %v6987_v58 }
 0x55e   :  { %8401 = vmatpush3.bf16.msra.mxu1 %v9735_v6  ;;  %8380 = vmatprep.subr.bf16.mxu0 %v9752_v30 }
 0x55f   :  { %8402 = vmatprep.subr.bf16.mxu1 %v9736_v10 }
 0x561   :  { %8381 = vmatpush3.bf16.msra.mxu0 %v9753_v15 }
 0x562   :  { %8403 = vmatpush3.bf16.msra.mxu1 %v9737_v37  ;;  %8382 = vmatprep.subr.bf16.mxu0 %v9754_v32 }
 0x563   :  { %8404 = vmatprep.subr.bf16.mxu1 %v9738_v28 }
 0x565   :  { %8383 = vmatpush3.bf16.msra.mxu0 %v9755_v33 }
 0x566   :  { %8405 = vmatpush3.bf16.msra.mxu1 %v9739_v13  ;;  %8384 = vmatprep.subr.bf16.mxu0 %v9756_v9  ;;  %v9825_v51 = vpop.eup %9824  ;;  %v8287_v9 = vld [vmem:[#allocation12] ss:$0 sm:$0xff] }
 0x567   :  { %8406 = vmatprep.subr.bf16.mxu1 %v9740_v16  ;;  %v9827_v34 = vpop.eup %9826 }
 0x569   :  { %8385 = vmatpush3.bf16.msra.mxu0 %v9757_v35 }
 0x56a   :  { %8407 = vmatpush3.bf16.msra.mxu1 %v9741_v17  ;;  %8386 = vmatprep.subr.bf16.mxu0 %v9758_v36 }
 0x56b   :  { %8408 = vmatprep.subr.bf16.mxu1 %v9742_v18 }
 0x56d   :  { %8387 = vmatpush3.bf16.msra.mxu0 %v9759_v38 }
 0x56e   :  { %8409 = vmatpush3.bf16.msra.mxu1 %v9743_v19  ;;  %8388 = vmatprep.subr.bf16.mxu0 %v9760_v39 }
 0x56f   :  { %8410 = vmatprep.subr.bf16.mxu1 %v9744_v20 }
 0x571   :  { %8389 = vmatpush3.bf16.msra.mxu0 %v9761_v40 }
 0x572   :  { %8411 = vmatpush3.bf16.msra.mxu1 %v9745_v21  ;;  %8390 = vmatprep.subr.bf16.mxu0 %v9762_v59 }
 0x573   :  { %8412 = vmatprep.subr.bf16.mxu1 %v9746_v22 }
 0x575   :  { %8391 = vmatpush3.bf16.msra.mxu0 %v9763_v56 }
 0x576   :  { %8413 = vmatpush3.bf16.msra.mxu1 %v9747_v23 }
 0x579   :  { %7345 = vmatmul.mubr.bf16.vlgmr.msra.gmra.mrb[28].mxu1 %v7012_v24 }
 0x62b   :  { %v6777_v31 = vpop.f32.mrb[24].mxu0 }
 0x62c   :  { %v8428_v0 = vadd.f32 %v6777_v31, %v2099_v57  ;;  %v6941_v3 = vpop.f32.mrb[24].mxu1  ;;  %v6779_v8 = vpop.f32.mrb[25].mxu0 }
 0x62d   :  { %v8430_v60 = vadd.f32 %v6941_v3, %v2107_v7  ;;  %v8429_v12 = vadd.f32 %v6779_v8, %v2103_v47  ;;  %v6943_v62 = vpop.f32.mrb[25].mxu1  ;;  %v6781_v63 = vpop.f32.mrb[26].mxu0 }
 0x62e   :  { %9828 = vtanh.f32 %v8428_v0  ;;  %v8431_v1 = vadd.f32 %v6943_v62, %v2111_v27  ;;  %v6945_v48 = vpop.f32.mrb[26].mxu1  ;;  %v6782_v2 = vpop.f32.mrb[27].mxu0 }
 0x62f   :  { %v8253_v25 = vmul.f32 -1.442695, %v8430_v60  ;;  %9830 = vtanh.f32 %v8429_v12  ;;  %v6946_v46 = vpop.f32.mrb[27].mxu1 }
 0x630   :  { %v8254_v50 = vmul.f32 -1.442695, %v8431_v1 }
 0x631   :  { %9832 = vpow2.f32 %v8253_v25 }
 0x632   :  { %9834 = vpow2.f32 %v8254_v50 }
 0x638   :  { %v9829_v4 = vpop.eup %9828 }
 0x639   :  { %v9831_v52 = vpop.eup %9830  ;;  %v7006_v5 = vmul.f32 %v9829_v4, %v9825_v51 }
 0x63a   :  { %v7007_v6 = vmul.f32 %v9831_v52, %v9827_v34 }
 0x63b   :  { %v9833_v10 = vpop.eup %9832  ;;  %9836 = vtanh.f32 %v7006_v5 }
 0x63c   :  { %v9835_v37 = vpop.eup %9834  ;;  %v7000_v28 = vadd.f32 1.0, %v9833_v10  ;;  %9838 = vtanh.f32 %v7007_v6 }
 0x63d   :  { %v7001_v13 = vadd.f32 1.0, %v9835_v37 }
 0x63e   :  { %9840 = vrcp.f32 %v7000_v28 }
 0x63f   :  { %9842 = vrcp.f32 %v7001_v13 }
 0x645   :  { %v9837_v16 = vpop.eup %9836 }
 0x646   :  { %v9839_v17 = vpop.eup %9838 }
 0x648   :  { %v9841_v18 = vpop.eup %9840 }
 0x649   :  { %v9843_v19 = vpop.eup %9842  ;;  %v7010_v20 = vmul.f32 %v9841_v18, %v9837_v16 }
 0x64a   :  { %v7011_v21 = vmul.f32 %v9843_v19, %v9839_v17 }
 0x64b   :  { %v7046_v14 = vpack.c.bf16 %v7010_v20, %v7010_v20 }
 0x64c   :  { %v8414_v22 = vpop.f32.mrb[28].mxu1  ;;  %v7047_v23 = vpack.c.bf16 %v7011_v21, %v7011_v21 }
 0x64d   :  { %v8415_v24 = vpop.f32.mrb[29].mxu1 }
 0x64e   :  { %v8416_v26 = vadd.f32 %v8415_v24, %v8414_v22  ;;  %7208 = vmatprep.mubr.bf16.mxu0 %v7047_v23  ;;  %v8417_v49 = vpop.f32.mrb[30].mxu1 }
 0x64f   :  { %7209 = vmatmul.mubr.bf16.vlgmr.msra.gmra.mrb[28].mxu0 %v7046_v14  ;;  %v8418_v29 = vpop.f32.mrb[31].mxu1 }
 0x722   :  { %v8392_v30 = vpop.f32.mrb[28].mxu0 }
 0x723   :  { %v8393_v15 = vpop.f32.mrb[29].mxu0 }
 0x724   :  { %v8394_v32 = vadd.f32 %v8393_v15, %v8392_v30  ;;  %v8395_v33 = vpop.f32.mrb[30].mxu0 }
 0x725   :  { %v8396_v35 = vpop.f32.mrb[31].mxu0 }
 0x726   :  { %v7347_v36 = vadd.f32 %v8416_v26, %v8394_v32 }
 0x728   :  { %v7359_v38 = vadd.f32 %v8287_v9, %v7347_v36 }
 0x72a   :  { %7361 = vst.msk [vmem:[%s10628_s10] sm:$0xff] %vm7360_vm1, %v7359_v38 }
 0x72b   :  { %7366 = vsyncpa [#allocation3], 1 }
 0x72c   :  { %7367 = vsyncpa [#allocation5], 1 }
 0x72d   :  { %7368 = vsyncpa [#allocation8], 1 }
 0x72e   :  { %7369 = vsyncpa [#allocation11], 1 }

</bundles_post_ra>
